<compile_context>
chip_gen: v6e
topology: v6e:2x2x1
jax: 0.10.0
libtpu: 0.0.40
codegen_flags: <defaults>
</compile_context>

<pallas_src>
import math
import functools

import jax
import jax.numpy as jnp
from jax import lax
from jax.experimental import pallas as pl
from jax.experimental.pallas import tpu as pltpu

VMEM_SPEC = pl.BlockSpec(memory_space=pltpu.MemorySpace.VMEM)


# -----------------------------------------------------------------------------
# Fused kernel
# -----------------------------------------------------------------------------
def rnn_crf_fused_kernel(
    # inputs
    x_ref,
    w_gi1_ref, b_gi1_ref, whh1_ref, bhn1_ref,
    kp_ref, vp_ref, wq_f_ref, wq_b_ref, bq_ref, wo_ref, bo_ref,
    w2_encf_ref, w2_encb_ref, w2_attn_ref, b_gi2_ref, whh2_ref, bhn2_ref,
    w_emit_f_ref, w_emit_b_ref, b_emit_ref,
    start_ref, end_ref, transT_ref,
    # output
    tags_ref,
    # scratch
    gi1f_scr, gi1b_scr, h1f_scr, h1b_scr,
    gi2f_scr, gi2b_scr, h2f_scr, h2b_scr,
    em_scr, bp_scr,
    *, num_heads):
    f32 = jnp.float32
    S, B, _ = x_ref.shape
    H = whh1_ref.shape[-1]
    T, E = kp_ref.shape
    HD = E // num_heads

    # ---------------- helpers ------------------------------------------------
    def store_gate_blocks(gi, f_scr, b_scr):
        # gi: (S, B, 6H), column blocks [f_r|f_z|f_n|b_r|b_z|b_n].
        # Store gate-major so the recurrence indexes gates on the leading dim.
        for d, scr in enumerate((f_scr, b_scr)):
            for g in range(3):
                c = (3 * d + g) * H
                scr[g * S:(g + 1) * S] = gi[:, :, c:c + H]

    def run_bigru(gf_scr, gb_scr, hf_scr, hb_scr, whh_ref, bhn_ref):
        # whh_ref: (6, H, H) = [f_r, f_z, f_n, b_r, b_z, b_n]; bhn_ref: (2, 1, H)
        wrf, wzf, wnf = whh_ref[0], whh_ref[1], whh_ref[2]
        wrb, wzb, wnb = whh_ref[3], whh_ref[4], whh_ref[5]
        bhn = bhn_ref[...]
        bnf, bnb = bhn[0], bhn[1]
        h0 = jnp.zeros((B, H), f32)

        def body(i, carry):
            hf, hb = carry
            tf = i
            tb = S - 1 - i
            # forward direction, step tf  (r/z biases pre-folded into gi)
            rf = jax.nn.sigmoid(gf_scr[tf] +
                                jnp.dot(hf, wrf, preferred_element_type=f32))
            zf = jax.nn.sigmoid(gf_scr[S + tf] +
                                jnp.dot(hf, wzf, preferred_element_type=f32))
            nf = jnp.tanh(gf_scr[2 * S + tf] +
                          rf * (jnp.dot(hf, wnf, preferred_element_type=f32) + bnf))
            hf = (1.0 - zf) * nf + zf * hf
            hf_scr[tf] = hf
            # backward direction, step tb (interleaved for ILP)
            rb = jax.nn.sigmoid(gb_scr[tb] +
                                jnp.dot(hb, wrb, preferred_element_type=f32))
            zb = jax.nn.sigmoid(gb_scr[S + tb] +
                                jnp.dot(hb, wzb, preferred_element_type=f32))
            nb = jnp.tanh(gb_scr[2 * S + tb] +
                          rb * (jnp.dot(hb, wnb, preferred_element_type=f32) + bnb))
            hb = (1.0 - zb) * nb + zb * hb
            hb_scr[tb] = hb
            return hf, hb

        lax.fori_loop(0, S, body, (h0, h0))

    # ---------------- stage 1: first bidirectional GRU -----------------------
    x = x_ref[...]                                                   # (S, B, F1)
    gi1 = jnp.einsum('sbf,fg->sbg', x, w_gi1_ref[...],
                     preferred_element_type=f32) + b_gi1_ref[...]    # (S, B, 6H)
    store_gate_blocks(gi1, gi1f_scr, gi1b_scr)
    run_bigru(gi1f_scr, gi1b_scr, h1f_scr, h1b_scr, whh1_ref, bhn1_ref)

    encf = h1f_scr[...]                                              # (S, B, H)
    encb = h1b_scr[...]                                              # (S, B, H)

    # ---------------- stage 2: multi-head attention (K/V batch-shared) -------
    q = (jnp.einsum('sbh,he->sbe', encf, wq_f_ref[...], preferred_element_type=f32)
         + jnp.einsum('sbh,he->sbe', encb, wq_b_ref[...], preferred_element_type=f32)
         + bq_ref[...])                                              # (S, B, E)
    kp = kp_ref[...]                                                 # (T, E)
    vp = vp_ref[...]                                                 # (T, E)
    wo = wo_ref[...]                                                 # (E, E)
    scale = 1.0 / math.sqrt(HD)
    attn = jnp.zeros((S, B, E), f32)
    for hd in range(num_heads):
        c = hd * HD
        qh = q[:, :, c:c + HD] * scale                               # (S, B, HD)
        scores = jnp.einsum('sbd,td->sbt', qh, kp[:, c:c + HD],
                            preferred_element_type=f32)              # (S, B, T)
        probs = jax.nn.softmax(scores, axis=-1)
        ctx = jnp.einsum('sbt,td->sbd', probs, vp[:, c:c + HD],
                         preferred_element_type=f32)                 # (S, B, HD)
        attn = attn + jnp.einsum('sbd,de->sbe', ctx, wo[c:c + HD, :],
                                 preferred_element_type=f32)         # out-proj, no concat
    attn = attn + bo_ref[...]

    # ---------------- stage 3: second bidirectional GRU ----------------------
    # decoder_input = [encf | encb | attn]  -> split matmuls instead of concat
    gi2 = (jnp.einsum('sbh,hg->sbg', encf, w2_encf_ref[...], preferred_element_type=f32)
           + jnp.einsum('sbh,hg->sbg', encb, w2_encb_ref[...], preferred_element_type=f32)
           + jnp.einsum('sbe,eg->sbg', attn, w2_attn_ref[...], preferred_element_type=f32)
           + b_gi2_ref[...])                                         # (S, B, 6H)
    store_gate_blocks(gi2, gi2f_scr, gi2b_scr)
    run_bigru(gi2f_scr, gi2b_scr, h2f_scr, h2b_scr, whh2_ref, bhn2_ref)

    # ---------------- stage 4: emissions (folded linear + NE dot product) ----
    em_scr[...] = (jnp.einsum('sbh,ht->sbt', h2f_scr[...], w_emit_f_ref[...],
                              preferred_element_type=f32)
                   + jnp.einsum('sbh,ht->sbt', h2b_scr[...], w_emit_b_ref[...],
                                preferred_element_type=f32)
                   + b_emit_ref[...])                                # (S, B, T)

    # ---------------- stage 5: CRF Viterbi (max-plus DP + in-kernel backtrace)
    transT = transT_ref[...]                                         # transT[next, prev]
    score0 = start_ref[...] + em_scr[0]                              # (B, T)

    def vit_body(t, score):
        combined = score[:, None, :] + transT[None, :, :]            # (B, Tnext, Tprev)
        best = jnp.max(combined, axis=-1, keepdims=True)             # (B, Tnext, 1)
        idx = lax.broadcasted_iota(jnp.int32, (B, T, T), 2)
        # first-occurrence argmax (matches torch.max tie-breaking)
        bp_scr[t] = jnp.min(jnp.where(combined == best, idx, T),
                            axis=-1).astype(jnp.int32)               # (B, Tnext)
        return best[..., 0] + em_scr[t]

    final = lax.fori_loop(1, S, vit_body, score0) + end_ref[...]     # (B, T)

    lane_T = lax.broadcasted_iota(jnp.int32, (B, T), 1)
    lane_S = lax.broadcasted_iota(jnp.int32, (B, S), 1)
    best_f = jnp.max(final, axis=-1, keepdims=True)                  # (B, 1)
    last = jnp.min(jnp.where(final == best_f, lane_T, T), axis=-1,
                   keepdims=True).astype(jnp.int32)                  # (B, 1)
    tags0 = jnp.where(lane_S == (S - 1), jnp.broadcast_to(last, (B, S)), 0)

    def bt_body(i, carry):
        cur, tags = carry
        t = S - 1 - i
        bp_t = bp_scr[t]                                             # (B, T) int32
        # one-hot gather: prev[b] = bp_t[b, cur[b]]
        prev = jnp.sum(jnp.where(lane_T == cur, bp_t, 0),
                       axis=-1, keepdims=True)                       # (B, 1)
        tags = jnp.where(lane_S == (t - 1), jnp.broadcast_to(prev, (B, S)), tags)
        return prev, tags

    _, tags = lax.fori_loop(0, S - 1, bt_body, (last, tags0))
    tags_ref[...] = tags                                             # (B, S) int32


# -----------------------------------------------------------------------------
# Wrapper
# -----------------------------------------------------------------------------
def rnn_crf_forward(prep, config, inputs):
    B, S = inputs.shape
    H = config['hidden_size']
    T = config['number_of_tags']

    # feature lookup (replaces host-side pickle dict lookups), time-major (S, B, 188)
    x = prep['feat_table'][inputs.T].astype(jnp.float32)

    args = (x,
            prep['w_gi1'], prep['b_gi1'], prep['whh1'], prep['bhn1'],
            prep['kp'], prep['vp'], prep['wq_f'], prep['wq_b'], prep['bq'],
            prep['wo'], prep['bo'],
            prep['w2_encf'], prep['w2_encb'], prep['w2_attn'],
            prep['b_gi2'], prep['whh2'], prep['bhn2'],
            prep['w_emit_f'], prep['w_emit_b'], prep['b_emit'],
            prep['crf_start'], prep['crf_end'], prep['crf_transT'])

    kernel = functools.partial(rnn_crf_fused_kernel,
                               num_heads=config['number_of_heads'])
    return pl.pallas_call(
        kernel,
        out_shape=jax.ShapeDtypeStruct((B, S), jnp.int32),
        in_specs=[VMEM_SPEC] * len(args),
        out_specs=VMEM_SPEC,
        scratch_shapes=[
            pltpu.VMEM((3 * S, B, H), jnp.float32),   # GRU1 fwd input proj (gate-major)
            pltpu.VMEM((3 * S, B, H), jnp.float32),   # GRU1 bwd input proj
            pltpu.VMEM((S, B, H), jnp.float32),       # GRU1 fwd hidden states
            pltpu.VMEM((S, B, H), jnp.float32),       # GRU1 bwd hidden states
            pltpu.VMEM((3 * S, B, H), jnp.float32),   # GRU2 fwd input proj
            pltpu.VMEM((3 * S, B, H), jnp.float32),   # GRU2 bwd input proj
            pltpu.VMEM((S, B, H), jnp.float32),       # GRU2 fwd hidden states
            pltpu.VMEM((S, B, H), jnp.float32),       # GRU2 bwd hidden states
            pltpu.VMEM((S, B, T), jnp.float32),       # emissions
            pltpu.VMEM((S, B, T), jnp.int32),         # Viterbi backpointers
        ],
    )(*args)


# -----------------------------------------------------------------------------
# Deterministic synthetic parameters (PyTorch-equivalent layout)
# -----------------------------------------------------------------------------
def init_params(key, cfg):
    H = cfg['hidden_size']
    T = cfg['number_of_tags']
    V = cfg['word_vocab_size']
    E = 2 * H
    F1 = 14 + 128 + 46          # p_dist + glove + pos features
    F2 = 4 * H                  # second GRU input

    ks = iter(jax.random.split(key, 64))

    def nrm(shape, scale=0.1):
        return (scale * jax.random.normal(next(ks), shape)).astype(jnp.float32)

    def gru(fin):
        def one_dir():
            return dict(w_ih=nrm((fin, 3 * H)), w_hh=nrm((H, 3 * H)),
                        b_ih=nrm((1, 3 * H)), b_hh=nrm((1, 3 * H)))
        f, b = one_dir(), one_dir()
        return dict(w_ih_f=f['w_ih'], w_hh_f=f['w_hh'], b_ih_f=f['b_ih'], b_hh_f=f['b_hh'],
                    w_ih_b=b['w_ih'], w_hh_b=b['w_hh'], b_ih_b=b['b_ih'], b_hh_b=b['b_hh'])

    ne_table = nrm((T, T)).at[0].set(0.0)                            # padding_idx=0

    return dict(
        p_dist_table=nrm((V, 14), 1.0),
        glove_table=nrm((V, 128), 1.0),
        pos_table=nrm((V, 46), 1.0),
        ne_table=ne_table,
        gru1=gru(F1),
        gru2=gru(F2),
        mha=dict(wq=nrm((E, E)), wk=nrm((T, E)), wv=nrm((T, E)),
                 bq=nrm((1, E)), bk=nrm((1, E)), bv=nrm((1, E)),
                 wo=nrm((E, E)), bo=nrm((1, E))),
        w_lin=nrm((E, T)), b_lin=nrm((1, T)),
        crf_start=nrm((1, T)), crf_end=nrm((1, T)), crf_trans=nrm((T, T)),
    )


def prepare_params(params, cfg):
    """One-time (trace-time) parameter repacking / constant folding for the fused kernel."""
    H = cfg['hidden_size']
    T = cfg['number_of_tags']
    ne = params['ne_table']

    def gru_pack(g):
        # input-projection weights, both dirs: (Fin, 6H) cols [f_r|f_z|f_n|b_r|b_z|b_n]
        w_gi = jnp.concatenate([g['w_ih_f'], g['w_ih_b']], axis=1)

        def bias_dir(b_ih, b_hh):
            # fold b_ih + b_hh for r,z; keep b_ih only for n (b_hh_n goes inside r*(.))
            return jnp.concatenate([b_ih[:, :H] + b_hh[:, :H],
                                    b_ih[:, H:2 * H] + b_hh[:, H:2 * H],
                                    b_ih[:, 2 * H:]], axis=1)

        b_gi = jnp.concatenate([bias_dir(g['b_ih_f'], g['b_hh_f']),
                                bias_dir(g['b_ih_b'], g['b_hh_b'])], axis=1)

        def split3(w):                                               # (H,3H) -> (3,H,H)
            return jnp.stack([w[:, :H], w[:, H:2 * H], w[:, 2 * H:]], axis=0)

        whh = jnp.concatenate([split3(g['w_hh_f']), split3(g['w_hh_b'])], axis=0)  # (6,H,H)
        bhn = jnp.stack([g['b_hh_f'][:, 2 * H:], g['b_hh_b'][:, 2 * H:]], axis=0)  # (2,1,H)
        return w_gi, b_gi, whh, bhn

    w_gi1, b_gi1, whh1, bhn1 = gru_pack(params['gru1'])
    w_gi2, b_gi2, whh2, bhn2 = gru_pack(params['gru2'])               # w_gi2: (4H, 6H)

    mha = params['mha']
    inv_sqrt_T = 1.0 / math.sqrt(T)
    # fold hidden2num_tag + scaled dot against NE table into one matmul
    w_emit = jnp.dot(params['w_lin'], ne.T) * inv_sqrt_T              # (E, T)
    b_emit = jnp.dot(params['b_lin'], ne.T) * inv_sqrt_T              # (1, T)

    return dict(
        feat_table=jnp.concatenate([params['p_dist_table'],
                                    params['glove_table'],
                                    params['pos_table']], axis=1),    # (V, 188)
        w_gi1=w_gi1, b_gi1=b_gi1, whh1=whh1, bhn1=bhn1,
        # batch-shared K/V projections of the NE table
        kp=jnp.dot(ne, mha['wk']) + mha['bk'],                        # (T, E)
        vp=jnp.dot(ne, mha['wv']) + mha['bv'],                        # (T, E)
        wq_f=mha['wq'][:H], wq_b=mha['wq'][H:],
        bq=mha['bq'], wo=mha['wo'], bo=mha['bo'],
        # second GRU input weights split by source (enc_fwd | enc_bwd | attn)
        w2_encf=w_gi2[:H], w2_encb=w_gi2[H:2 * H], w2_attn=w_gi2[2 * H:],
        b_gi2=b_gi2, whh2=whh2, bhn2=bhn2,
        w_emit_f=w_emit[:H], w_emit_b=w_emit[H:], b_emit=b_emit,
        crf_start=params['crf_start'], crf_end=params['crf_end'],
        crf_transT=params['crf_trans'].T,                             # [next, prev]
    )


if __name__ == "__main__":
    config = dict(word_vocab_size=50, embedding_size=128, hidden_size=32,
                  number_of_tags=14, number_of_heads=2, dropout=0.1)

    key = jax.random.PRNGKey(0)
    pkey, ikey = jax.random.split(key)
    params = init_params(pkey, config)
    prep = prepare_params(params, config)

    B, S = 2, 8
    inputs = jax.random.randint(ikey, (B, S), 1, config['word_vocab_size'], dtype=jnp.int32)

    tags = rnn_crf_forward(prep, config, inputs)   # (B, S) decoded tag ids
    tags = jax.block_until_ready(tags)
    assert tags.shape == (B, S) and tags.dtype == jnp.int32
    print("KERNEL_OK")
</pallas_src>

<mosaic_0001>
module attributes {stable_mosaic.version = 11 : i64} {
  func.func @rnn_crf_fused_kernel(%arg0: memref<8x2x188xf32, #tpu.memory_space<vmem>>, %arg1: memref<188x192xf32, #tpu.memory_space<vmem>>, %arg2: memref<1x192xf32, #tpu.memory_space<vmem>>, %arg3: memref<6x32x32xf32, #tpu.memory_space<vmem>>, %arg4: memref<2x1x32xf32, #tpu.memory_space<vmem>>, %arg5: memref<14x64xf32, #tpu.memory_space<vmem>>, %arg6: memref<14x64xf32, #tpu.memory_space<vmem>>, %arg7: memref<32x64xf32, #tpu.memory_space<vmem>>, %arg8: memref<32x64xf32, #tpu.memory_space<vmem>>, %arg9: memref<1x64xf32, #tpu.memory_space<vmem>>, %arg10: memref<64x64xf32, #tpu.memory_space<vmem>>, %arg11: memref<1x64xf32, #tpu.memory_space<vmem>>, %arg12: memref<32x192xf32, #tpu.memory_space<vmem>>, %arg13: memref<32x192xf32, #tpu.memory_space<vmem>>, %arg14: memref<64x192xf32, #tpu.memory_space<vmem>>, %arg15: memref<1x192xf32, #tpu.memory_space<vmem>>, %arg16: memref<6x32x32xf32, #tpu.memory_space<vmem>>, %arg17: memref<2x1x32xf32, #tpu.memory_space<vmem>>, %arg18: memref<32x14xf32, #tpu.memory_space<vmem>>, %arg19: memref<32x14xf32, #tpu.memory_space<vmem>>, %arg20: memref<1x14xf32, #tpu.memory_space<vmem>>, %arg21: memref<1x14xf32, #tpu.memory_space<vmem>>, %arg22: memref<1x14xf32, #tpu.memory_space<vmem>>, %arg23: memref<14x14xf32, #tpu.memory_space<vmem>>, %arg24: memref<2x8xi32, #tpu.memory_space<vmem>>, %arg25: memref<24x2x32xf32, #tpu.memory_space<vmem>>, %arg26: memref<24x2x32xf32, #tpu.memory_space<vmem>>, %arg27: memref<8x2x32xf32, #tpu.memory_space<vmem>>, %arg28: memref<8x2x32xf32, #tpu.memory_space<vmem>>, %arg29: memref<24x2x32xf32, #tpu.memory_space<vmem>>, %arg30: memref<24x2x32xf32, #tpu.memory_space<vmem>>, %arg31: memref<8x2x32xf32, #tpu.memory_space<vmem>>, %arg32: memref<8x2x32xf32, #tpu.memory_space<vmem>>, %arg33: memref<8x2x14xf32, #tpu.memory_space<vmem>>, %arg34: memref<8x2x14xi32, #tpu.memory_space<vmem>>) attributes {dimension_semantics = [], scalar_prefetch = 0 : i64, scratch_operands = 10 : i64, tpu.core_type = #tpu.core_type<tc>} {
    %c0 = arith.constant 0 : index
    %c0_0 = arith.constant 0 : index
    %c0_1 = arith.constant 0 : index
    %0 = vector.load %arg0[%c0, %c0_0, %c0_1] : memref<8x2x188xf32, #tpu.memory_space<vmem>>, vector<8x2x188xf32>
    %c0_2 = arith.constant 0 : index
    %c0_3 = arith.constant 0 : index
    %1 = vector.load %arg1[%c0_2, %c0_3] : memref<188x192xf32, #tpu.memory_space<vmem>>, vector<188x192xf32>
    "tpu.trace_start"() <{level = 10 : i32, message = "sbf,fg->sbg"}> : () -> ()
    %cst = arith.constant dense<0.000000e+00> : vector<8x2x192xf32>
    %2 = tpu.matmul %0, %1, %cst {dimension_numbers = #tpu.dot_dimension_numbers<[2], [0], [0, 1], [1], [0, 0, 0, 1, 1, 1], [], []>} : vector<8x2x188xf32>, vector<188x192xf32>, vector<8x2x192xf32> -> vector<8x2x192xf32>
    "tpu.trace_stop"() : () -> ()
    %c0_4 = arith.constant 0 : index
    %c0_5 = arith.constant 0 : index
    %3 = vector.load %arg2[%c0_4, %c0_5] : memref<1x192xf32, #tpu.memory_space<vmem>>, vector<1x192xf32>
    %4 = vector.shape_cast %3 : vector<1x192xf32> to vector<1x1x192xf32>
    %5 = vector.broadcast %4 : vector<1x1x192xf32> to vector<8x2x192xf32>
    %6 = arith.addf %2, %5 : vector<8x2x192xf32>
    %7 = vector.extract_strided_slice %6 {offsets = [0, 0, 0], sizes = [8, 2, 32], strides = [1, 1, 1]} : vector<8x2x192xf32> to vector<8x2x32xf32>
    %c0_6 = arith.constant 0 : index
    %c0_7 = arith.constant 0 : index
    %c0_8 = arith.constant 0 : index
    %8 = vector.load %arg25[%c0_6, %c0_7, %c0_8] : memref<24x2x32xf32, #tpu.memory_space<vmem>>, vector<8x2x32xf32>
    tpu.vector_store %arg25[%c0_6, %c0_7, %c0_8], %7 {strides = array<i32>} : memref<24x2x32xf32, #tpu.memory_space<vmem>>, vector<8x2x32xf32>,
    %9 = vector.extract_strided_slice %6 {offsets = [0, 0, 32], sizes = [8, 2, 32], strides = [1, 1, 1]} : vector<8x2x192xf32> to vector<8x2x32xf32>
    %c8 = arith.constant 8 : index
    %c0_9 = arith.constant 0 : index
    %c0_10 = arith.constant 0 : index
    %10 = vector.load %arg25[%c8, %c0_9, %c0_10] : memref<24x2x32xf32, #tpu.memory_space<vmem>>, vector<8x2x32xf32>
    tpu.vector_store %arg25[%c8, %c0_9, %c0_10], %9 {strides = array<i32>} : memref<24x2x32xf32, #tpu.memory_space<vmem>>, vector<8x2x32xf32>,
    %11 = vector.extract_strided_slice %6 {offsets = [0, 0, 64], sizes = [8, 2, 32], strides = [1, 1, 1]} : vector<8x2x192xf32> to vector<8x2x32xf32>
    %c16 = arith.constant 16 : index
    %c0_11 = arith.constant 0 : index
    %c0_12 = arith.constant 0 : index
    %12 = vector.load %arg25[%c16, %c0_11, %c0_12] : memref<24x2x32xf32, #tpu.memory_space<vmem>>, vector<8x2x32xf32>
    tpu.vector_store %arg25[%c16, %c0_11, %c0_12], %11 {strides = array<i32>} : memref<24x2x32xf32, #tpu.memory_space<vmem>>, vector<8x2x32xf32>,
    %13 = vector.extract_strided_slice %6 {offsets = [0, 0, 96], sizes = [8, 2, 32], strides = [1, 1, 1]} : vector<8x2x192xf32> to vector<8x2x32xf32>
    %c0_13 = arith.constant 0 : index
    %c0_14 = arith.constant 0 : index
    %c0_15 = arith.constant 0 : index
    %14 = vector.load %arg26[%c0_13, %c0_14, %c0_15] : memref<24x2x32xf32, #tpu.memory_space<vmem>>, vector<8x2x32xf32>
    tpu.vector_store %arg26[%c0_13, %c0_14, %c0_15], %13 {strides = array<i32>} : memref<24x2x32xf32, #tpu.memory_space<vmem>>, vector<8x2x32xf32>,
    %15 = vector.extract_strided_slice %6 {offsets = [0, 0, 128], sizes = [8, 2, 32], strides = [1, 1, 1]} : vector<8x2x192xf32> to vector<8x2x32xf32>
    %c8_16 = arith.constant 8 : index
    %c0_17 = arith.constant 0 : index
    %c0_18 = arith.constant 0 : index
    %16 = vector.load %arg26[%c8_16, %c0_17, %c0_18] : memref<24x2x32xf32, #tpu.memory_space<vmem>>, vector<8x2x32xf32>
    tpu.vector_store %arg26[%c8_16, %c0_17, %c0_18], %15 {strides = array<i32>} : memref<24x2x32xf32, #tpu.memory_space<vmem>>, vector<8x2x32xf32>,
    %17 = vector.extract_strided_slice %6 {offsets = [0, 0, 160], sizes = [8, 2, 32], strides = [1, 1, 1]} : vector<8x2x192xf32> to vector<8x2x32xf32>
    %c16_19 = arith.constant 16 : index
    %c0_20 = arith.constant 0 : index
    %c0_21 = arith.constant 0 : index
    %18 = vector.load %arg26[%c16_19, %c0_20, %c0_21] : memref<24x2x32xf32, #tpu.memory_space<vmem>>, vector<8x2x32xf32>
    tpu.vector_store %arg26[%c16_19, %c0_20, %c0_21], %17 {strides = array<i32>} : memref<24x2x32xf32, #tpu.memory_space<vmem>>, vector<8x2x32xf32>,
    %c0_22 = arith.constant 0 : index
    %c0_23 = arith.constant 0 : index
    %c0_24 = arith.constant 0 : index
    %19 = vector.load %arg3[%c0_22, %c0_23, %c0_24] : memref<6x32x32xf32, #tpu.memory_space<vmem>>, vector<1x32x32xf32>
    %20 = vector.shape_cast %19 : vector<1x32x32xf32> to vector<32x32xf32>
    %c1 = arith.constant 1 : index
    %c0_25 = arith.constant 0 : index
    %c0_26 = arith.constant 0 : index
    %21 = vector.load %arg3[%c1, %c0_25, %c0_26] : memref<6x32x32xf32, #tpu.memory_space<vmem>>, vector<1x32x32xf32>
    %22 = vector.shape_cast %21 : vector<1x32x32xf32> to vector<32x32xf32>
    %c2 = arith.constant 2 : index
    %c0_27 = arith.constant 0 : index
    %c0_28 = arith.constant 0 : index
    %23 = vector.load %arg3[%c2, %c0_27, %c0_28] : memref<6x32x32xf32, #tpu.memory_space<vmem>>, vector<1x32x32xf32>
    %24 = vector.shape_cast %23 : vector<1x32x32xf32> to vector<32x32xf32>
    %c3 = arith.constant 3 : index
    %c0_29 = arith.constant 0 : index
    %c0_30 = arith.constant 0 : index
    %25 = vector.load %arg3[%c3, %c0_29, %c0_30] : memref<6x32x32xf32, #tpu.memory_space<vmem>>, vector<1x32x32xf32>
    %26 = vector.shape_cast %25 : vector<1x32x32xf32> to vector<32x32xf32>
    %c4 = arith.constant 4 : index
    %c0_31 = arith.constant 0 : index
    %c0_32 = arith.constant 0 : index
    %27 = vector.load %arg3[%c4, %c0_31, %c0_32] : memref<6x32x32xf32, #tpu.memory_space<vmem>>, vector<1x32x32xf32>
    %28 = vector.shape_cast %27 : vector<1x32x32xf32> to vector<32x32xf32>
    %c5 = arith.constant 5 : index
    %c0_33 = arith.constant 0 : index
    %c0_34 = arith.constant 0 : index
    %29 = vector.load %arg3[%c5, %c0_33, %c0_34] : memref<6x32x32xf32, #tpu.memory_space<vmem>>, vector<1x32x32xf32>
    %30 = vector.shape_cast %29 : vector<1x32x32xf32> to vector<32x32xf32>
    %c0_35 = arith.constant 0 : index
    %c0_36 = arith.constant 0 : index
    %c0_37 = arith.constant 0 : index
    %31 = vector.load %arg4[%c0_35, %c0_36, %c0_37] : memref<2x1x32xf32, #tpu.memory_space<vmem>>, vector<2x1x32xf32>
    %32 = vector.extract_strided_slice %31 {offsets = [0, 0, 0], sizes = [1, 1, 32], strides = [1, 1, 1]} : vector<2x1x32xf32> to vector<1x1x32xf32>
    %33 = vector.shape_cast %32 : vector<1x1x32xf32> to vector<1x32xf32>
    %34 = vector.extract_strided_slice %31 {offsets = [1, 0, 0], sizes = [1, 1, 32], strides = [1, 1, 1]} : vector<2x1x32xf32> to vector<1x1x32xf32>
    %35 = vector.shape_cast %34 : vector<1x1x32xf32> to vector<1x32xf32>
    %cst_38 = arith.constant 0.000000e+00 : f32
    %36 = vector.broadcast %cst_38 : f32 to vector<2x32xf32>
    %c0_i32 = arith.constant 0 : i32
    %c8_i32 = arith.constant 8 : i32
    %37 = arith.addi %c0_i32, %c8_i32 : i32
    %c1_i32 = arith.constant 1 : i32
    %38:2 = scf.for %arg35 = %c0_i32 to %37 step %c1_i32 iter_args(%arg36 = %36, %arg37 = %36) -> (vector<2x32xf32>, vector<2x32xf32>)  : i32 {
      %c7_i32_171 = arith.constant 7 : i32
      %186 = arith.subi %c7_i32_171, %arg35 : i32
      %187 = arith.index_cast %arg35 : i32 to index
      %c0_172 = arith.constant 0 : index
      %c0_173 = arith.constant 0 : index
      %188 = vector.load %arg25[%187, %c0_172, %c0_173] : memref<24x2x32xf32, #tpu.memory_space<vmem>>, vector<1x2x32xf32>
      %189 = vector.shape_cast %188 : vector<1x2x32xf32> to vector<2x32xf32>
      %cst_174 = arith.constant dense<0.000000e+00> : vector<2x32xf32>
      %190 = tpu.matmul %arg36, %20, %cst_174 {dimension_numbers = #tpu.dot_dimension_numbers<[1], [0], [0], [1], [0, 0, 1, 1], [], []>} : vector<2x32xf32>, vector<32x32xf32>, vector<2x32xf32> -> vector<2x32xf32>
      %191 = arith.addf %189, %190 : vector<2x32xf32>
      %192 = arith.negf %191 : vector<2x32xf32>
      %193 = math.exp %192 : vector<2x32xf32>
      %cst_175 = arith.constant 1.000000e+00 : f32
      %194 = vector.broadcast %cst_175 : f32 to vector<2x32xf32>
      %195 = arith.addf %194, %193 : vector<2x32xf32>
      %196 = arith.divf %194, %195 : vector<2x32xf32>
      %c8_i32_176 = arith.constant 8 : i32
      %197 = arith.addi %c8_i32_176, %arg35 : i32
      %198 = arith.index_cast %197 : i32 to index
      %c0_177 = arith.constant 0 : index
      %c0_178 = arith.constant 0 : index
      %199 = vector.load %arg25[%198, %c0_177, %c0_178] : memref<24x2x32xf32, #tpu.memory_space<vmem>>, vector<1x2x32xf32>
      %200 = vector.shape_cast %199 : vector<1x2x32xf32> to vector<2x32xf32>
      %cst_179 = arith.constant dense<0.000000e+00> : vector<2x32xf32>
      %201 = tpu.matmul %arg36, %22, %cst_179 {dimension_numbers = #tpu.dot_dimension_numbers<[1], [0], [0], [1], [0, 0, 1, 1], [], []>} : vector<2x32xf32>, vector<32x32xf32>, vector<2x32xf32> -> vector<2x32xf32>
      %202 = arith.addf %200, %201 : vector<2x32xf32>
      %203 = arith.negf %202 : vector<2x32xf32>
      %204 = math.exp %203 : vector<2x32xf32>
      %cst_180 = arith.constant 1.000000e+00 : f32
      %205 = vector.broadcast %cst_180 : f32 to vector<2x32xf32>
      %206 = arith.addf %205, %204 : vector<2x32xf32>
      %207 = arith.divf %205, %206 : vector<2x32xf32>
      %c16_i32 = arith.constant 16 : i32
      %208 = arith.addi %c16_i32, %arg35 : i32
      %209 = arith.index_cast %208 : i32 to index
      %c0_181 = arith.constant 0 : index
      %c0_182 = arith.constant 0 : index
      %210 = vector.load %arg25[%209, %c0_181, %c0_182] : memref<24x2x32xf32, #tpu.memory_space<vmem>>, vector<1x2x32xf32>
      %211 = vector.shape_cast %210 : vector<1x2x32xf32> to vector<2x32xf32>
      %cst_183 = arith.constant dense<0.000000e+00> : vector<2x32xf32>
      %212 = tpu.matmul %arg36, %24, %cst_183 {dimension_numbers = #tpu.dot_dimension_numbers<[1], [0], [0], [1], [0, 0, 1, 1], [], []>} : vector<2x32xf32>, vector<32x32xf32>, vector<2x32xf32> -> vector<2x32xf32>
      %213 = vector.broadcast %33 : vector<1x32xf32> to vector<2x32xf32>
      %214 = arith.addf %212, %213 : vector<2x32xf32>
      %215 = arith.mulf %196, %214 : vector<2x32xf32>
      %216 = arith.addf %211, %215 : vector<2x32xf32>
      %217 = math.tanh %216 : vector<2x32xf32>
      %cst_184 = arith.constant 1.000000e+00 : f32
      %218 = vector.broadcast %cst_184 : f32 to vector<2x32xf32>
      %219 = arith.subf %218, %207 : vector<2x32xf32>
      %220 = arith.mulf %219, %217 : vector<2x32xf32>
      %221 = arith.mulf %207, %arg36 : vector<2x32xf32>
      %222 = arith.addf %220, %221 : vector<2x32xf32>
      %223 = arith.index_cast %arg35 : i32 to index
      %c0_185 = arith.constant 0 : index
      %c0_186 = arith.constant 0 : index
      %224 = vector.load %arg27[%223, %c0_185, %c0_186] : memref<8x2x32xf32, #tpu.memory_space<vmem>>, vector<1x2x32xf32>
      %225 = vector.shape_cast %224 : vector<1x2x32xf32> to vector<2x32xf32>
      %226 = vector.shape_cast %222 : vector<2x32xf32> to vector<1x2x32xf32>
      tpu.vector_store %arg27[%223, %c0_185, %c0_186], %226 {strides = array<i32>} : memref<8x2x32xf32, #tpu.memory_space<vmem>>, vector<1x2x32xf32>,
      %227 = arith.index_cast %186 : i32 to index
      %c0_187 = arith.constant 0 : index
      %c0_188 = arith.constant 0 : index
      %228 = vector.load %arg26[%227, %c0_187, %c0_188] : memref<24x2x32xf32, #tpu.memory_space<vmem>>, vector<1x2x32xf32>
      %229 = vector.shape_cast %228 : vector<1x2x32xf32> to vector<2x32xf32>
      %cst_189 = arith.constant dense<0.000000e+00> : vector<2x32xf32>
      %230 = tpu.matmul %arg37, %26, %cst_189 {dimension_numbers = #tpu.dot_dimension_numbers<[1], [0], [0], [1], [0, 0, 1, 1], [], []>} : vector<2x32xf32>, vector<32x32xf32>, vector<2x32xf32> -> vector<2x32xf32>
      %231 = arith.addf %229, %230 : vector<2x32xf32>
      %232 = arith.negf %231 : vector<2x32xf32>
      %233 = math.exp %232 : vector<2x32xf32>
      %cst_190 = arith.constant 1.000000e+00 : f32
      %234 = vector.broadcast %cst_190 : f32 to vector<2x32xf32>
      %235 = arith.addf %234, %233 : vector<2x32xf32>
      %236 = arith.divf %234, %235 : vector<2x32xf32>
      %c8_i32_191 = arith.constant 8 : i32
      %237 = arith.addi %c8_i32_191, %186 : i32
      %238 = arith.index_cast %237 : i32 to index
      %c0_192 = arith.constant 0 : index
      %c0_193 = arith.constant 0 : index
      %239 = vector.load %arg26[%238, %c0_192, %c0_193] : memref<24x2x32xf32, #tpu.memory_space<vmem>>, vector<1x2x32xf32>
      %240 = vector.shape_cast %239 : vector<1x2x32xf32> to vector<2x32xf32>
      %cst_194 = arith.constant dense<0.000000e+00> : vector<2x32xf32>
      %241 = tpu.matmul %arg37, %28, %cst_194 {dimension_numbers = #tpu.dot_dimension_numbers<[1], [0], [0], [1], [0, 0, 1, 1], [], []>} : vector<2x32xf32>, vector<32x32xf32>, vector<2x32xf32> -> vector<2x32xf32>
      %242 = arith.addf %240, %241 : vector<2x32xf32>
      %243 = arith.negf %242 : vector<2x32xf32>
      %244 = math.exp %243 : vector<2x32xf32>
      %cst_195 = arith.constant 1.000000e+00 : f32
      %245 = vector.broadcast %cst_195 : f32 to vector<2x32xf32>
      %246 = arith.addf %245, %244 : vector<2x32xf32>
      %247 = arith.divf %245, %246 : vector<2x32xf32>
      %c16_i32_196 = arith.constant 16 : i32
      %248 = arith.addi %c16_i32_196, %186 : i32
      %249 = arith.index_cast %248 : i32 to index
      %c0_197 = arith.constant 0 : index
      %c0_198 = arith.constant 0 : index
      %250 = vector.load %arg26[%249, %c0_197, %c0_198] : memref<24x2x32xf32, #tpu.memory_space<vmem>>, vector<1x2x32xf32>
      %251 = vector.shape_cast %250 : vector<1x2x32xf32> to vector<2x32xf32>
      %cst_199 = arith.constant dense<0.000000e+00> : vector<2x32xf32>
      %252 = tpu.matmul %arg37, %30, %cst_199 {dimension_numbers = #tpu.dot_dimension_numbers<[1], [0], [0], [1], [0, 0, 1, 1], [], []>} : vector<2x32xf32>, vector<32x32xf32>, vector<2x32xf32> -> vector<2x32xf32>
      %253 = vector.broadcast %35 : vector<1x32xf32> to vector<2x32xf32>
      %254 = arith.addf %252, %253 : vector<2x32xf32>
      %255 = arith.mulf %236, %254 : vector<2x32xf32>
      %256 = arith.addf %251, %255 : vector<2x32xf32>
      %257 = math.tanh %256 : vector<2x32xf32>
      %cst_200 = arith.constant 1.000000e+00 : f32
      %258 = vector.broadcast %cst_200 : f32 to vector<2x32xf32>
      %259 = arith.subf %258, %247 : vector<2x32xf32>
      %260 = arith.mulf %259, %257 : vector<2x32xf32>
      %261 = arith.mulf %247, %arg37 : vector<2x32xf32>
      %262 = arith.addf %260, %261 : vector<2x32xf32>
      %263 = arith.index_cast %186 : i32 to index
      %c0_201 = arith.constant 0 : index
      %c0_202 = arith.constant 0 : index
      %264 = vector.load %arg28[%263, %c0_201, %c0_202] : memref<8x2x32xf32, #tpu.memory_space<vmem>>, vector<1x2x32xf32>
      %265 = vector.shape_cast %264 : vector<1x2x32xf32> to vector<2x32xf32>
      %266 = vector.shape_cast %262 : vector<2x32xf32> to vector<1x2x32xf32>
      tpu.vector_store %arg28[%263, %c0_201, %c0_202], %266 {strides = array<i32>} : memref<8x2x32xf32, #tpu.memory_space<vmem>>, vector<1x2x32xf32>,
      scf.yield %222, %262 : vector<2x32xf32>, vector<2x32xf32>
    }
    %c8_i32_39 = arith.constant 8 : i32
    %c0_40 = arith.constant 0 : index
    %c0_41 = arith.constant 0 : index
    %c0_42 = arith.constant 0 : index
    %39 = vector.load %arg27[%c0_40, %c0_41, %c0_42] : memref<8x2x32xf32, #tpu.memory_space<vmem>>, vector<8x2x32xf32>
    %c0_43 = arith.constant 0 : index
    %c0_44 = arith.constant 0 : index
    %c0_45 = arith.constant 0 : index
    %40 = vector.load %arg28[%c0_43, %c0_44, %c0_45] : memref<8x2x32xf32, #tpu.memory_space<vmem>>, vector<8x2x32xf32>
    %c0_46 = arith.constant 0 : index
    %c0_47 = arith.constant 0 : index
    %41 = vector.load %arg7[%c0_46, %c0_47] : memref<32x64xf32, #tpu.memory_space<vmem>>, vector<32x64xf32>
    "tpu.trace_start"() <{level = 10 : i32, message = "sbh,he->sbe"}> : () -> ()
    %cst_48 = arith.constant dense<0.000000e+00> : vector<8x2x64xf32>
    %42 = tpu.matmul %39, %41, %cst_48 {dimension_numbers = #tpu.dot_dimension_numbers<[2], [0], [0, 1], [1], [0, 0, 0, 1, 1, 1], [], []>} : vector<8x2x32xf32>, vector<32x64xf32>, vector<8x2x64xf32> -> vector<8x2x64xf32>
    "tpu.trace_stop"() : () -> ()
    %c0_49 = arith.constant 0 : index
    %c0_50 = arith.constant 0 : index
    %43 = vector.load %arg8[%c0_49, %c0_50] : memref<32x64xf32, #tpu.memory_space<vmem>>, vector<32x64xf32>
    "tpu.trace_start"() <{level = 10 : i32, message = "sbh,he->sbe"}> : () -> ()
    %cst_51 = arith.constant dense<0.000000e+00> : vector<8x2x64xf32>
    %44 = tpu.matmul %40, %43, %cst_51 {dimension_numbers = #tpu.dot_dimension_numbers<[2], [0], [0, 1], [1], [0, 0, 0, 1, 1, 1], [], []>} : vector<8x2x32xf32>, vector<32x64xf32>, vector<8x2x64xf32> -> vector<8x2x64xf32>
    "tpu.trace_stop"() : () -> ()
    %45 = arith.addf %42, %44 : vector<8x2x64xf32>
    %c0_52 = arith.constant 0 : index
    %c0_53 = arith.constant 0 : index
    %46 = vector.load %arg9[%c0_52, %c0_53] : memref<1x64xf32, #tpu.memory_space<vmem>>, vector<1x64xf32>
    %47 = vector.shape_cast %46 : vector<1x64xf32> to vector<1x1x64xf32>
    %48 = vector.broadcast %47 : vector<1x1x64xf32> to vector<8x2x64xf32>
    %49 = arith.addf %45, %48 : vector<8x2x64xf32>
    %c0_54 = arith.constant 0 : index
    %c0_55 = arith.constant 0 : index
    %50 = vector.load %arg5[%c0_54, %c0_55] : memref<14x64xf32, #tpu.memory_space<vmem>>, vector<14x64xf32>
    %c0_56 = arith.constant 0 : index
    %c0_57 = arith.constant 0 : index
    %51 = vector.load %arg6[%c0_56, %c0_57] : memref<14x64xf32, #tpu.memory_space<vmem>>, vector<14x64xf32>
    %c0_58 = arith.constant 0 : index
    %c0_59 = arith.constant 0 : index
    %52 = vector.load %arg10[%c0_58, %c0_59] : memref<64x64xf32, #tpu.memory_space<vmem>>, vector<64x64xf32>
    %cst_60 = arith.constant 0.000000e+00 : f32
    %53 = vector.broadcast %cst_60 : f32 to vector<8x2x64xf32>
    %54 = vector.extract_strided_slice %49 {offsets = [0, 0, 0], sizes = [8, 2, 32], strides = [1, 1, 1]} : vector<8x2x64xf32> to vector<8x2x32xf32>
    %cst_61 = arith.constant 0.176776692 : f32
    %55 = vector.broadcast %cst_61 : f32 to vector<8x2x32xf32>
    %56 = arith.mulf %54, %55 : vector<8x2x32xf32>
    %57 = vector.extract_strided_slice %50 {offsets = [0, 0], sizes = [14, 32], strides = [1, 1]} : vector<14x64xf32> to vector<14x32xf32>
    "tpu.trace_start"() <{level = 10 : i32, message = "sbd,td->sbt"}> : () -> ()
    %cst_62 = arith.constant dense<0.000000e+00> : vector<8x2x14xf32>
    %58 = tpu.matmul %56, %57, %cst_62 {dimension_numbers = #tpu.dot_dimension_numbers<[2], [1], [0, 1], [0], [0, 0, 0, 1, 1, 0], [], []>} : vector<8x2x32xf32>, vector<14x32xf32>, vector<8x2x14xf32> -> vector<8x2x14xf32>
    "tpu.trace_stop"() : () -> ()
    %cst_63 = arith.constant dense<0xFF800000> : vector<8x2xf32>
    %59 = vector.multi_reduction <maximumf>, %58, %cst_63 [2] : vector<8x2x14xf32> to vector<8x2xf32>
    %cst_64 = arith.constant 0xFF800000 : f32
    %60 = vector.broadcast %cst_64 : f32 to vector<8x2xf32>
    %61 = arith.maximumf %60, %59 : vector<8x2xf32>
    %62 = vector.shape_cast %61 : vector<8x2xf32> to vector<8x2x1xf32>
    %63 = vector.broadcast %62 : vector<8x2x1xf32> to vector<8x2x14xf32>
    %64 = arith.subf %58, %63 : vector<8x2x14xf32>
    %65 = math.exp %64 : vector<8x2x14xf32>
    %cst_65 = arith.constant dense<0.000000e+00> : vector<8x2xf32>
    %66 = vector.multi_reduction <add>, %65, %cst_65 [2] : vector<8x2x14xf32> to vector<8x2xf32>
    %67 = vector.shape_cast %66 : vector<8x2xf32> to vector<8x2x1xf32>
    %68 = vector.broadcast %67 : vector<8x2x1xf32> to vector<8x2x14xf32>
    %69 = arith.divf %65, %68 : vector<8x2x14xf32>
    %70 = vector.extract_strided_slice %51 {offsets = [0, 0], sizes = [14, 32], strides = [1, 1]} : vector<14x64xf32> to vector<14x32xf32>
    "tpu.trace_start"() <{level = 10 : i32, message = "sbt,td->sbd"}> : () -> ()
    %cst_66 = arith.constant dense<0.000000e+00> : vector<8x2x32xf32>
    %71 = tpu.matmul %69, %70, %cst_66 {dimension_numbers = #tpu.dot_dimension_numbers<[2], [0], [0, 1], [1], [0, 0, 0, 1, 1, 1], [], []>} : vector<8x2x14xf32>, vector<14x32xf32>, vector<8x2x32xf32> -> vector<8x2x32xf32>
    "tpu.trace_stop"() : () -> ()
    %72 = vector.extract_strided_slice %52 {offsets = [0, 0], sizes = [32, 64], strides = [1, 1]} : vector<64x64xf32> to vector<32x64xf32>
    "tpu.trace_start"() <{level = 10 : i32, message = "sbd,de->sbe"}> : () -> ()
    %cst_67 = arith.constant dense<0.000000e+00> : vector<8x2x64xf32>
    %73 = tpu.matmul %71, %72, %cst_67 {dimension_numbers = #tpu.dot_dimension_numbers<[2], [0], [0, 1], [1], [0, 0, 0, 1, 1, 1], [], []>} : vector<8x2x32xf32>, vector<32x64xf32>, vector<8x2x64xf32> -> vector<8x2x64xf32>
    "tpu.trace_stop"() : () -> ()
    %74 = arith.addf %53, %73 : vector<8x2x64xf32>
    %75 = vector.extract_strided_slice %49 {offsets = [0, 0, 32], sizes = [8, 2, 32], strides = [1, 1, 1]} : vector<8x2x64xf32> to vector<8x2x32xf32>
    %cst_68 = arith.constant 0.176776692 : f32
    %76 = vector.broadcast %cst_68 : f32 to vector<8x2x32xf32>
    %77 = arith.mulf %75, %76 : vector<8x2x32xf32>
    %78 = vector.extract_strided_slice %50 {offsets = [0, 32], sizes = [14, 32], strides = [1, 1]} : vector<14x64xf32> to vector<14x32xf32>
    "tpu.trace_start"() <{level = 10 : i32, message = "sbd,td->sbt"}> : () -> ()
    %cst_69 = arith.constant dense<0.000000e+00> : vector<8x2x14xf32>
    %79 = tpu.matmul %77, %78, %cst_69 {dimension_numbers = #tpu.dot_dimension_numbers<[2], [1], [0, 1], [0], [0, 0, 0, 1, 1, 0], [], []>} : vector<8x2x32xf32>, vector<14x32xf32>, vector<8x2x14xf32> -> vector<8x2x14xf32>
    "tpu.trace_stop"() : () -> ()
    %cst_70 = arith.constant dense<0xFF800000> : vector<8x2xf32>
    %80 = vector.multi_reduction <maximumf>, %79, %cst_70 [2] : vector<8x2x14xf32> to vector<8x2xf32>
    %cst_71 = arith.constant 0xFF800000 : f32
    %81 = vector.broadcast %cst_71 : f32 to vector<8x2xf32>
    %82 = arith.maximumf %81, %80 : vector<8x2xf32>
    %83 = vector.shape_cast %82 : vector<8x2xf32> to vector<8x2x1xf32>
    %84 = vector.broadcast %83 : vector<8x2x1xf32> to vector<8x2x14xf32>
    %85 = arith.subf %79, %84 : vector<8x2x14xf32>
    %86 = math.exp %85 : vector<8x2x14xf32>
    %cst_72 = arith.constant dense<0.000000e+00> : vector<8x2xf32>
    %87 = vector.multi_reduction <add>, %86, %cst_72 [2] : vector<8x2x14xf32> to vector<8x2xf32>
    %88 = vector.shape_cast %87 : vector<8x2xf32> to vector<8x2x1xf32>
    %89 = vector.broadcast %88 : vector<8x2x1xf32> to vector<8x2x14xf32>
    %90 = arith.divf %86, %89 : vector<8x2x14xf32>
    %91 = vector.extract_strided_slice %51 {offsets = [0, 32], sizes = [14, 32], strides = [1, 1]} : vector<14x64xf32> to vector<14x32xf32>
    "tpu.trace_start"() <{level = 10 : i32, message = "sbt,td->sbd"}> : () -> ()
    %cst_73 = arith.constant dense<0.000000e+00> : vector<8x2x32xf32>
    %92 = tpu.matmul %90, %91, %cst_73 {dimension_numbers = #tpu.dot_dimension_numbers<[2], [0], [0, 1], [1], [0, 0, 0, 1, 1, 1], [], []>} : vector<8x2x14xf32>, vector<14x32xf32>, vector<8x2x32xf32> -> vector<8x2x32xf32>
    "tpu.trace_stop"() : () -> ()
    %93 = vector.extract_strided_slice %52 {offsets = [32, 0], sizes = [32, 64], strides = [1, 1]} : vector<64x64xf32> to vector<32x64xf32>
    "tpu.trace_start"() <{level = 10 : i32, message = "sbd,de->sbe"}> : () -> ()
    %cst_74 = arith.constant dense<0.000000e+00> : vector<8x2x64xf32>
    %94 = tpu.matmul %92, %93, %cst_74 {dimension_numbers = #tpu.dot_dimension_numbers<[2], [0], [0, 1], [1], [0, 0, 0, 1, 1, 1], [], []>} : vector<8x2x32xf32>, vector<32x64xf32>, vector<8x2x64xf32> -> vector<8x2x64xf32>
    "tpu.trace_stop"() : () -> ()
    %95 = arith.addf %74, %94 : vector<8x2x64xf32>
    %c0_75 = arith.constant 0 : index
    %c0_76 = arith.constant 0 : index
    %96 = vector.load %arg11[%c0_75, %c0_76] : memref<1x64xf32, #tpu.memory_space<vmem>>, vector<1x64xf32>
    %97 = vector.shape_cast %96 : vector<1x64xf32> to vector<1x1x64xf32>
    %98 = vector.broadcast %97 : vector<1x1x64xf32> to vector<8x2x64xf32>
    %99 = arith.addf %95, %98 : vector<8x2x64xf32>
    %c0_77 = arith.constant 0 : index
    %c0_78 = arith.constant 0 : index
    %100 = vector.load %arg12[%c0_77, %c0_78] : memref<32x192xf32, #tpu.memory_space<vmem>>, vector<32x192xf32>
    "tpu.trace_start"() <{level = 10 : i32, message = "sbh,hg->sbg"}> : () -> ()
    %cst_79 = arith.constant dense<0.000000e+00> : vector<8x2x192xf32>
    %101 = tpu.matmul %39, %100, %cst_79 {dimension_numbers = #tpu.dot_dimension_numbers<[2], [0], [0, 1], [1], [0, 0, 0, 1, 1, 1], [], []>} : vector<8x2x32xf32>, vector<32x192xf32>, vector<8x2x192xf32> -> vector<8x2x192xf32>
    "tpu.trace_stop"() : () -> ()
    %c0_80 = arith.constant 0 : index
    %c0_81 = arith.constant 0 : index
    %102 = vector.load %arg13[%c0_80, %c0_81] : memref<32x192xf32, #tpu.memory_space<vmem>>, vector<32x192xf32>
    "tpu.trace_start"() <{level = 10 : i32, message = "sbh,hg->sbg"}> : () -> ()
    %cst_82 = arith.constant dense<0.000000e+00> : vector<8x2x192xf32>
    %103 = tpu.matmul %40, %102, %cst_82 {dimension_numbers = #tpu.dot_dimension_numbers<[2], [0], [0, 1], [1], [0, 0, 0, 1, 1, 1], [], []>} : vector<8x2x32xf32>, vector<32x192xf32>, vector<8x2x192xf32> -> vector<8x2x192xf32>
    "tpu.trace_stop"() : () -> ()
    %104 = arith.addf %101, %103 : vector<8x2x192xf32>
    %c0_83 = arith.constant 0 : index
    %c0_84 = arith.constant 0 : index
    %105 = vector.load %arg14[%c0_83, %c0_84] : memref<64x192xf32, #tpu.memory_space<vmem>>, vector<64x192xf32>
    "tpu.trace_start"() <{level = 10 : i32, message = "sbe,eg->sbg"}> : () -> ()
    %cst_85 = arith.constant dense<0.000000e+00> : vector<8x2x192xf32>
    %106 = tpu.matmul %99, %105, %cst_85 {dimension_numbers = #tpu.dot_dimension_numbers<[2], [0], [0, 1], [1], [0, 0, 0, 1, 1, 1], [], []>} : vector<8x2x64xf32>, vector<64x192xf32>, vector<8x2x192xf32> -> vector<8x2x192xf32>
    "tpu.trace_stop"() : () -> ()
    %107 = arith.addf %104, %106 : vector<8x2x192xf32>
    %c0_86 = arith.constant 0 : index
    %c0_87 = arith.constant 0 : index
    %108 = vector.load %arg15[%c0_86, %c0_87] : memref<1x192xf32, #tpu.memory_space<vmem>>, vector<1x192xf32>
    %109 = vector.shape_cast %108 : vector<1x192xf32> to vector<1x1x192xf32>
    %110 = vector.broadcast %109 : vector<1x1x192xf32> to vector<8x2x192xf32>
    %111 = arith.addf %107, %110 : vector<8x2x192xf32>
    %112 = vector.extract_strided_slice %111 {offsets = [0, 0, 0], sizes = [8, 2, 32], strides = [1, 1, 1]} : vector<8x2x192xf32> to vector<8x2x32xf32>
    %c0_88 = arith.constant 0 : index
    %c0_89 = arith.constant 0 : index
    %c0_90 = arith.constant 0 : index
    %113 = vector.load %arg29[%c0_88, %c0_89, %c0_90] : memref<24x2x32xf32, #tpu.memory_space<vmem>>, vector<8x2x32xf32>
    tpu.vector_store %arg29[%c0_88, %c0_89, %c0_90], %112 {strides = array<i32>} : memref<24x2x32xf32, #tpu.memory_space<vmem>>, vector<8x2x32xf32>,
    %114 = vector.extract_strided_slice %111 {offsets = [0, 0, 32], sizes = [8, 2, 32], strides = [1, 1, 1]} : vector<8x2x192xf32> to vector<8x2x32xf32>
    %c8_91 = arith.constant 8 : index
    %c0_92 = arith.constant 0 : index
    %c0_93 = arith.constant 0 : index
    %115 = vector.load %arg29[%c8_91, %c0_92, %c0_93] : memref<24x2x32xf32, #tpu.memory_space<vmem>>, vector<8x2x32xf32>
    tpu.vector_store %arg29[%c8_91, %c0_92, %c0_93], %114 {strides = array<i32>} : memref<24x2x32xf32, #tpu.memory_space<vmem>>, vector<8x2x32xf32>,
    %116 = vector.extract_strided_slice %111 {offsets = [0, 0, 64], sizes = [8, 2, 32], strides = [1, 1, 1]} : vector<8x2x192xf32> to vector<8x2x32xf32>
    %c16_94 = arith.constant 16 : index
    %c0_95 = arith.constant 0 : index
    %c0_96 = arith.constant 0 : index
    %117 = vector.load %arg29[%c16_94, %c0_95, %c0_96] : memref<24x2x32xf32, #tpu.memory_space<vmem>>, vector<8x2x32xf32>
    tpu.vector_store %arg29[%c16_94, %c0_95, %c0_96], %116 {strides = array<i32>} : memref<24x2x32xf32, #tpu.memory_space<vmem>>, vector<8x2x32xf32>,
    %118 = vector.extract_strided_slice %111 {offsets = [0, 0, 96], sizes = [8, 2, 32], strides = [1, 1, 1]} : vector<8x2x192xf32> to vector<8x2x32xf32>
    %c0_97 = arith.constant 0 : index
    %c0_98 = arith.constant 0 : index
    %c0_99 = arith.constant 0 : index
    %119 = vector.load %arg30[%c0_97, %c0_98, %c0_99] : memref<24x2x32xf32, #tpu.memory_space<vmem>>, vector<8x2x32xf32>
    tpu.vector_store %arg30[%c0_97, %c0_98, %c0_99], %118 {strides = array<i32>} : memref<24x2x32xf32, #tpu.memory_space<vmem>>, vector<8x2x32xf32>,
    %120 = vector.extract_strided_slice %111 {offsets = [0, 0, 128], sizes = [8, 2, 32], strides = [1, 1, 1]} : vector<8x2x192xf32> to vector<8x2x32xf32>
    %c8_100 = arith.constant 8 : index
    %c0_101 = arith.constant 0 : index
    %c0_102 = arith.constant 0 : index
    %121 = vector.load %arg30[%c8_100, %c0_101, %c0_102] : memref<24x2x32xf32, #tpu.memory_space<vmem>>, vector<8x2x32xf32>
    tpu.vector_store %arg30[%c8_100, %c0_101, %c0_102], %120 {strides = array<i32>} : memref<24x2x32xf32, #tpu.memory_space<vmem>>, vector<8x2x32xf32>,
    %122 = vector.extract_strided_slice %111 {offsets = [0, 0, 160], sizes = [8, 2, 32], strides = [1, 1, 1]} : vector<8x2x192xf32> to vector<8x2x32xf32>
    %c16_103 = arith.constant 16 : index
    %c0_104 = arith.constant 0 : index
    %c0_105 = arith.constant 0 : index
    %123 = vector.load %arg30[%c16_103, %c0_104, %c0_105] : memref<24x2x32xf32, #tpu.memory_space<vmem>>, vector<8x2x32xf32>
    tpu.vector_store %arg30[%c16_103, %c0_104, %c0_105], %122 {strides = array<i32>} : memref<24x2x32xf32, #tpu.memory_space<vmem>>, vector<8x2x32xf32>,
    %c0_106 = arith.constant 0 : index
    %c0_107 = arith.constant 0 : index
    %c0_108 = arith.constant 0 : index
    %124 = vector.load %arg16[%c0_106, %c0_107, %c0_108] : memref<6x32x32xf32, #tpu.memory_space<vmem>>, vector<1x32x32xf32>
    %125 = vector.shape_cast %124 : vector<1x32x32xf32> to vector<32x32xf32>
    %c1_109 = arith.constant 1 : index
    %c0_110 = arith.constant 0 : index
    %c0_111 = arith.constant 0 : index
    %126 = vector.load %arg16[%c1_109, %c0_110, %c0_111] : memref<6x32x32xf32, #tpu.memory_space<vmem>>, vector<1x32x32xf32>
    %127 = vector.shape_cast %126 : vector<1x32x32xf32> to vector<32x32xf32>
    %c2_112 = arith.constant 2 : index
    %c0_113 = arith.constant 0 : index
    %c0_114 = arith.constant 0 : index
    %128 = vector.load %arg16[%c2_112, %c0_113, %c0_114] : memref<6x32x32xf32, #tpu.memory_space<vmem>>, vector<1x32x32xf32>
    %129 = vector.shape_cast %128 : vector<1x32x32xf32> to vector<32x32xf32>
    %c3_115 = arith.constant 3 : index
    %c0_116 = arith.constant 0 : index
    %c0_117 = arith.constant 0 : index
    %130 = vector.load %arg16[%c3_115, %c0_116, %c0_117] : memref<6x32x32xf32, #tpu.memory_space<vmem>>, vector<1x32x32xf32>
    %131 = vector.shape_cast %130 : vector<1x32x32xf32> to vector<32x32xf32>
    %c4_118 = arith.constant 4 : index
    %c0_119 = arith.constant 0 : index
    %c0_120 = arith.constant 0 : index
    %132 = vector.load %arg16[%c4_118, %c0_119, %c0_120] : memref<6x32x32xf32, #tpu.memory_space<vmem>>, vector<1x32x32xf32>
    %133 = vector.shape_cast %132 : vector<1x32x32xf32> to vector<32x32xf32>
    %c5_121 = arith.constant 5 : index
    %c0_122 = arith.constant 0 : index
    %c0_123 = arith.constant 0 : index
    %134 = vector.load %arg16[%c5_121, %c0_122, %c0_123] : memref<6x32x32xf32, #tpu.memory_space<vmem>>, vector<1x32x32xf32>
    %135 = vector.shape_cast %134 : vector<1x32x32xf32> to vector<32x32xf32>
    %c0_124 = arith.constant 0 : index
    %c0_125 = arith.constant 0 : index
    %c0_126 = arith.constant 0 : index
    %136 = vector.load %arg17[%c0_124, %c0_125, %c0_126] : memref<2x1x32xf32, #tpu.memory_space<vmem>>, vector<2x1x32xf32>
    %137 = vector.extract_strided_slice %136 {offsets = [0, 0, 0], sizes = [1, 1, 32], strides = [1, 1, 1]} : vector<2x1x32xf32> to vector<1x1x32xf32>
    %138 = vector.shape_cast %137 : vector<1x1x32xf32> to vector<1x32xf32>
    %139 = vector.extract_strided_slice %136 {offsets = [1, 0, 0], sizes = [1, 1, 32], strides = [1, 1, 1]} : vector<2x1x32xf32> to vector<1x1x32xf32>
    %140 = vector.shape_cast %139 : vector<1x1x32xf32> to vector<1x32xf32>
    %cst_127 = arith.constant 0.000000e+00 : f32
    %141 = vector.broadcast %cst_127 : f32 to vector<2x32xf32>
    %c0_i32_128 = arith.constant 0 : i32
    %c8_i32_129 = arith.constant 8 : i32
    %142 = arith.addi %c0_i32_128, %c8_i32_129 : i32
    %c1_i32_130 = arith.constant 1 : i32
    %143:2 = scf.for %arg35 = %c0_i32_128 to %142 step %c1_i32_130 iter_args(%arg36 = %141, %arg37 = %141) -> (vector<2x32xf32>, vector<2x32xf32>)  : i32 {
      %c7_i32_171 = arith.constant 7 : i32
      %186 = arith.subi %c7_i32_171, %arg35 : i32
      %187 = arith.index_cast %arg35 : i32 to index
      %c0_172 = arith.constant 0 : index
      %c0_173 = arith.constant 0 : index
      %188 = vector.load %arg29[%187, %c0_172, %c0_173] : memref<24x2x32xf32, #tpu.memory_space<vmem>>, vector<1x2x32xf32>
      %189 = vector.shape_cast %188 : vector<1x2x32xf32> to vector<2x32xf32>
      %cst_174 = arith.constant dense<0.000000e+00> : vector<2x32xf32>
      %190 = tpu.matmul %arg36, %125, %cst_174 {dimension_numbers = #tpu.dot_dimension_numbers<[1], [0], [0], [1], [0, 0, 1, 1], [], []>} : vector<2x32xf32>, vector<32x32xf32>, vector<2x32xf32> -> vector<2x32xf32>
      %191 = arith.addf %189, %190 : vector<2x32xf32>
      %192 = arith.negf %191 : vector<2x32xf32>
      %193 = math.exp %192 : vector<2x32xf32>
      %cst_175 = arith.constant 1.000000e+00 : f32
      %194 = vector.broadcast %cst_175 : f32 to vector<2x32xf32>
      %195 = arith.addf %194, %193 : vector<2x32xf32>
      %196 = arith.divf %194, %195 : vector<2x32xf32>
      %c8_i32_176 = arith.constant 8 : i32
      %197 = arith.addi %c8_i32_176, %arg35 : i32
      %198 = arith.index_cast %197 : i32 to index
      %c0_177 = arith.constant 0 : index
      %c0_178 = arith.constant 0 : index
      %199 = vector.load %arg29[%198, %c0_177, %c0_178] : memref<24x2x32xf32, #tpu.memory_space<vmem>>, vector<1x2x32xf32>
      %200 = vector.shape_cast %199 : vector<1x2x32xf32> to vector<2x32xf32>
      %cst_179 = arith.constant dense<0.000000e+00> : vector<2x32xf32>
      %201 = tpu.matmul %arg36, %127, %cst_179 {dimension_numbers = #tpu.dot_dimension_numbers<[1], [0], [0], [1], [0, 0, 1, 1], [], []>} : vector<2x32xf32>, vector<32x32xf32>, vector<2x32xf32> -> vector<2x32xf32>
      %202 = arith.addf %200, %201 : vector<2x32xf32>
      %203 = arith.negf %202 : vector<2x32xf32>
      %204 = math.exp %203 : vector<2x32xf32>
      %cst_180 = arith.constant 1.000000e+00 : f32
      %205 = vector.broadcast %cst_180 : f32 to vector<2x32xf32>
      %206 = arith.addf %205, %204 : vector<2x32xf32>
      %207 = arith.divf %205, %206 : vector<2x32xf32>
      %c16_i32 = arith.constant 16 : i32
      %208 = arith.addi %c16_i32, %arg35 : i32
      %209 = arith.index_cast %208 : i32 to index
      %c0_181 = arith.constant 0 : index
      %c0_182 = arith.constant 0 : index
      %210 = vector.load %arg29[%209, %c0_181, %c0_182] : memref<24x2x32xf32, #tpu.memory_space<vmem>>, vector<1x2x32xf32>
      %211 = vector.shape_cast %210 : vector<1x2x32xf32> to vector<2x32xf32>
      %cst_183 = arith.constant dense<0.000000e+00> : vector<2x32xf32>
      %212 = tpu.matmul %arg36, %129, %cst_183 {dimension_numbers = #tpu.dot_dimension_numbers<[1], [0], [0], [1], [0, 0, 1, 1], [], []>} : vector<2x32xf32>, vector<32x32xf32>, vector<2x32xf32> -> vector<2x32xf32>
      %213 = vector.broadcast %138 : vector<1x32xf32> to vector<2x32xf32>
      %214 = arith.addf %212, %213 : vector<2x32xf32>
      %215 = arith.mulf %196, %214 : vector<2x32xf32>
      %216 = arith.addf %211, %215 : vector<2x32xf32>
      %217 = math.tanh %216 : vector<2x32xf32>
      %cst_184 = arith.constant 1.000000e+00 : f32
      %218 = vector.broadcast %cst_184 : f32 to vector<2x32xf32>
      %219 = arith.subf %218, %207 : vector<2x32xf32>
      %220 = arith.mulf %219, %217 : vector<2x32xf32>
      %221 = arith.mulf %207, %arg36 : vector<2x32xf32>
      %222 = arith.addf %220, %221 : vector<2x32xf32>
      %223 = arith.index_cast %arg35 : i32 to index
      %c0_185 = arith.constant 0 : index
      %c0_186 = arith.constant 0 : index
      %224 = vector.load %arg31[%223, %c0_185, %c0_186] : memref<8x2x32xf32, #tpu.memory_space<vmem>>, vector<1x2x32xf32>
      %225 = vector.shape_cast %224 : vector<1x2x32xf32> to vector<2x32xf32>
      %226 = vector.shape_cast %222 : vector<2x32xf32> to vector<1x2x32xf32>
      tpu.vector_store %arg31[%223, %c0_185, %c0_186], %226 {strides = array<i32>} : memref<8x2x32xf32, #tpu.memory_space<vmem>>, vector<1x2x32xf32>,
      %227 = arith.index_cast %186 : i32 to index
      %c0_187 = arith.constant 0 : index
      %c0_188 = arith.constant 0 : index
      %228 = vector.load %arg30[%227, %c0_187, %c0_188] : memref<24x2x32xf32, #tpu.memory_space<vmem>>, vector<1x2x32xf32>
      %229 = vector.shape_cast %228 : vector<1x2x32xf32> to vector<2x32xf32>
      %cst_189 = arith.constant dense<0.000000e+00> : vector<2x32xf32>
      %230 = tpu.matmul %arg37, %131, %cst_189 {dimension_numbers = #tpu.dot_dimension_numbers<[1], [0], [0], [1], [0, 0, 1, 1], [], []>} : vector<2x32xf32>, vector<32x32xf32>, vector<2x32xf32> -> vector<2x32xf32>
      %231 = arith.addf %229, %230 : vector<2x32xf32>
      %232 = arith.negf %231 : vector<2x32xf32>
      %233 = math.exp %232 : vector<2x32xf32>
      %cst_190 = arith.constant 1.000000e+00 : f32
      %234 = vector.broadcast %cst_190 : f32 to vector<2x32xf32>
      %235 = arith.addf %234, %233 : vector<2x32xf32>
      %236 = arith.divf %234, %235 : vector<2x32xf32>
      %c8_i32_191 = arith.constant 8 : i32
      %237 = arith.addi %c8_i32_191, %186 : i32
      %238 = arith.index_cast %237 : i32 to index
      %c0_192 = arith.constant 0 : index
      %c0_193 = arith.constant 0 : index
      %239 = vector.load %arg30[%238, %c0_192, %c0_193] : memref<24x2x32xf32, #tpu.memory_space<vmem>>, vector<1x2x32xf32>
      %240 = vector.shape_cast %239 : vector<1x2x32xf32> to vector<2x32xf32>
      %cst_194 = arith.constant dense<0.000000e+00> : vector<2x32xf32>
      %241 = tpu.matmul %arg37, %133, %cst_194 {dimension_numbers = #tpu.dot_dimension_numbers<[1], [0], [0], [1], [0, 0, 1, 1], [], []>} : vector<2x32xf32>, vector<32x32xf32>, vector<2x32xf32> -> vector<2x32xf32>
      %242 = arith.addf %240, %241 : vector<2x32xf32>
      %243 = arith.negf %242 : vector<2x32xf32>
      %244 = math.exp %243 : vector<2x32xf32>
      %cst_195 = arith.constant 1.000000e+00 : f32
      %245 = vector.broadcast %cst_195 : f32 to vector<2x32xf32>
      %246 = arith.addf %245, %244 : vector<2x32xf32>
      %247 = arith.divf %245, %246 : vector<2x32xf32>
      %c16_i32_196 = arith.constant 16 : i32
      %248 = arith.addi %c16_i32_196, %186 : i32
      %249 = arith.index_cast %248 : i32 to index
      %c0_197 = arith.constant 0 : index
      %c0_198 = arith.constant 0 : index
      %250 = vector.load %arg30[%249, %c0_197, %c0_198] : memref<24x2x32xf32, #tpu.memory_space<vmem>>, vector<1x2x32xf32>
      %251 = vector.shape_cast %250 : vector<1x2x32xf32> to vector<2x32xf32>
      %cst_199 = arith.constant dense<0.000000e+00> : vector<2x32xf32>
      %252 = tpu.matmul %arg37, %135, %cst_199 {dimension_numbers = #tpu.dot_dimension_numbers<[1], [0], [0], [1], [0, 0, 1, 1], [], []>} : vector<2x32xf32>, vector<32x32xf32>, vector<2x32xf32> -> vector<2x32xf32>
      %253 = vector.broadcast %140 : vector<1x32xf32> to vector<2x32xf32>
      %254 = arith.addf %252, %253 : vector<2x32xf32>
      %255 = arith.mulf %236, %254 : vector<2x32xf32>
      %256 = arith.addf %251, %255 : vector<2x32xf32>
      %257 = math.tanh %256 : vector<2x32xf32>
      %cst_200 = arith.constant 1.000000e+00 : f32
      %258 = vector.broadcast %cst_200 : f32 to vector<2x32xf32>
      %259 = arith.subf %258, %247 : vector<2x32xf32>
      %260 = arith.mulf %259, %257 : vector<2x32xf32>
      %261 = arith.mulf %247, %arg37 : vector<2x32xf32>
      %262 = arith.addf %260, %261 : vector<2x32xf32>
      %263 = arith.index_cast %186 : i32 to index
      %c0_201 = arith.constant 0 : index
      %c0_202 = arith.constant 0 : index
      %264 = vector.load %arg32[%263, %c0_201, %c0_202] : memref<8x2x32xf32, #tpu.memory_space<vmem>>, vector<1x2x32xf32>
      %265 = vector.shape_cast %264 : vector<1x2x32xf32> to vector<2x32xf32>
      %266 = vector.shape_cast %262 : vector<2x32xf32> to vector<1x2x32xf32>
      tpu.vector_store %arg32[%263, %c0_201, %c0_202], %266 {strides = array<i32>} : memref<8x2x32xf32, #tpu.memory_space<vmem>>, vector<1x2x32xf32>,
      scf.yield %222, %262 : vector<2x32xf32>, vector<2x32xf32>
    }
    %c8_i32_131 = arith.constant 8 : i32
    %c0_132 = arith.constant 0 : index
    %c0_133 = arith.constant 0 : index
    %c0_134 = arith.constant 0 : index
    %144 = vector.load %arg31[%c0_132, %c0_133, %c0_134] : memref<8x2x32xf32, #tpu.memory_space<vmem>>, vector<8x2x32xf32>
    %c0_135 = arith.constant 0 : index
    %c0_136 = arith.constant 0 : index
    %145 = vector.load %arg18[%c0_135, %c0_136] : memref<32x14xf32, #tpu.memory_space<vmem>>, vector<32x14xf32>
    "tpu.trace_start"() <{level = 10 : i32, message = "sbh,ht->sbt"}> : () -> ()
    %cst_137 = arith.constant dense<0.000000e+00> : vector<8x2x14xf32>
    %146 = tpu.matmul %144, %145, %cst_137 {dimension_numbers = #tpu.dot_dimension_numbers<[2], [0], [0, 1], [1], [0, 0, 0, 1, 1, 1], [], []>} : vector<8x2x32xf32>, vector<32x14xf32>, vector<8x2x14xf32> -> vector<8x2x14xf32>
    "tpu.trace_stop"() : () -> ()
    %c0_138 = arith.constant 0 : index
    %c0_139 = arith.constant 0 : index
    %c0_140 = arith.constant 0 : index
    %147 = vector.load %arg32[%c0_138, %c0_139, %c0_140] : memref<8x2x32xf32, #tpu.memory_space<vmem>>, vector<8x2x32xf32>
    %c0_141 = arith.constant 0 : index
    %c0_142 = arith.constant 0 : index
    %148 = vector.load %arg19[%c0_141, %c0_142] : memref<32x14xf32, #tpu.memory_space<vmem>>, vector<32x14xf32>
    "tpu.trace_start"() <{level = 10 : i32, message = "sbh,ht->sbt"}> : () -> ()
    %cst_143 = arith.constant dense<0.000000e+00> : vector<8x2x14xf32>
    %149 = tpu.matmul %147, %148, %cst_143 {dimension_numbers = #tpu.dot_dimension_numbers<[2], [0], [0, 1], [1], [0, 0, 0, 1, 1, 1], [], []>} : vector<8x2x32xf32>, vector<32x14xf32>, vector<8x2x14xf32> -> vector<8x2x14xf32>
    "tpu.trace_stop"() : () -> ()
    %150 = arith.addf %146, %149 : vector<8x2x14xf32>
    %c0_144 = arith.constant 0 : index
    %c0_145 = arith.constant 0 : index
    %151 = vector.load %arg20[%c0_144, %c0_145] : memref<1x14xf32, #tpu.memory_space<vmem>>, vector<1x14xf32>
    %152 = vector.shape_cast %151 : vector<1x14xf32> to vector<1x1x14xf32>
    %153 = vector.broadcast %152 : vector<1x1x14xf32> to vector<8x2x14xf32>
    %154 = arith.addf %150, %153 : vector<8x2x14xf32>
    %c0_146 = arith.constant 0 : index
    %c0_147 = arith.constant 0 : index
    %c0_148 = arith.constant 0 : index
    %155 = vector.load %arg33[%c0_146, %c0_147, %c0_148] : memref<8x2x14xf32, #tpu.memory_space<vmem>>, vector<8x2x14xf32>
    tpu.vector_store %arg33[%c0_146, %c0_147, %c0_148], %154 {strides = array<i32>} : memref<8x2x14xf32, #tpu.memory_space<vmem>>, vector<8x2x14xf32>,
    %c0_149 = arith.constant 0 : index
    %c0_150 = arith.constant 0 : index
    %156 = vector.load %arg23[%c0_149, %c0_150] : memref<14x14xf32, #tpu.memory_space<vmem>>, vector<14x14xf32>
    %c0_151 = arith.constant 0 : index
    %c0_152 = arith.constant 0 : index
    %157 = vector.load %arg21[%c0_151, %c0_152] : memref<1x14xf32, #tpu.memory_space<vmem>>, vector<1x14xf32>
    %c0_153 = arith.constant 0 : index
    %c0_154 = arith.constant 0 : index
    %c0_155 = arith.constant 0 : index
    %158 = vector.load %arg33[%c0_153, %c0_154, %c0_155] : memref<8x2x14xf32, #tpu.memory_space<vmem>>, vector<1x2x14xf32>
    %159 = vector.shape_cast %158 : vector<1x2x14xf32> to vector<2x14xf32>
    %160 = vector.broadcast %157 : vector<1x14xf32> to vector<2x14xf32>
    %161 = arith.addf %160, %159 : vector<2x14xf32>
    %c1_i32_156 = arith.constant 1 : i32
    %c7_i32 = arith.constant 7 : i32
    %162 = arith.addi %c1_i32_156, %c7_i32 : i32
    %c1_i32_157 = arith.constant 1 : i32
    %163 = scf.for %arg35 = %c1_i32_156 to %162 step %c1_i32_157 iter_args(%arg36 = %161) -> (vector<2x14xf32>)  : i32 {
      %186 = vector.shape_cast %arg36 : vector<2x14xf32> to vector<2x1x14xf32>
      %187 = vector.shape_cast %156 : vector<14x14xf32> to vector<1x14x14xf32>
      %188 = vector.broadcast %186 : vector<2x1x14xf32> to vector<2x14x14xf32>
      %189 = vector.broadcast %187 : vector<1x14x14xf32> to vector<2x14x14xf32>
      %190 = arith.addf %188, %189 : vector<2x14x14xf32>
      %cst_171 = arith.constant dense<0xFF800000> : vector<2x14xf32>
      %191 = vector.multi_reduction <maximumf>, %190, %cst_171 [2] : vector<2x14x14xf32> to vector<2x14xf32>
      %192 = vector.shape_cast %191 : vector<2x14xf32> to vector<2x14x1xf32>
      %193 = tpu.iota {dimensions = array<i32: 2>} : vector<2x14x14xi32>
      %194 = vector.broadcast %192 : vector<2x14x1xf32> to vector<2x14x14xf32>
      %195 = arith.cmpf oeq, %190, %194 : vector<2x14x14xf32>
      %c14_i32_172 = arith.constant 14 : i32
      %196 = vector.broadcast %c14_i32_172 : i32 to vector<2x14x14xi32>
      %197 = arith.select %195, %193, %196 : vector<2x14x14xi1>, vector<2x14x14xi32>
      %cst_173 = arith.constant dense<2147483647> : vector<2x14xi32>
      %198 = vector.multi_reduction <minsi>, %197, %cst_173 [2] : vector<2x14x14xi32> to vector<2x14xi32>
      %199 = arith.index_cast %arg35 : i32 to index
      %c0_174 = arith.constant 0 : index
      %c0_175 = arith.constant 0 : index
      %200 = vector.load %arg34[%199, %c0_174, %c0_175] : memref<8x2x14xi32, #tpu.memory_space<vmem>>, vector<1x2x14xi32>
      %201 = vector.shape_cast %200 : vector<1x2x14xi32> to vector<2x14xi32>
      %202 = vector.shape_cast %198 : vector<2x14xi32> to vector<1x2x14xi32>
      tpu.vector_store %arg34[%199, %c0_174, %c0_175], %202 {strides = array<i32>} : memref<8x2x14xi32, #tpu.memory_space<vmem>>, vector<1x2x14xi32>,
      %203 = vector.shape_cast %192 : vector<2x14x1xf32> to vector<2x14xf32>
      %204 = arith.index_cast %arg35 : i32 to index
      %c0_176 = arith.constant 0 : index
      %c0_177 = arith.constant 0 : index
      %205 = vector.load %arg33[%204, %c0_176, %c0_177] : memref<8x2x14xf32, #tpu.memory_space<vmem>>, vector<1x2x14xf32>
      %206 = vector.shape_cast %205 : vector<1x2x14xf32> to vector<2x14xf32>
      %207 = arith.addf %203, %206 : vector<2x14xf32>
      scf.yield %207 : vector<2x14xf32>
    }
    %c7_i32_158 = arith.constant 7 : i32
    %c0_159 = arith.constant 0 : index
    %c0_160 = arith.constant 0 : index
    %164 = vector.load %arg22[%c0_159, %c0_160] : memref<1x14xf32, #tpu.memory_space<vmem>>, vector<1x14xf32>
    %165 = vector.broadcast %164 : vector<1x14xf32> to vector<2x14xf32>
    %166 = arith.addf %163, %165 : vector<2x14xf32>
    %167 = tpu.iota {dimensions = array<i32: 1>} : vector<2x14xi32>
    %168 = tpu.iota {dimensions = array<i32: 1>} : vector<2x8xi32>
    %cst_161 = arith.constant dense<0xFF800000> : vector<2xf32>
    %169 = vector.multi_reduction <maximumf>, %166, %cst_161 [1] : vector<2x14xf32> to vector<2xf32>
    %170 = vector.shape_cast %169 : vector<2xf32> to vector<2x1xf32>
    %171 = vector.broadcast %170 : vector<2x1xf32> to vector<2x14xf32>
    %172 = arith.cmpf oeq, %166, %171 : vector<2x14xf32>
    %c14_i32 = arith.constant 14 : i32
    %173 = vector.broadcast %c14_i32 : i32 to vector<2x14xi32>
    %174 = arith.select %172, %167, %173 : vector<2x14xi1>, vector<2x14xi32>
    %cst_162 = arith.constant dense<2147483647> : vector<2xi32>
    %175 = vector.multi_reduction <minsi>, %174, %cst_162 [1] : vector<2x14xi32> to vector<2xi32>
    %176 = vector.shape_cast %175 : vector<2xi32> to vector<2x1xi32>
    %c7_i32_163 = arith.constant 7 : i32
    %177 = vector.broadcast %c7_i32_163 : i32 to vector<2x8xi32>
    %178 = arith.cmpi eq, %168, %177 : vector<2x8xi32>
    %179 = vector.shape_cast %176 : vector<2x1xi32> to vector<2x1xi32>
    %180 = vector.broadcast %179 : vector<2x1xi32> to vector<2x8xi32>
    %c0_i32_164 = arith.constant 0 : i32
    %181 = vector.broadcast %c0_i32_164 : i32 to vector<2x8xi32>
    %182 = arith.select %178, %180, %181 : vector<2x8xi1>, vector<2x8xi32>
    %c0_i32_165 = arith.constant 0 : i32
    %c7_i32_166 = arith.constant 7 : i32
    %183 = arith.addi %c0_i32_165, %c7_i32_166 : i32
    %c1_i32_167 = arith.constant 1 : i32
    %184:2 = scf.for %arg35 = %c0_i32_165 to %183 step %c1_i32_167 iter_args(%arg36 = %176, %arg37 = %182) -> (vector<2x1xi32>, vector<2x8xi32>)  : i32 {
      %c7_i32_171 = arith.constant 7 : i32
      %186 = arith.subi %c7_i32_171, %arg35 : i32
      %187 = arith.index_cast %186 : i32 to index
      %c0_172 = arith.constant 0 : index
      %c0_173 = arith.constant 0 : index
      %188 = vector.load %arg34[%187, %c0_172, %c0_173] : memref<8x2x14xi32, #tpu.memory_space<vmem>>, vector<1x2x14xi32>
      %189 = vector.shape_cast %188 : vector<1x2x14xi32> to vector<2x14xi32>
      %190 = vector.broadcast %arg36 : vector<2x1xi32> to vector<2x14xi32>
      %191 = arith.cmpi eq, %167, %190 : vector<2x14xi32>
      %c0_i32_174 = arith.constant 0 : i32
      %192 = vector.broadcast %c0_i32_174 : i32 to vector<2x14xi32>
      %193 = arith.select %191, %189, %192 : vector<2x14xi1>, vector<2x14xi32>
      %cst_175 = arith.constant dense<0> : vector<2xi32>
      %194 = vector.multi_reduction <add>, %193, %cst_175 [1] : vector<2x14xi32> to vector<2xi32>
      %195 = vector.shape_cast %194 : vector<2xi32> to vector<2x1xi32>
      %c1_i32_176 = arith.constant 1 : i32
      %196 = arith.subi %186, %c1_i32_176 : i32
      %197 = vector.broadcast %196 : i32 to vector<2x8xi32>
      %198 = arith.cmpi eq, %168, %197 : vector<2x8xi32>
      %199 = vector.shape_cast %195 : vector<2x1xi32> to vector<2x1xi32>
      %200 = vector.broadcast %199 : vector<2x1xi32> to vector<2x8xi32>
      %201 = arith.select %198, %200, %arg37 : vector<2x8xi1>, vector<2x8xi32>
      scf.yield %195, %201 : vector<2x1xi32>, vector<2x8xi32>
    }
    %c7_i32_168 = arith.constant 7 : i32
    %c0_169 = arith.constant 0 : index
    %c0_170 = arith.constant 0 : index
    %185 = vector.load %arg24[%c0_169, %c0_170] : memref<2x8xi32, #tpu.memory_space<vmem>>, vector<2x8xi32>
    tpu.vector_store %arg24[%c0_169, %c0_170], %184#1 {strides = array<i32>} : memref<2x8xi32, #tpu.memory_space<vmem>>, vector<2x8xi32>,
    return
  }
}

</mosaic_0001>

<bundles_post_ra>
// kernel: tpu_custom_call.1
= control target key start
LH: loop header
LB: loop body
LE: loop exit
PB: predicated region body
PF: predicated region fallthrough
CT: control target
= control target key end

     0   :  { %s6835_s0 = inlined_call_operand.vmem [shape: f32[8,2,188], index: 0, kind: input, shape index: {}]   ;;  %s6836_s1 = inlined_call_operand.hbm [shape: f32[188,192], index: 1, kind: input, shape index: {}]   ;;  %s6837_s2 = inlined_call_operand.hbm [shape: f32[1,192], index: 2, kind: input, shape index: {}]   ;;  %s6838_s3 = inlined_call_operand.hbm [shape: f32[6,32,32], index: 3, kind: input, shape index: {}]   ;;  %s6839_s4 = inlined_call_operand.hbm [shape: f32[2,1,32], index: 4, kind: input, shape index: {}]   ;;  %s6840_s5 = inlined_call_operand.hbm [shape: f32[14,64], index: 5, kind: input, shape index: {}]   ;;  %s6841_s6 = inlined_call_operand.hbm [shape: f32[14,64], index: 6, kind: input, shape index: {}]   ;;  %s6842_s7 = inlined_call_operand.hbm [shape: f32[32,64], index: 7, kind: input, shape index: {}]   ;;  %s6843_s8 = inlined_call_operand.hbm [shape: f32[32,64], index: 8, kind: input, shape index: {}]   ;;  %s6844_s9 = inlined_call_operand.hbm [shape: f32[1,64], index: 9, kind: input, shape index: {}]   ;;  %s6845_s10 = inlined_call_operand.vmem [shape: f32[64,64], index: 10, kind: input, shape index: {}]   ;;  %s6846_s11 = inlined_call_operand.hbm [shape: f32[1,64], index: 11, kind: input, shape index: {}]   ;;  %s6847_s12 = inlined_call_operand.hbm [shape: f32[32,192], index: 12, kind: input, shape index: {}]   ;;  %s6848_s13 = inlined_call_operand.hbm [shape: f32[32,192], index: 13, kind: input, shape index: {}]   ;;  %s6849_s14 = inlined_call_operand.hbm [shape: f32[64,192], index: 14, kind: input, shape index: {}]   ;;  %s6850_s15 = inlined_call_operand.hbm [shape: f32[1,192], index: 15, kind: input, shape index: {}]   ;;  %s6851_s16 = inlined_call_operand.hbm [shape: f32[6,32,32], index: 16, kind: input, shape index: {}]   ;;  %s6852_s17 = inlined_call_operand.hbm [shape: f32[2,1,32], index: 17, kind: input, shape index: {}]   ;;  %s6853_s18 = inlined_call_operand.vmem [shape: f32[32,14], index: 18, kind: input, shape index: {}]   ;;  %s6854_s19 = inlined_call_operand.vmem [shape: f32[32,14], index: 19, kind: input, shape index: {}]   ;;  %s6855_s20 = inlined_call_operand.vmem [shape: f32[1,14], index: 20, kind: input, shape index: {}]   ;;  %s6856_s21 = inlined_call_operand.vmem [shape: f32[1,14], index: 21, kind: input, shape index: {}]   ;;  %s6857_s22 = inlined_call_operand.vmem [shape: f32[1,14], index: 22, kind: input, shape index: {}]   ;;  %s6858_s23 = inlined_call_operand.hbm [shape: f32[14,14], index: 23, kind: input, shape index: {}]   ;;  %s6859_s24 = inlined_call_operand.hbm [shape: s32[2,8], index: 24, kind: output, shape index: {}]  }
   0x1   :  { %6862 = sst [smem:[#allocation50_spill]] %s6835_s0 }
   0x2   :  { %6863 = sst [smem:[#allocation51_spill]] %s6836_s1 }
   0x3   :  { %6864 = sst [smem:[#allocation52_spill]] %s6837_s2 }
   0x4   :  { %6865 = sst [smem:[#allocation53_spill]] %s6838_s3 }
   0x5   :  { %6866 = sst [smem:[#allocation54_spill]] %s6839_s4 }
   0x6   :  { %6867 = sst [smem:[#allocation55_spill]] %s6840_s5 }
   0x7   :  { %6868 = sst [smem:[#allocation56_spill]] %s6841_s6 }
   0x8   :  { %6869 = sst [smem:[#allocation57_spill]] %s6842_s7 }
   0x9   :  { %6870 = sst [smem:[#allocation58_spill]] %s6843_s8 }
   0xa   :  { %29 = vsyncpa [#allocation13], 0 }
   0xb   :  { %30 = vsyncpa [#allocation16], 0 }
   0xc   :  { %31 = vsyncpa [#allocation19], 0 }
   0xd   :  { %32 = vsyncpa [#allocation22], 0 }
   0xe   :  { %33 = vsyncpa [#allocation25], 0 }
   0xf   :  { %34 = vsyncpa [#allocation28], 0 }
  0x10   :  { %35 = vsyncpa [#allocation31], 0 }
  0x11   :  { %36 = vsyncpa [#allocation34], 0 }
  0x12   :  { %37 = vsyncpa [#allocation37], 0 }
  0x13   :  { %38 = vsyncpa [#allocation14], 0  ;;  %s5766_s5 = smov [#allocation15]   ;;  %s5767_s27 = smov [#allocation18]  }
  0x14   :  { %s59_s26 = sshll.u32 %s5766_s5, 4  ;;  %s80_s28 = sshll.u32 %s5767_s27, 4  ;;  %s60_s26 = int_to_ptr.vmem [resolvable:$true] %s59_s26  ;;  %s81_s28 = int_to_ptr.vmem [resolvable:$true] %s80_s28 }
  0x15   :  { %s5306_s6 = scalar_lea.vmem %s60_s26, 32  ;;  %p5311_p1 = scmp.lt.s32.totalorder %s60_s26, %s60_s26 }
  0x16   :  { %p5307_p0 = scmp.ne.s32.totalorder %s60_s26, %s5306_s6  ;;  %p5312_p2 = scmp.lt.s32.totalorder %s5306_s6, %s5306_s6 }
  0x18   :  { %p5313_p3 = por %p5312_p2, %p5311_p1 }
  0x1a   :  { %p5314_p4 = pnand %p5313_p3, %p5307_p0 }
  0x1c   :  { %5317 = shalt.err (!%p5314_p4)
}
  0x1d   :  { %s6871_s0 = sld [smem:[#allocation52_spill]]  ;;  %s5326_s7 = scalar_lea.vmem %s81_s28, 32 }
  0x1e   :  { %p5327_p5 = scmp.ne.s32.totalorder %s81_s28, %s5326_s7  ;;  %p5331_p6 = scmp.lt.s32.totalorder %s81_s28, %s81_s28 }
  0x1f   :  { %p5332_p7 = scmp.lt.s32.totalorder %s5326_s7, %s5326_s7 }
  0x21   :  { %p5333_p8 = por %p5332_p7, %p5331_p6 }
  0x23   :  { %62 = dma.hbm_to_vmem [thread:$0]  %s6871_s0, 32, %s60_s26, [#allocation16]  }
  0x24   :  { %p5334_p9 = pnand %p5333_p8, %p5327_p5 }
  0x26   :  { %5337 = shalt.err (!%p5334_p9)
}
  0x27   :  { %s5768_s30 = smov 16   ;;  %s6861_s3 = smov 1  }
  0x28   :  { %s6872_s4 = sld [smem:[#allocation54_spill]]  ;;  %s5770_s1 = smov [#allocation21]  }
  0x29   :  { %s104_s5 = sshll.u32 %s5770_s1, 4  ;;  %s5771_s26 = smov [#allocation24]   ;;  %s105_s5 = int_to_ptr.vmem [resolvable:$true] %s104_s5 }
  0x2a   :  { %s128_s27 = sshll.u32 %s5771_s26, 4  ;;  %s5346_s6 = scalar_lea.vmem %s105_s5, 256  ;;  %s129_s27 = int_to_ptr.vmem [resolvable:$true] %s128_s27 }
  0x2b   :  { %p5347_p10 = scmp.ne.s32.totalorder %s105_s5, %s5346_s6  ;;  %p5351_p11 = scmp.lt.s32.totalorder %s105_s5, %s105_s5 }
  0x2c   :  { %p5352_p12 = scmp.lt.s32.totalorder %s5346_s6, %s5346_s6 }
  0x2e   :  { %86 = dma.hbm_to_vmem [thread:$0]  %s6872_s4, 32, %s81_s28, [#allocation19], %s5768_s30, %s5768_s30, %s6861_s3  }
  0x2f   :  { %p5353_p13 = por %p5352_p12, %p5351_p11 }
  0x31   :  { %p5354_p0 = pnand %p5353_p13, %p5347_p10 }
  0x33   :  { %5357 = shalt.err (!%p5354_p0)
}
  0x34   :  { %s5772_s2 = smov 128   ;;  %s5773_s29 = smov 8  }
  0x35   :  { %s6873_s7 = sld [smem:[#allocation56_spill]]  ;;  %s5366_s25 = scalar_lea.vmem %s129_s27, 512 }
  0x36   :  { %p5367_p1 = scmp.ne.s32.totalorder %s129_s27, %s5366_s25  ;;  %p5371_p2 = scmp.lt.s32.totalorder %s129_s27, %s129_s27 }
  0x37   :  { %p5372_p3 = scmp.lt.s32.totalorder %s5366_s25, %s5366_s25 }
  0x39   :  { %p5373_p4 = por %p5372_p3, %p5371_p2 }
  0x3b   :  { %110 = dma.hbm_to_vmem [thread:$0]  %s6873_s7, 256, %s105_s5, [#allocation22], %s5772_s2, %s5772_s2, %s5773_s29  }
  0x3c   :  { %p5374_p5 = pnand %p5373_p4, %p5367_p1 }
  0x3e   :  { %5377 = shalt.err (!%p5374_p5)
}
  0x3f   :  { %s6874_s1 = sld [smem:[#allocation58_spill]]  ;;  %s5774_s26 = smov [#allocation27]  }
  0x40   :  { %s153_s6 = sshll.u32 %s5774_s26, 4  ;;  %s5775_s3 = smov [#allocation30]   ;;  %s154_s6 = int_to_ptr.vmem [resolvable:$true] %s153_s6 }
  0x41   :  { %s174_s0 = sshll.u32 %s5775_s3, 4  ;;  %s5386_s5 = scalar_lea.vmem %s154_s6, 16  ;;  %s175_s0 = int_to_ptr.vmem [resolvable:$true] %s174_s0 }
  0x42   :  { %p5387_p6 = scmp.ne.s32.totalorder %s154_s6, %s5386_s5  ;;  %s5390_s28 = scalar_lea.vmem %s154_s6, 32 }
  0x43   :  { %p5391_p7 = scmp.lt.s32.totalorder %s154_s6, %s154_s6  ;;  %p5392_p8 = scmp.lt.s32.totalorder %s5390_s28, %s5386_s5 }
  0x45   :  { %134 = dma.hbm_to_vmem [thread:$0]  %s6874_s1, 512, %s129_s27, [#allocation25], %s5772_s2, %s5772_s2, %s5773_s29  }
  0x46   :  { %p5393_p9 = por %p5392_p8, %p5391_p7 }
  0x48   :  { %p5394_p10 = pnand %p5393_p9, %p5387_p6 }
  0x4a   :  { %5397 = shalt.err (!%p5394_p10)
}
  0x4b   :  { %156 = dma.hbm_to_vmem [thread:$0]  %s6846_s11, 16, %s154_s6, [#allocation28]  }
  0x4c   :  { %s5406_s8 = scalar_lea.vmem %s175_s0, 1024  ;;  %p5411_p12 = scmp.lt.s32.totalorder %s175_s0, %s175_s0 }
  0x4d   :  { %p5407_p11 = scmp.ne.s32.totalorder %s175_s0, %s5406_s8  ;;  %p5412_p13 = scmp.lt.s32.totalorder %s5406_s8, %s5406_s8 }
  0x4f   :  { %p5413_p0 = por %p5412_p13, %p5411_p12 }
  0x51   :  { %p5414_p1 = pnand %p5413_p0, %p5407_p11 }
  0x53   :  { %5417 = shalt.err (!%p5414_p1)
}
  0x54   :  { %s5776_s3 = smov 256   ;;  %s5777_s1 = smov [#allocation33]  }
  0x55   :  { %180 = dma.hbm_to_vmem [thread:$0]  %s6848_s13, 1024, %s175_s0, [#allocation31], %s5776_s3, %s5776_s3, %s5768_s30  }
  0x56   :  { %s199_s26 = sshll.u32 %s5777_s1, 4  ;;  %s5778_s11 = smov [#allocation36]   ;;  %s200_s26 = int_to_ptr.vmem [resolvable:$true] %s199_s26 }
  0x57   :  { %s220_s6 = sshll.u32 %s5778_s11, 4  ;;  %s5426_s5 = scalar_lea.vmem %s200_s26, 32  ;;  %s221_s6 = int_to_ptr.vmem [resolvable:$true] %s220_s6 }
  0x58   :  { %p5427_p2 = scmp.ne.s32.totalorder %s200_s26, %s5426_s5  ;;  %p5431_p3 = scmp.lt.s32.totalorder %s200_s26, %s200_s26 }
  0x59   :  { %p5432_p4 = scmp.lt.s32.totalorder %s5426_s5, %s5426_s5 }
  0x5b   :  { %p5433_p5 = por %p5432_p4, %p5431_p3 }
  0x5d   :  { %p5434_p6 = pnand %p5433_p5, %p5427_p2 }
  0x5f   :  { %5437 = shalt.err (!%p5434_p6)
}
  0x60   :  { %202 = dma.hbm_to_vmem [thread:$0]  %s6850_s15, 32, %s200_s26, [#allocation34]  }
  0x61   :  { %s5446_s25 = scalar_lea.vmem %s221_s6, 32  ;;  %p5451_p8 = scmp.lt.s32.totalorder %s221_s6, %s221_s6 }
  0x62   :  { %p5447_p7 = scmp.ne.s32.totalorder %s221_s6, %s5446_s25  ;;  %p5452_p9 = scmp.lt.s32.totalorder %s5446_s25, %s5446_s25 }
  0x64   :  { %p5453_p10 = por %p5452_p9, %p5451_p8 }
  0x66   :  { %p5454_p11 = pnand %p5453_p10, %p5447_p7 }
  0x68   :  { %5457 = shalt.err (!%p5454_p11)
}
  0x69   :  { %s6875_s13 = smov 1   ;;  %s5779_s27 = smov [#allocation12]  }
  0x6a   :  { %226 = dma.hbm_to_vmem [thread:$0]  %s6852_s17, 32, %s221_s6, [#allocation37], %s5768_s30, %s5768_s30, %s6875_s13  }
  0x6b   :  { %s46_s4 = sshll.u32 %s5779_s27, 4  ;;  %s5780_s1 = smov [#allocation17]   ;;  %s47_s4 = int_to_ptr.vmem [resolvable:$true] %s46_s4 }
  0x6c   :  { %s68_s15 = sshll.u32 %s5780_s1, 4  ;;  %s5466_s26 = scalar_lea.vmem %s47_s4, 6144  ;;  %s69_s15 = int_to_ptr.vmem [resolvable:$true] %s68_s15 }
  0x6d   :  { %p5467_p12 = scmp.ne.s32.totalorder %s47_s4, %s5466_s26  ;;  %p5471_p13 = scmp.lt.s32.totalorder %s47_s4, %s47_s4 }
  0x6e   :  { %p5472_p0 = scmp.lt.s32.totalorder %s5466_s26, %s5466_s26 }
  0x70   :  { %p5473_p1 = por %p5472_p0, %p5471_p13 }
  0x72   :  { %p5474_p2 = pnand %p5473_p1, %p5467_p12 }
  0x74   :  { %5477 = shalt.err (!%p5474_p2)
}
  0x75   :  { %s6876_s28 = sld [smem:[#allocation51_spill]]  ;;  %s5486_s17 = scalar_lea.vmem %s69_s15, 3072 }
  0x76   :  { %p5487_p3 = scmp.ne.s32.totalorder %s69_s15, %s5486_s17  ;;  %p5491_p4 = scmp.lt.s32.totalorder %s69_s15, %s69_s15 }
  0x77   :  { %p5492_p5 = scmp.lt.s32.totalorder %s5486_s17, %s5486_s17 }
  0x79   :  { %p5493_p6 = por %p5492_p5, %p5491_p4 }
  0x7b   :  { %52 = dma.hbm_to_vmem [thread:$0]  %s6876_s28, 6144, %s47_s4, [#allocation13], %s5776_s3, %s5776_s3, %s5768_s30  }
  0x7c   :  { %p5494_p7 = pnand %p5493_p6, %p5487_p3 }
  0x7e   :  { %5497 = shalt.err (!%p5494_p7)
}
  0x7f   :  { %s6877_s25 = sld [smem:[#allocation53_spill]]  ;;  %s5781_s13 = smov [#allocation20]  }
  0x80   :  { %s92_s0 = sshll.u32 %s5781_s13, 4  ;;  %s5782_s8 = smov [#allocation23]   ;;  %s93_s0 = int_to_ptr.vmem [resolvable:$true] %s92_s0 }
  0x81   :  { %s116_s27 = sshll.u32 %s5782_s8, 4  ;;  %s5506_s4 = scalar_lea.vmem %s93_s0, 256  ;;  %s117_s27 = int_to_ptr.vmem [resolvable:$true] %s116_s27 }
  0x82   :  { %p5507_p8 = scmp.ne.s32.totalorder %s93_s0, %s5506_s4  ;;  %p5511_p9 = scmp.lt.s32.totalorder %s93_s0, %s93_s0 }
  0x83   :  { %p5512_p10 = scmp.lt.s32.totalorder %s5506_s4, %s5506_s4 }
  0x85   :  { %74 = dma.hbm_to_vmem [thread:$0]  %s6877_s25, 3072, %s69_s15, [#allocation16], %s5772_s2, %s5772_s2, %s5773_s29  }
  0x86   :  { %p5513_p11 = por %p5512_p10, %p5511_p9 }
  0x88   :  { %p5514_p12 = pnand %p5513_p11, %p5507_p8 }
  0x8a   :  { %5517 = shalt.err (!%p5514_p12)
}
  0x8b   :  { %s6878_s11 = sld [smem:[#allocation55_spill]]  ;;  %s5526_s15 = scalar_lea.vmem %s117_s27, 512 }
  0x8c   :  { %p5527_p13 = scmp.ne.s32.totalorder %s117_s27, %s5526_s15  ;;  %p5531_p0 = scmp.lt.s32.totalorder %s117_s27, %s117_s27 }
  0x8d   :  { %p5532_p1 = scmp.lt.s32.totalorder %s5526_s15, %s5526_s15 }
  0x8f   :  { %p5533_p2 = por %p5532_p1, %p5531_p0 }
  0x91   :  { %98 = dma.hbm_to_vmem [thread:$0]  %s6878_s11, 256, %s93_s0, [#allocation19], %s5772_s2, %s5772_s2, %s5773_s29  }
  0x92   :  { %p5534_p3 = pnand %p5533_p2, %p5527_p13 }
  0x94   :  { %5537 = shalt.err (!%p5534_p3)
}
  0x95   :  { %s6879_s17 = sld [smem:[#allocation57_spill]]  ;;  %s5783_s6 = smov [#allocation26]  }
  0x96   :  { %s141_s7 = sshll.u32 %s5783_s6, 4  ;;  %s5784_s25 = smov [#allocation29]   ;;  %s142_s7 = int_to_ptr.vmem [resolvable:$true] %s141_s7 }
  0x97   :  { %s162_s13 = sshll.u32 %s5784_s25, 4  ;;  %s5546_s0 = scalar_lea.vmem %s142_s7, 16  ;;  %s163_s13 = int_to_ptr.vmem [resolvable:$true] %s162_s13 }
  0x98   :  { %p5547_p4 = scmp.ne.s32.totalorder %s142_s7, %s5546_s0  ;;  %s5550_s8 = scalar_lea.vmem %s142_s7, 32 }
  0x99   :  { %p5551_p5 = scmp.lt.s32.totalorder %s142_s7, %s142_s7  ;;  %p5552_p6 = scmp.lt.s32.totalorder %s5550_s8, %s5546_s0 }
  0x9b   :  { %122 = dma.hbm_to_vmem [thread:$0]  %s6879_s17, 512, %s117_s27, [#allocation22], %s5772_s2, %s5772_s2, %s5773_s29  }
  0x9c   :  { %p5553_p7 = por %p5552_p6, %p5551_p5 }
  0x9e   :  { %p5554_p8 = pnand %p5553_p7, %p5547_p4 }
  0xa0   :  { %5557 = shalt.err (!%p5554_p8)
}
  0xa1   :  { %144 = dma.hbm_to_vmem [thread:$0]  %s6844_s9, 16, %s142_s7, [#allocation25]  }
  0xa2   :  { %s5566_s26 = scalar_lea.vmem %s163_s13, 1024  ;;  %p5571_p10 = scmp.lt.s32.totalorder %s163_s13, %s163_s13 }
  0xa3   :  { %p5567_p9 = scmp.ne.s32.totalorder %s163_s13, %s5566_s26  ;;  %p5572_p11 = scmp.lt.s32.totalorder %s5566_s26, %s5566_s26 }
  0xa5   :  { %p5573_p12 = por %p5572_p11, %p5571_p10 }
  0xa7   :  { %p5574_p13 = pnand %p5573_p12, %p5567_p9 }
  0xa9   :  { %5577 = shalt.err (!%p5574_p13)
}
  0xaa   :  { %168 = dma.hbm_to_vmem [thread:$0]  %s6847_s12, 1024, %s163_s13, [#allocation28], %s5776_s3, %s5776_s3, %s5768_s30  }
  0xab   :  { %s5785_s15 = smov [#allocation32]   ;;  %s5786_s28 = smov [#allocation35]  }
  0xac   :  { %s186_s5 = sshll.u32 %s5785_s15, 4  ;;  %s208_s9 = sshll.u32 %s5786_s28, 4  ;;  %s187_s5 = int_to_ptr.vmem [resolvable:$true] %s186_s5  ;;  %s209_s9 = int_to_ptr.vmem [resolvable:$true] %s208_s9 }
  0xad   :  { %s5586_s17 = scalar_lea.vmem %s187_s5, 2048  ;;  %p5591_p1 = scmp.lt.s32.totalorder %s187_s5, %s187_s5 }
  0xae   :  { %p5587_p0 = scmp.ne.s32.totalorder %s187_s5, %s5586_s17  ;;  %p5592_p2 = scmp.lt.s32.totalorder %s5586_s17, %s5586_s17 }
  0xb0   :  { %p5593_p3 = por %p5592_p2, %p5591_p1 }
  0xb2   :  { %p5594_p4 = pnand %p5593_p3, %p5587_p0 }
  0xb4   :  { %5597 = shalt.err (!%p5594_p4)
}
  0xb5   :  { %192 = dma.hbm_to_vmem [thread:$0]  %s6849_s14, 2048, %s187_s5, [#allocation31], %s5776_s3, %s5776_s3, %s5768_s30  }
  0xb6   :  { %s5606_s12 = scalar_lea.vmem %s209_s9, 3072  ;;  %p5611_p6 = scmp.lt.s32.totalorder %s209_s9, %s209_s9 }
  0xb7   :  { %p5607_p5 = scmp.ne.s32.totalorder %s209_s9, %s5606_s12  ;;  %p5612_p7 = scmp.lt.s32.totalorder %s5606_s12, %s5606_s12 }
  0xb9   :  { %p5613_p8 = por %p5612_p7, %p5611_p6 }
  0xbb   :  { %p5614_p9 = pnand %p5613_p8, %p5607_p5 }
  0xbd   :  { %5617 = shalt.err (!%p5614_p9)
}
  0xbe   :  { %214 = dma.hbm_to_vmem [thread:$0]  %s6851_s16, 3072, %s209_s9, [#allocation34], %s5772_s2, %s5772_s2, %s5773_s29  }
  0xbf   :  { %s5787_s0 = smov [#allocation38]  }
  0xc0   :  { %s242_s8 = sshll.u32 %s5787_s0, 4  ;;  %s243_s8 = int_to_ptr.vmem [resolvable:$true] %s242_s8 }
  0xc1   :  { %s5626_s4 = scalar_lea.vmem %s243_s8, 256  ;;  %p5631_p11 = scmp.lt.s32.totalorder %s243_s8, %s243_s8 }
  0xc2   :  { %p5627_p10 = scmp.ne.s32.totalorder %s243_s8, %s5626_s4  ;;  %p5632_p12 = scmp.lt.s32.totalorder %s5626_s4, %s5626_s4 }
  0xc4   :  { %p5633_p13 = por %p5632_p12, %p5631_p11 }
  0xc6   :  { %p5634_p0 = pnand %p5633_p13, %p5627_p10 }
  0xc8   :  { %5637 = shalt.err (!%p5634_p0)
}
  0xc9   :  { %248 = dma.hbm_to_vmem [thread:$0]  %s6858_s23, 256, %s243_s8, [#allocation37], %s5772_s2, %s5772_s2, %s5773_s29  }
  0xca   :  { %5702 = dma.done.wait [#allocation13], 6144  }
  0xcb   :  { %5703 = vsyncadd [#allocation13], 4294961152 }
  0xcc   :  { %5704 = dma.done.wait [#allocation16], 3104  }
  0xcd   :  { %5705 = vsyncadd [#allocation16], 4294964192 }
  0xce   :  { %5706 = dma.done.wait [#allocation19], 288  }
  0xcf   :  { %5707 = vsyncadd [#allocation19], 4294967008 }
  0xd0   :  { %5708 = dma.done.wait [#allocation22], 768  }
  0xd1   :  { %5709 = vsyncadd [#allocation22], 4294966528 }
  0xd2   :  { %5710 = dma.done.wait [#allocation25], 528  }
  0xd3   :  { %5711 = vsyncadd [#allocation25], 4294966768 }
  0xd4   :  { %5712 = dma.done.wait [#allocation28], 1040  }
  0xd5   :  { %5713 = vsyncadd [#allocation28], 4294966256 }
  0xd6   :  { %5714 = dma.done.wait [#allocation31], 3072  }
  0xd7   :  { %5715 = vsyncadd [#allocation31], 4294964224 }
  0xd8   :  { %5716 = dma.done.wait [#allocation34], 3104  }
  0xd9   :  { %5717 = vsyncadd [#allocation34], 4294964192 }
  0xda   :  { %5718 = dma.done.wait [#allocation37], 288  }
  0xdb   :  { %5719 = vsyncadd [#allocation37], 4294967008  ;;  %v6015_v0 = vld [vmem:[#allocation17] sm:$0xff]  ;;  %v6017_v1 = vld [vmem:[#allocation17 + $0x8] sm:$0xff]  ;;  %v358_v56 = vlaneseq  ;;  %v5788_v57 = vmov 1983009808  }
  0xdc   :  { %v6019_v2 = vld [vmem:[#allocation17 + $0x10] sm:$0xff]  ;;  %v6021_v3 = vld [vmem:[#allocation17 + $0x18] sm:$0xff]  ;;  %v6023_v4 = vld [vmem:[#allocation17 + $0x20] sm:$0xff]  ;;  %v368_v58 = vunpack.c.l.s4 %v5788_v57  ;;  %vm437_vm0 = vcmask 1043456   ;;  %s6880_s2 = sld [smem:[#allocation50_spill]]  ;;  %vm432_vm1 = vcmask 490496  }
  0xdd   :  { %v6025_v5 = vld [vmem:[#allocation17 + $0x28] sm:$0xff]  ;;  %v6027_v6 = vld [vmem:[#allocation17 + $0x30] sm:$0xff]  ;;  %v6029_v7 = vld [vmem:[#allocation17 + $0x38] sm:$0xff]  ;;  %v6068_v63 = vshrl.u32 %v358_v56, 7  ;;  %vm569_vm2 = vcmask 254976   ;;  %s5789_s15 = smov 96  }
  0xde   :  { %v6031_v8 = vld [vmem:[#allocation17 + $0x40] sm:$0xff]  ;;  %v6033_v9 = vld [vmem:[#allocation17 + $0x48] sm:$0xff]  ;;  %v6035_v10 = vld [vmem:[#allocation17 + $0x50] sm:$0xff]  ;;  %s5790_s5 = smov 64   ;;  %s5791_s28 = smov 32  }
  0xdf   :  { %v6037_v11 = vld [vmem:[#allocation17 + $0x58] sm:$0xff]  ;;  %v6039_v12 = vld [vmem:[#allocation17 + $0x60] sm:$0xff]  ;;  %v6041_v13 = vld [vmem:[#allocation17 + $0x68] sm:$0xff]  ;;  %s6191_s9 = smov 0  }
  0xe0   :  { %v6043_v14 = vld [vmem:[#allocation17 + $0x70] sm:$0xff]  ;;  %v6045_v15 = vld [vmem:[#allocation17 + $0x78] sm:$0xff]  ;;  %v6047_v16 = vld [vmem:[#allocation17 + $0x80] sm:$0xff] }
  0xe1   :  { %v6049_v17 = vld [vmem:[#allocation17 + $0x88] sm:$0xff]  ;;  %v6051_v18 = vld [vmem:[#allocation17 + $0x90] sm:$0xff]  ;;  %v6053_v19 = vld [vmem:[#allocation17 + $0x98] sm:$0xff] }
  0xe2   :  { %v6055_v20 = vld [vmem:[#allocation17 + $0xa0] sm:$0xff]  ;;  %v6057_v21 = vld [vmem:[#allocation17 + $0xa8] sm:$0xff]  ;;  %v6059_v22 = vld [vmem:[#allocation17 + $0xb0] sm:$0xff] }
  0xe3   :  { %v6061_v23 = vld [vmem:[#allocation17 + $0xb8] sm:$0xff]  ;;  %v6063_v24 = vld [vmem:[#allocation18] ss:$0 sm:$0xff]  ;;  %v6065_v25 = vld [vmem:[#allocation18 + $0x1] ss:$0 sm:$0xff] }
  0xe4   :  { %v339_v26 = vld [vmem:[#allocation12 + $0xf8] sm:$0xff]  ;;  %v338_v27 = vld [vmem:[#allocation12 + $0xf0] sm:$0xff]  ;;  %v337_v28 = vld [vmem:[#allocation12 + $0xe8] sm:$0xff] }
  0xe5   :  { %444 = vmatprep.subr.mxu0 %v339_v26  ;;  %5014 = vmatprep.subr.mxu1 %v339_v26  ;;  %v336_v29 = vld [vmem:[#allocation12 + $0xe0] sm:$0xff]  ;;  %v335_v30 = vld [vmem:[#allocation12 + $0xd8] sm:$0xff]  ;;  %v334_v31 = vld [vmem:[#allocation12 + $0xd0] sm:$0xff]  ;;  %v369_v26 = vunpack.c.0.s8 %v368_v58 }
  0xe6   :  { %445 = vmatpush1.msra.mxu0 %v338_v27  ;;  %5038 = vmatpush1.msra.mxu1 %v338_v27  ;;  %v333_v32 = vld [vmem:[#allocation12 + $0xc8] sm:$0xff]  ;;  %v332_v33 = vld [vmem:[#allocation12 + $0xc0] sm:$0xff]  ;;  %v331_v34 = vld [vmem:[#allocation12 + $0xb8] sm:$0xff] }
  0xe7   :  { %446 = vmatprep.subr.mxu0 %v337_v28  ;;  %5015 = vmatprep.subr.mxu1 %v337_v28  ;;  %v330_v35 = vld [vmem:[#allocation12 + $0xb0] sm:$0xff]  ;;  %v329_v36 = vld [vmem:[#allocation12 + $0xa8] sm:$0xff]  ;;  %v328_v37 = vld [vmem:[#allocation12 + $0xa0] sm:$0xff] }
  0xe8   :  { %447 = vmatpush1.msra.mxu0 %v336_v29  ;;  %5039 = vmatpush1.msra.mxu1 %v336_v29  ;;  %v327_v38 = vld [vmem:[#allocation12 + $0x98] sm:$0xff]  ;;  %v326_v39 = vld [vmem:[#allocation12 + $0x90] sm:$0xff]  ;;  %v325_v40 = vld [vmem:[#allocation12 + $0x88] sm:$0xff] }
  0xe9   :  { %448 = vmatprep.subr.mxu0 %v335_v30  ;;  %5016 = vmatprep.subr.mxu1 %v335_v30  ;;  %v324_v41 = vld [vmem:[#allocation12 + $0x80] sm:$0xff]  ;;  %v323_v42 = vld [vmem:[#allocation12 + $0x78] sm:$0xff]  ;;  %v322_v43 = vld [vmem:[#allocation12 + $0x70] sm:$0xff] }
  0xea   :  { %449 = vmatpush1.msra.mxu0 %v334_v31  ;;  %5040 = vmatpush1.msra.mxu1 %v334_v31  ;;  %v321_v44 = vld [vmem:[#allocation12 + $0x68] sm:$0xff]  ;;  %v320_v45 = vld [vmem:[#allocation12 + $0x60] sm:$0xff]  ;;  %v319_v46 = vld [vmem:[#allocation12 + $0x58] sm:$0xff]  ;;  %v6071_v31 = vsub.s32 %v369_v26, %v6068_v63 }
  0xeb   :  { %450 = vmatprep.subr.mxu0 %v333_v32  ;;  %5017 = vmatprep.subr.mxu1 %v333_v32  ;;  %v318_v47 = vld [vmem:[#allocation12 + $0x50] sm:$0xff]  ;;  %v317_v48 = vld [vmem:[#allocation12 + $0x48] sm:$0xff]  ;;  %v316_v49 = vld [vmem:[#allocation12 + $0x40] sm:$0xff] }
  0xec   :  { %451 = vmatpush1.msra.mxu0 %v332_v33  ;;  %5041 = vmatpush1.msra.mxu1 %v332_v33  ;;  %v315_v50 = vld [vmem:[#allocation12 + $0x38] sm:$0xff]  ;;  %v314_v51 = vld [vmem:[#allocation12 + $0x30] sm:$0xff]  ;;  %v313_v52 = vld [vmem:[#allocation12 + $0x28] sm:$0xff] }
  0xed   :  { %452 = vmatprep.subr.mxu0 %v331_v34  ;;  %5018 = vmatprep.subr.mxu1 %v331_v34  ;;  %v312_v53 = vld [vmem:[#allocation12 + $0x20] sm:$0xff]  ;;  %v311_v54 = vld [vmem:[#allocation12 + $0x18] sm:$0xff]  ;;  %v310_v55 = vld [vmem:[#allocation12 + $0x10] sm:$0xff] }
  0xee   :  { %453 = vmatpush1.msra.mxu0 %v330_v35  ;;  %5042 = vmatpush1.msra.mxu1 %v330_v35  ;;  %v309_v59 = vld [vmem:[#allocation12 + $0x8] sm:$0xff]  ;;  %v308_v60 = vld [vmem:[#allocation12] sm:$0xff]  ;;  %v355_v61 = vld [vmem:[#allocation12 + $0x178] sm:$0xf] }
  0xef   :  { %454 = vmatprep.subr.mxu0 %v329_v36  ;;  %5019 = vmatprep.subr.mxu1 %v329_v36  ;;  %v354_v62 = vld [vmem:[#allocation12 + $0x170] sm:$0xf]  ;;  %v353_v27 = vld [vmem:[#allocation12 + $0x168] sm:$0xff]  ;;  %v352_v28 = vld [vmem:[#allocation12 + $0x160] sm:$0xff] }
  0xf0   :  { %455 = vmatpush1.msra.mxu0 %v328_v37  ;;  %5043 = vmatpush1.msra.mxu1 %v328_v37  ;;  %v351_v29 = vld [vmem:[#allocation12 + $0x158] sm:$0xff]  ;;  %v350_v30 = vld [vmem:[#allocation12 + $0x150] sm:$0xff]  ;;  %v5294_v32 = vld.sshfl [vmem:[%s6880_s2] sm:$0xff pattern:$0x76325410] }
  0xf1   :  { %456 = vmatprep.subr.mxu0 %v327_v38  ;;  %5020 = vmatprep.subr.mxu1 %v327_v38  ;;  %v5295_v33 = vld.sshfl [vmem:[%s6880_s2 + $0x8] sm:$0xff pattern:$0x76325410]  ;;  %v348_v35 = vld [vmem:[#allocation12 + $0x140] sm:$0xff]  ;;  %v347_v36 = vld [vmem:[#allocation12 + $0x138] sm:$0xff] }
  0xf2   :  { %457 = vmatpush1.msra.mxu0 %v326_v39  ;;  %5044 = vmatpush1.msra.mxu1 %v326_v39  ;;  %v349_v34 = vld [vmem:[#allocation12 + $0x148] sm:$0xff]  ;;  %v5296_v37 = vld.sshfl [vmem:[%s6880_s2 + $0x10] sm:$0xff pattern:$0x76325410] }
  0xf3   :  { %458 = vmatprep.subr.mxu0 %v325_v40  ;;  %5021 = vmatprep.subr.mxu1 %v325_v40  ;;  %v5297_v38 = vld.sshfl [vmem:[%s6880_s2 + $0x18] sm:$0xff pattern:$0x76325410]  ;;  %v346_v39 = vld [vmem:[#allocation12 + $0x130] sm:$0xff]  ;;  %v345_v40 = vld [vmem:[#allocation12 + $0x128] sm:$0xff] }
  0xf4   :  { %459 = vmatpush1.msra.mxu0 %v324_v41  ;;  %5045 = vmatpush1.msra.mxu1 %v324_v41  ;;  %v344_v41 = vld [vmem:[#allocation12 + $0x120] sm:$0xff] }
  0xf5   :  { %460 = vmatprep.subr.mxu0 %v323_v42  ;;  %5022 = vmatprep.subr.mxu1 %v323_v42  ;;  %v343_v42 = vld [vmem:[#allocation12 + $0x118] sm:$0xff] }
  0xf6   :  { %461 = vmatpush1.msra.mxu0 %v322_v43  ;;  %5046 = vmatpush1.msra.mxu1 %v322_v43  ;;  %v342_v43 = vld [vmem:[#allocation12 + $0x110] sm:$0xff] }
  0xf7   :  { %462 = vmatprep.subr.mxu0 %v321_v44  ;;  %5023 = vmatprep.subr.mxu1 %v321_v44  ;;  %v399_v44 = vcombine.high %v5294_v32, %v5295_v33 }
  0xf8   :  { %463 = vmatpush1.msra.mxu0 %v320_v45  ;;  %5047 = vmatpush1.msra.mxu1 %v320_v45  ;;  %v341_v45 = vld [vmem:[#allocation12 + $0x108] sm:$0xff] }
  0xf9   :  { %464 = vmatprep.subr.mxu0 %v319_v46  ;;  %5024 = vmatprep.subr.mxu1 %v319_v46  ;;  %v340_v46 = vld [vmem:[#allocation12 + $0x100] sm:$0xff] }
  0xfa   :  { %465 = vmatpush1.msra.mxu0 %v318_v47  ;;  %5048 = vmatpush1.msra.mxu1 %v318_v47  ;;  %v398_v47 = vcombine.low %v5294_v32, %v5295_v33 }
  0xfb   :  { %466 = vmatprep.subr.mxu0 %v317_v48  ;;  %5025 = vmatprep.subr.mxu1 %v317_v48  ;;  %v417_v48 = vcombine.high %v5296_v37, %v5297_v38 }
  0xfc   :  { %467 = vmatpush1.msra.mxu0 %v316_v49  ;;  %5049 = vmatpush1.msra.mxu1 %v316_v49  ;;  %v416_v49 = vcombine.low %v5296_v37, %v5297_v38 }
  0xfd   :  { %468 = vmatprep.subr.mxu0 %v315_v50  ;;  %5026 = vmatprep.subr.mxu1 %v315_v50  ;;  %v6086_v50 = vsub.s32 0, %v6068_v63 }
  0xfe   :  { %469 = vmatpush1.msra.mxu0 %v314_v51  ;;  %5050 = vmatpush1.msra.mxu1 %v314_v51  ;;  %v6089_v51 = vsub.s32 1, %v6068_v63 }
  0xff   :  { %470 = vmatprep.subr.mxu0 %v313_v52  ;;  %5027 = vmatprep.subr.mxu1 %v313_v52  ;;  %v356_v52 = vld [vmem:[#allocation15] sm:$0x3] }
 0x100   :  { %471 = vmatpush1.msra.mxu0 %v312_v53  ;;  %5051 = vmatpush1.msra.mxu1 %v312_v53  ;;  %v361_v53 = vrot.slane %v356_v52, %v6086_v50 }
 0x101   :  { %472 = vmatprep.subr.mxu0 %v311_v54  ;;  %5028 = vmatprep.subr.mxu1 %v311_v54  ;;  %v365_v54 = vrot.slane %v356_v52, %v6089_v51 }
 0x102   :  { %473 = vmatpush1.msra.mxu0 %v310_v55  ;;  %5052 = vmatpush1.msra.mxu1 %v310_v55 }
 0x103   :  { %474 = vmatprep.subr.mxu0 %v309_v59  ;;  %5029 = vmatprep.subr.mxu1 %v309_v59  ;;  %v366_v55 = vcombine.low %v361_v53, %v365_v54 }
 0x104   :  { %475 = vmatpush1.msra.mxu0 %v308_v60  ;;  %5053 = vmatpush1.msra.mxu1 %v308_v60 }
 0x105   :  { %4593 = vmatprep.subr.msk.mxu0 %vm437_vm0, %v355_v61  ;;  %5030 = vmatprep.subr.msk.mxu1 %vm437_vm0, %v355_v61  ;;  %v373_v57 = vrot.slane %v366_v55, %v6071_v31 }
 0x106   :  { %4594 = vmatpush2.msk.msra.mxu0 %vm437_vm0, %v354_v62  ;;  %5054 = vmatpush2.msk.msra.mxu1 %vm437_vm0, %v354_v62 }
 0x107   :  { %494 = vmatprep.subr.mxu0 %v353_v27  ;;  %5031 = vmatprep.subr.mxu1 %v353_v27  ;;  %v420_v58 = vcombine.low %v373_v57, %v373_v57 }
 0x108   :  { %495 = vmatpush2.msra.mxu0 %v352_v28  ;;  %5055 = vmatpush2.msra.mxu1 %v352_v28 }
 0x109   :  { %496 = vmatprep.subr.mxu0 %v351_v29  ;;  %5032 = vmatprep.subr.mxu1 %v351_v29  ;;  %v427_v59 = vrot.slane %v420_v58, %v6071_v31 }
 0x10a   :  { %497 = vmatpush2.msra.mxu0 %v350_v30  ;;  %5056 = vmatpush2.msra.mxu1 %v350_v30 }
 0x10b   :  { %498 = vmatprep.subr.mxu0 %v349_v34  ;;  %5033 = vmatprep.subr.mxu1 %v349_v34  ;;  %v428_v60 = vcombine.low %v427_v59, %v427_v59  ;;  %v429_v61 = vcombine.high %v427_v59, %v427_v59 }
 0x10c   :  { %499 = vmatpush2.msra.mxu0 %v348_v35  ;;  %5057 = vmatpush2.msra.mxu1 %v348_v35 }
 0x10d   :  { %500 = vmatprep.subr.mxu0 %v347_v36  ;;  %5034 = vmatprep.subr.mxu1 %v347_v36 }
 0x10e   :  { %501 = vmatpush2.msra.mxu0 %v346_v39  ;;  %5058 = vmatpush2.msra.mxu1 %v346_v39 }
 0x10f   :  { %502 = vmatprep.subr.mxu0 %v345_v40  ;;  %5035 = vmatprep.subr.mxu1 %v345_v40 }
 0x110   :  { %503 = vmatpush2.msra.mxu0 %v344_v41  ;;  %5059 = vmatpush2.msra.mxu1 %v344_v41 }
 0x111   :  { %504 = vmatprep.subr.mxu0 %v343_v42  ;;  %5036 = vmatprep.subr.mxu1 %v343_v42 }
 0x112   :  { %505 = vmatpush2.msra.mxu0 %v342_v43  ;;  %5060 = vmatpush2.msra.mxu1 %v342_v43 }
 0x113   :  { %506 = vmatprep.subr.mxu0 %v341_v45  ;;  %4595 = vmatprep.mubr.msk.f32.mxu0 %vm432_vm1, %v399_v44 }
 0x114   :  { %507 = vmatpush2.msra.mxu0 %v340_v46  ;;  %5037 = vmatprep.subr.mxu1 %v341_v45 }
 0x115   :  { %509 = vmatmul.mubr.f32.vlgmr.msra.gmra.mxu0 %v398_v47  ;;  %5061 = vmatpush2.msra.mxu1 %v340_v46 }
 0x116   :  { %4596 = vmatprep.mubr.msk.f32.mxu1 %vm432_vm1, %v417_v48 }
 0x117   :  { %515 = vmatmul.mubr.f32.vlgmr.msra.gmra.mxu1 %v416_v49 }
 0x1d5   :  { %v510_v62 = vpop.f32.mrf.mxu0 }
 0x1d6   :  { %v511_v28 = vadd.f32 %v510_v62, %v428_v60 }
 0x1d7   :  { %v512_v26 = vpop.f32.mrf.mxu0  ;;  %v516_v27 = vpop.f32.mrf.mxu1 }
 0x1d8   :  { %v513_v29 = vadd.f32 %v512_v26, %v429_v61  ;;  %v517_v30 = vadd.f32 %v516_v27, %v428_v60 }
 0x1d9   :  { %v518_v32 = vpop.f32.mrf.mxu1 }
 0x1da   :  { %v525_v33 = vcombine.low %v511_v28, %v513_v29  ;;  %v526_v34 = vcombine.high %v511_v28, %v513_v29  ;;  %v519_v35 = vadd.f32 %v518_v32, %v429_v61 }
 0x1dc   :  { %v533_v36 = vrot.slane %v525_v33, %v6071_v31  ;;  %v540_v37 = vrot.slane %v526_v34, %v6071_v31  ;;  %v543_v38 = vcombine.low %v517_v30, %v519_v35  ;;  %v544_v39 = vcombine.high %v517_v30, %v519_v35 }
 0x1de   :  { %v541_v40 = vcombine.high %v533_v36, %v533_v36  ;;  %v542_v41 = vcombine.high %v540_v37, %v540_v37  ;;  %570 = vst.msk [vmem:[#allocation2] sm:$0x3] %vm569_vm2, %v533_v36  ;;  %572 = vst.msk [vmem:[#allocation2 + $0x4] sm:$0x3] %vm569_vm2, %v540_v37  ;;  %v551_v42 = vrot.slane %v543_v38, %v6071_v31 }
 0x1df   :  { %v558_v43 = vrot.slane %v544_v39, %v6071_v31  ;;  %v598_v44 = vrot.slane %v540_v37, %v6071_v31  ;;  %v584_v45 = vrot.slane %v533_v36, %v6071_v31 }
 0x1e0   :  { %571 = vst.msk [vmem:[#allocation2 + $0x2] sm:$0x3] %vm569_vm2, %v541_v40  ;;  %573 = vst.msk [vmem:[#allocation2 + $0x6] sm:$0x3] %vm569_vm2, %v542_v41  ;;  %v559_v46 = vcombine.high %v551_v42, %v551_v42  ;;  %v605_v48 = vrot.slane %v542_v41, %v6071_v31  ;;  %v612_v49 = vrot.slane %v551_v42, %v6071_v31 }
 0x1e1   :  { %v560_v47 = vcombine.high %v558_v43, %v558_v43  ;;  %574 = vst.msk [vmem:[#allocation2 + $0x8] sm:$0x3] %vm569_vm2, %v551_v42  ;;  %576 = vst.msk [vmem:[#allocation2 + $0xc] sm:$0x3] %vm569_vm2, %v558_v43  ;;  %638 = vrot.lane.b32.xlu1 %v598_v44, %s5789_s15  ;;  %634 = vrot.lane.b32.xlu0 %v584_v45, %s5789_s15  ;;  %v626_v52 = vrot.slane %v558_v43, %v6071_v31 }
 0x1e2   :  { %v591_v53 = vrot.slane %v541_v40, %v6071_v31  ;;  %v732_v54 = vcombine.high %v584_v45, %v584_v45  ;;  %575 = vst.msk [vmem:[#allocation2 + $0xa] sm:$0x3] %vm569_vm2, %v559_v46  ;;  %v619_v55 = vrot.slane %v559_v46, %v6071_v31  ;;  %v734_v58 = vcombine.high %v598_v44, %v598_v44 }
 0x1e3   :  { %577 = vst.msk [vmem:[#allocation2 + $0xe] sm:$0x3] %vm569_vm2, %v560_v47  ;;  %v633_v57 = vrot.slane %v560_v47, %v6071_v31  ;;  %v735_v59 = vcombine.high %v605_v48, %v605_v48  ;;  %v736_v61 = vcombine.high %v612_v49, %v612_v49  ;;  %v738_v62 = vcombine.high %v626_v52, %v626_v52 }
 0x1e4   :  { %749 = vst.msk [vmem:[#allocation3 + $0x10] sm:$0x3] %vm569_vm2, %v732_v54  ;;  %v733_v60 = vcombine.high %v591_v53, %v591_v53  ;;  %751 = vst.msk [vmem:[#allocation3 + $0x14] sm:$0x3] %vm569_vm2, %v734_v58  ;;  %v737_v26 = vcombine.high %v619_v55, %v619_v55 }
 0x1e5   :  { %752 = vst.msk [vmem:[#allocation3 + $0x16] sm:$0x3] %vm569_vm2, %v735_v59  ;;  %v739_v27 = vcombine.high %v633_v57, %v633_v57  ;;  %640 = vrot.lane.b32.xlu1 %v605_v48, %s5789_s15  ;;  %642 = vrot.lane.b32.xlu0 %v612_v49, %s5789_s15  ;;  %753 = vst.msk [vmem:[#allocation3 + $0x18] sm:$0x3] %vm569_vm2, %v736_v61 }
 0x1e6   :  { %750 = vst.msk [vmem:[#allocation3 + $0x12] sm:$0x3] %vm569_vm2, %v733_v60  ;;  %755 = vst.msk [vmem:[#allocation3 + $0x1c] sm:$0x3] %vm569_vm2, %v738_v62 }
 0x1e7   :  { %754 = vst.msk [vmem:[#allocation3 + $0x1a] sm:$0x3] %vm569_vm2, %v737_v26  ;;  %756 = vst.msk [vmem:[#allocation3 + $0x1e] sm:$0x3] %vm569_vm2, %v739_v27 }
 0x1e9   :  { %644 = vrot.lane.b32.xlu1 %v619_v55, %s5789_s15  ;;  %646 = vrot.lane.b32.xlu0 %v626_v52, %s5789_s15 }
 0x1ed   :  { %648 = vrot.lane.b32.xlu1 %v633_v57, %s5789_s15  ;;  %667 = vrot.lane.b32.xlu0 %v584_v45, %s5790_s5 }
 0x1f1   :  { %671 = vrot.lane.b32.xlu0 %v598_v44, %s5790_s5  ;;  %669 = vrot.lane.b32.xlu1 %v591_v53, %s5790_s5 }
 0x1f5   :  { %675 = vrot.lane.b32.xlu0 %v612_v49, %s5790_s5  ;;  %673 = vrot.lane.b32.xlu1 %v605_v48, %s5790_s5 }
 0x1f9   :  { %679 = vrot.lane.b32.xlu0 %v626_v52, %s5790_s5  ;;  %677 = vrot.lane.b32.xlu1 %v619_v55, %s5790_s5 }
 0x1fd   :  { %700 = vrot.lane.b32.xlu0 %v584_v45, %s5791_s28  ;;  %681 = vrot.lane.b32.xlu1 %v633_v57, %s5790_s5 }
 0x201   :  { %704 = vrot.lane.b32.xlu0 %v598_v44, %s5791_s28  ;;  %702 = vrot.lane.b32.xlu1 %v591_v53, %s5791_s28 }
 0x205   :  { %708 = vrot.lane.b32.xlu0 %v612_v49, %s5791_s28  ;;  %706 = vrot.lane.b32.xlu1 %v605_v48, %s5791_s28 }
 0x209   :  { %712 = vrot.lane.b32.xlu0 %v626_v52, %s5791_s28  ;;  %710 = vrot.lane.b32.xlu1 %v619_v55, %s5791_s28 }
 0x20d   :  { %714 = vrot.lane.b32.xlu1 %v633_v57, %s5791_s28  ;;  %636 = vrot.lane.b32.xlu0 %v591_v53, %s5789_s15 }
 0x211   :  { %757 = vrot.lane.b32.xlu0 %v732_v54, %s5789_s15  ;;  %759 = vrot.lane.b32.xlu1 %v733_v60, %s5789_s15 }
 0x215   :  { %761 = vrot.lane.b32.xlu0 %v734_v58, %s5789_s15  ;;  %763 = vrot.lane.b32.xlu1 %v735_v59, %s5789_s15 }
 0x219   :  { %765 = vrot.lane.b32.xlu0 %v736_v61, %s5789_s15  ;;  %767 = vrot.lane.b32.xlu1 %v737_v26, %s5789_s15 }
 0x21d   :  { %769 = vrot.lane.b32.xlu0 %v738_v62, %s5789_s15  ;;  %771 = vrot.lane.b32.xlu1 %v739_v27, %s5789_s15  ;;  %v6187_v27 = vmov 0.0  }
 0x253   :  { %v639_v28 = vpop.permute.xlu1 %638  ;;  %v635_v29 = vpop.permute.xlu0 %634 }
 0x254   :  { %661 = vst.msk [vmem:[#allocation2 + $0x14] sm:$0x3] %vm569_vm2, %v639_v28  ;;  %659 = vst.msk [vmem:[#allocation2 + $0x10] sm:$0x3] %vm569_vm2, %v635_v29  ;;  %v6189_v28 = vmov 0.0  }
 0x257   :  { %v641_v30 = vpop.permute.xlu1 %640  ;;  %v643_v32 = vpop.permute.xlu0 %642 }
 0x258   :  { %662 = vst.msk [vmem:[#allocation2 + $0x16] sm:$0x3] %vm569_vm2, %v641_v30  ;;  %663 = vst.msk [vmem:[#allocation2 + $0x18] sm:$0x3] %vm569_vm2, %v643_v32 }
 0x25b   :  { %v645_v33 = vpop.permute.xlu1 %644  ;;  %v647_v34 = vpop.permute.xlu0 %646 }
 0x25c   :  { %664 = vst.msk [vmem:[#allocation2 + $0x1a] sm:$0x3] %vm569_vm2, %v645_v33  ;;  %665 = vst.msk [vmem:[#allocation2 + $0x1c] sm:$0x3] %vm569_vm2, %v647_v34 }
 0x25f   :  { %v649_v35 = vpop.permute.xlu1 %648  ;;  %v668_v36 = vpop.permute.xlu0 %667 }
 0x260   :  { %666 = vst.msk [vmem:[#allocation2 + $0x1e] sm:$0x3] %vm569_vm2, %v649_v35  ;;  %692 = vst.msk [vmem:[#allocation2 + $0x20] sm:$0x3] %vm569_vm2, %v668_v36 }
 0x263   :  { %v672_v37 = vpop.permute.xlu0 %671  ;;  %v670_v38 = vpop.permute.xlu1 %669 }
 0x264   :  { %694 = vst.msk [vmem:[#allocation2 + $0x24] sm:$0x3] %vm569_vm2, %v672_v37  ;;  %693 = vst.msk [vmem:[#allocation2 + $0x22] sm:$0x3] %vm569_vm2, %v670_v38 }
 0x267   :  { %v676_v39 = vpop.permute.xlu0 %675  ;;  %v674_v40 = vpop.permute.xlu1 %673 }
 0x268   :  { %696 = vst.msk [vmem:[#allocation2 + $0x28] sm:$0x3] %vm569_vm2, %v676_v39  ;;  %695 = vst.msk [vmem:[#allocation2 + $0x26] sm:$0x3] %vm569_vm2, %v674_v40 }
 0x26b   :  { %v680_v41 = vpop.permute.xlu0 %679  ;;  %v678_v42 = vpop.permute.xlu1 %677 }
 0x26c   :  { %698 = vst.msk [vmem:[#allocation2 + $0x2c] sm:$0x3] %vm569_vm2, %v680_v41  ;;  %697 = vst.msk [vmem:[#allocation2 + $0x2a] sm:$0x3] %vm569_vm2, %v678_v42 }
 0x26f   :  { %v701_v43 = vpop.permute.xlu0 %700  ;;  %v682_v44 = vpop.permute.xlu1 %681 }
 0x270   :  { %724 = vst.msk [vmem:[#allocation3] sm:$0x3] %vm569_vm2, %v701_v43  ;;  %699 = vst.msk [vmem:[#allocation2 + $0x2e] sm:$0x3] %vm569_vm2, %v682_v44 }
 0x273   :  { %v705_v45 = vpop.permute.xlu0 %704  ;;  %v703_v46 = vpop.permute.xlu1 %702 }
 0x274   :  { %726 = vst.msk [vmem:[#allocation3 + $0x4] sm:$0x3] %vm569_vm2, %v705_v45  ;;  %725 = vst.msk [vmem:[#allocation3 + $0x2] sm:$0x3] %vm569_vm2, %v703_v46 }
 0x277   :  { %v709_v47 = vpop.permute.xlu0 %708  ;;  %v707_v48 = vpop.permute.xlu1 %706 }
 0x278   :  { %728 = vst.msk [vmem:[#allocation3 + $0x8] sm:$0x3] %vm569_vm2, %v709_v47  ;;  %727 = vst.msk [vmem:[#allocation3 + $0x6] sm:$0x3] %vm569_vm2, %v707_v48 }
 0x27b   :  { %v713_v49 = vpop.permute.xlu0 %712  ;;  %v711_v52 = vpop.permute.xlu1 %710 }
 0x27c   :  { %730 = vst.msk [vmem:[#allocation3 + $0xc] sm:$0x3] %vm569_vm2, %v713_v49  ;;  %729 = vst.msk [vmem:[#allocation3 + $0xa] sm:$0x3] %vm569_vm2, %v711_v52 }
 0x27f   :  { %v715_v53 = vpop.permute.xlu1 %714  ;;  %v637_v54 = vpop.permute.xlu0 %636 }
 0x280   :  { %731 = vst.msk [vmem:[#allocation3 + $0xe] sm:$0x3] %vm569_vm2, %v715_v53  ;;  %660 = vst.msk [vmem:[#allocation2 + $0x12] sm:$0x3] %vm569_vm2, %v637_v54 }
 0x283   :  { %v758_v55 = vpop.permute.xlu0 %757  ;;  %v760_v57 = vpop.permute.xlu1 %759 }
 0x284   :  { %782 = vst.msk [vmem:[#allocation3 + $0x20] sm:$0x3] %vm569_vm2, %v758_v55  ;;  %783 = vst.msk [vmem:[#allocation3 + $0x22] sm:$0x3] %vm569_vm2, %v760_v57 }
 0x287   :  { %v762_v58 = vpop.permute.xlu0 %761  ;;  %v764_v59 = vpop.permute.xlu1 %763 }
 0x288   :  { %784 = vst.msk [vmem:[#allocation3 + $0x24] sm:$0x3] %vm569_vm2, %v762_v58  ;;  %785 = vst.msk [vmem:[#allocation3 + $0x26] sm:$0x3] %vm569_vm2, %v764_v59 }
 0x28b   :  { %v766_v60 = vpop.permute.xlu0 %765  ;;  %v768_v61 = vpop.permute.xlu1 %767 }
 0x28c   :  { %786 = vst.msk [vmem:[#allocation3 + $0x28] sm:$0x3] %vm569_vm2, %v766_v60  ;;  %787 = vst.msk [vmem:[#allocation3 + $0x2a] sm:$0x3] %vm569_vm2, %v768_v61 }
 0x28f   :  { %v770_v62 = vpop.permute.xlu0 %769  ;;  %v772_v26 = vpop.permute.xlu1 %771 }
 0x290   :  { %788 = vst.msk [vmem:[#allocation3 + $0x2c] sm:$0x3] %vm569_vm2, %v770_v62  ;;  %789 = vst.msk [vmem:[#allocation3 + $0x2e] sm:$0x3] %vm569_vm2, %v772_v26 }
 0x291 LB: > { %v5792_v29 = vmov 0.0   ;;  %vm833_vm3 = vcmask 261120   ;;  %vm5793_vm4 = vmmov 0   ;;  %s4597_s17 = sshll.u32 %s5732_s9, 1  ;;  %s829_s7 = ssub.s32 7, %s5732_s9  ;;  %s5732_s9 = sphi %s6191_s9, %s826_s9   ;;  %v5728_v28 = vphi %v6189_v28, %v1081_v28   ;;  %v5724_v27 = vphi %v6187_v27, %v1334_v27  }
 0x292   : > { %4788 = vmatprep.subr.mxu0 %v5792_v29  ;;  %4799 = vmatprep.subr.mxu1 %v5792_v29  ;;  %s6247_s6 = scalar_lea.vmem [#allocation2], %s4597_s17  ;;  %s6251_s12 = sshll.u32 %s829_s7, 1 }
 0x293   : > { %4789 = vmatpush3.msra.mxu0 %v6021_v3  ;;  %4800 = vmatpush3.msra.mxu1 %v6029_v7  ;;  %v832_v30 = vld [vmem:[%s6247_s6] sm:$0x3]  ;;  %v4601_v38 = vld [vmem:[%s6247_s6 + $0x10] sm:$0x3]  ;;  %s1085_s25 = scalar_lea.vmem [#allocation3], %s6251_s12  ;;  %s1167_s13 = ssub.s32 15, %s5732_s9 }
 0x294   : > { %4790 = vmatprep.subr.mxu0 %v5792_v29  ;;  %4801 = vmatprep.subr.mxu1 %v5792_v29  ;;  %s4611_s0 = sshll.u32 %s1167_s13, 1  ;;  %s1248_s4 = ssub.s32 23, %s5732_s9 }
 0x295   : > { %4791 = vmatpush3.msra.mxu0 %v6019_v2  ;;  %4802 = vmatpush3.msra.mxu1 %v6027_v6  ;;  %s1169_s8 = scalar_lea.vmem [#allocation3], %s4611_s0  ;;  %s4614_s14 = sshll.u32 %s1248_s4, 1 }
 0x296   : > { %4792 = vmatprep.subr.mxu0 %v5792_v29  ;;  %4803 = vmatprep.subr.mxu1 %v5792_v29  ;;  %s1250_s30 = scalar_lea.vmem [#allocation3], %s4614_s14  ;;  %s1082_s16 = scalar_lea.vmem [#allocation4], %s4597_s17 }
 0x297   : > { %4793 = vmatpush3.msra.mxu0 %v6017_v1  ;;  %4804 = vmatpush3.msra.mxu1 %v6025_v5  ;;  %v1086_v40 = vld [vmem:[%s1085_s25] sm:$0x3]  ;;  %s1335_s23 = scalar_lea.vmem [#allocation5], %s6251_s12  ;;  %s826_s9 = sadd.s32 1, %s5732_s9  }
 0x298   : > { %4794 = vmatprep.subr.mxu0 %v5792_v29  ;;  %4805 = vmatprep.subr.mxu1 %v5792_v29  ;;  %v1170_v48 = vld [vmem:[%s1169_s8] sm:$0x3]  ;;  %p823_p1 = scmp.ge.s32.totalorder %s826_s9, 8  }
 0x299   : > { %4795 = vmatpush3.msra.mxu0 %v6015_v0  ;;  %4796 = vmatprep.mubr.msk.f32.mxu0 %vm5793_vm4, %v5792_v29  ;;  %v1356_v3 = vld [vmem:[#allocation23 + $0x18] sm:$0xff] (%p823_p1)  ;;  %vm1854_vm5 = vcmask (%p823_p1), 107520   ;;  %vm1990_vm6 = vcmask (%p823_p1), 1045504   ;;  %vm1985_vm7 = vcmask (%p823_p1), 113664   ;;  %vm2918_vm8 = vcmask (%p823_p1), 523264  }
 0x29a   : > { %4806 = vmatpush3.msra.mxu1 %v6023_v4  ;;  %4807 = vmatprep.mubr.msk.f32.mxu1 %vm5793_vm4, %v5792_v29 }
 0x29b   : > { %4797 = vmatmul.mubr.msk.f32.vlgmr.msra.gmra.mxu0 %vm833_vm3, %v5728_v28  ;;  %4808 = vmatmul.mubr.msk.f32.vlgmr.msra.gmra.mxu1 %vm833_vm3, %v5728_v28 }
 0x29c   : > { %4821 = vmatprep.subr.mxu1 %v5792_v29  ;;  %4810 = vmatprep.subr.mxu0 %v5792_v29 }
 0x29d   : > { %4822 = vmatpush3.msra.mxu1 %v6045_v15  ;;  %4811 = vmatpush3.msra.mxu0 %v6037_v11 }
 0x29e   : > { %4823 = vmatprep.subr.mxu1 %v5792_v29  ;;  %4829 = vmatprep.mubr.msk.f32.mxu1 %vm5793_vm4, %v5792_v29 }
 0x29f   : > { %4824 = vmatpush3.msra.mxu1 %v6043_v14  ;;  %4812 = vmatprep.subr.mxu0 %v5792_v29 }
 0x2a0   : > { %4825 = vmatprep.subr.mxu1 %v5792_v29  ;;  %4813 = vmatpush3.msra.mxu0 %v6035_v10 }
 0x2a1   : > { %4826 = vmatpush3.msra.mxu1 %v6041_v13  ;;  %4814 = vmatprep.subr.mxu0 %v5792_v29 }
 0x2a2   : > { %4827 = vmatprep.subr.mxu1 %v5792_v29  ;;  %4815 = vmatpush3.msra.mxu0 %v6033_v9 }
 0x2a3   : > { %4828 = vmatpush3.msra.mxu1 %v6039_v12  ;;  %4816 = vmatprep.subr.mxu0 %v5792_v29 }
 0x2a4   : > { %4830 = vmatmul.mubr.msk.f32.vlgmr.msra.gmra.mxu1 %vm833_vm3, %v5724_v27  ;;  %4817 = vmatpush3.msra.mxu0 %v6031_v8 }
 0x2a5   : > { %4818 = vmatprep.mubr.msk.f32.mxu0 %vm5793_vm4, %v5792_v29  ;;  %4832 = vmatprep.subr.mxu0 %v5792_v29 }
 0x2a6   : > { %4819 = vmatmul.mubr.msk.f32.vlgmr.msra.gmra.mxu0 %vm833_vm3, %v5728_v28  ;;  %4843 = vmatprep.subr.mxu1 %v5792_v29 }
 0x2a7   : > { %4833 = vmatpush3.msra.mxu0 %v6053_v19  ;;  %4840 = vmatprep.mubr.msk.f32.mxu0 %vm5793_vm4, %v5792_v29 }
 0x2a8   : > { %4834 = vmatprep.subr.mxu0 %v5792_v29  ;;  %4844 = vmatpush3.msra.mxu1 %v6061_v23 }
 0x2a9   : > { %4835 = vmatpush3.msra.mxu0 %v6051_v18  ;;  %4845 = vmatprep.subr.mxu1 %v5792_v29 }
 0x2aa   : > { %4836 = vmatprep.subr.mxu0 %v5792_v29  ;;  %4846 = vmatpush3.msra.mxu1 %v6059_v22 }
 0x2ab   : > { %4837 = vmatpush3.msra.mxu0 %v6049_v17  ;;  %4847 = vmatprep.subr.mxu1 %v5792_v29 }
 0x2ac   : > { %4838 = vmatprep.subr.mxu0 %v5792_v29  ;;  %4848 = vmatpush3.msra.mxu1 %v6057_v21  ;;  %v1355_v21 = vld [vmem:[#allocation23 + $0x10] sm:$0xff] (%p823_p1) }
 0x2ad   : > { %4839 = vmatpush3.msra.mxu0 %v6047_v16  ;;  %4849 = vmatprep.subr.mxu1 %v5792_v29 }
 0x2ae   : > { %4841 = vmatmul.mubr.msk.f32.vlgmr.msra.gmra.mxu0 %vm833_vm3, %v5724_v27  ;;  %4850 = vmatpush3.msra.mxu1 %v6055_v20 }
 0x2af   : > { %4851 = vmatprep.mubr.msk.f32.mxu1 %vm5793_vm4, %v5792_v29 }
 0x2b0   : > { %4852 = vmatmul.mubr.msk.f32.vlgmr.msra.gmra.mxu1 %vm833_vm3, %v5724_v27 }
 0x35b   : > { %v903_v32 = vpop.f32.mrf.mxu0  ;;  %v984_v33 = vpop.f32.mrf.mxu1 }
 0x35c   : > { %v907_v34 = vadd.f32 %v903_v32, %v832_v30  ;;  %v988_v39 = vadd.f32 %v4601_v38, %v984_v33  ;;  %v4605_v32 = vld [vmem:[%s6247_s6 + $0x20] sm:$0x3] }
 0x35d   : > { %v4809_v35 = vpop.f32.mrf.mxu1  ;;  %v4798_v36 = vpop.f32.mrf.mxu0 }
 0x35e   : > { %v4599_v37 = vmul.f32 -1.442695, %v907_v34  ;;  %v4603_v43 = vmul.f32 -1.442695, %v988_v39  ;;  %v1251_v39 = vld [vmem:[%s1250_s30] sm:$0x3] }
 0x360   : > { %5188 = vpow2.f32 %v4599_v37 }
 0x364   : > { %v1156_v41 = vpop.f32.mrf.mxu1 }
 0x365   : > { %v1160_v42 = vadd.f32 %v1156_v41, %v1086_v40 }
 0x366   : > { %v4831_v44 = vpop.f32.mrf.mxu1  ;;  %v1071_v45 = vpop.f32.mrf.mxu0 }
 0x367   : > { %v4610_v46 = vmul.f32 -1.442695, %v1160_v42  ;;  %v1072_v29 = vadd.f32 %v6063_v24, %v1071_v45 }
 0x368   : > { %v4820_v47 = vpop.f32.mrf.mxu0 }
 0x369   : > { %5190 = vpow2.f32 %v4610_v46 }
 0x36a   : > { %5192 = vpow2.f32 %v4603_v43 }
 0x36d   : > { %v5189_v49 = vpop.eup %5188 }
 0x36e   : > { %v911_v52 = vadd.f32 1.0, %v5189_v49  ;;  %v1237_v53 = vpop.f32.mrf.mxu0 }
 0x36f   : > { %v1241_v54 = vadd.f32 %v1237_v53, %v1170_v48 }
 0x370   : > { %5194 = vrcp.f32 %v911_v52  ;;  %v4842_v55 = vpop.f32.mrf.mxu0  ;;  %v1324_v57 = vpop.f32.mrf.mxu1 }
 0x371   : > { %v4613_v58 = vmul.f32 -1.442695, %v1241_v54  ;;  %v1325_v37 = vadd.f32 %v6065_v25, %v1324_v57  ;;  %v1360_v54 = vld [vmem:[#allocation24 + $0x18] sm:$0xff] (%p823_p1)  ;;  %v1359_v55 = vld [vmem:[#allocation24 + $0x10] sm:$0xff] (%p823_p1)  ;;  %v1358_v57 = vld [vmem:[#allocation24 + $0x8] sm:$0xff] (%p823_p1) }
 0x372   : > { %v4853_v59 = vpop.f32.mrf.mxu1  ;;  %4854 = vmatprep.subr.mxu1 (%p823_p1), %v1360_v54  ;;  %v1354_v25 = vld [vmem:[#allocation23 + $0x8] sm:$0xff] (%p823_p1) }
 0x373   : > { %5196 = vpow2.f32 %v4613_v58  ;;  %4855 = vmatpush3.msra.mxu1 (%p823_p1), %v1360_v54 }
 0x374   :  { %4856 = vmatprep.subr.mxu1 (%p823_p1), %v1359_v55 }
 0x375   :  { %4857 = vmatpush3.msra.mxu1 (%p823_p1), %v1359_v55 }
 0x376   : > { %v5191_v60 = vpop.eup %5190  ;;  %4858 = vmatprep.subr.mxu1 (%p823_p1), %v1358_v57 }
 0x377   : > { %v5193_v61 = vpop.eup %5192  ;;  %v1164_v62 = vadd.f32 1.0, %v5191_v60  ;;  %4859 = vmatpush3.msra.mxu1 (%p823_p1), %v1358_v57 }
 0x378   : > { %v992_v26 = vadd.f32 1.0, %v5193_v61 }
 0x379   : > { %5198 = vrcp.f32 %v1164_v62 }
 0x37a   : > { %5200 = vrcp.f32 %v992_v26 }
 0x37d   : > { %v5195_v30 = vpop.eup %5194 }
 0x37e   : > { %v1075_v33 = vmul.f32 %v5195_v30, %v1072_v29 }
 0x380   : > { %v5197_v34 = vpop.eup %5196  ;;  %v1076_v35 = vadd.f32 %v4605_v32, %v1075_v33 }
 0x381   : > { %v1245_v36 = vadd.f32 1.0, %v5197_v34 }
 0x382   : > { %5202 = vtanh.f32 %v1076_v35  ;;  %v1353_v35 = vld [vmem:[#allocation23] sm:$0xff] (%p823_p1) }
 0x383   : > { %5204 = vrcp.f32 %v1245_v36 }
 0x386   : > { %v5199_v38 = vpop.eup %5198 }
 0x387   : > { %v1328_v40 = vmul.f32 %v5199_v38, %v1325_v37  ;;  %v5201_v42 = vpop.eup %5200  ;;  %v6298_v37 = vld [vmem:[#allocation20 + $0x8] sm:$0x3f] (%p823_p1)  ;;  %v6300_v38 = vld [vmem:[#allocation20] sm:$0xff] (%p823_p1) }
 0x388   : > { %v1078_v43 = vsub.f32 1.0, %v5201_v42  ;;  %v1080_v45 = vmul.f32 %v5728_v28, %v5201_v42  ;;  %4876 = vmatprep.subr.msk.mxu0 (%p823_p1), %vm833_vm3, %v6298_v37 }
 0x389   : > { %v1329_v41 = vadd.f32 %v1328_v40, %v1251_v39  ;;  %4877 = vmatpush3.xpose.msk.msra.mxu0 (%p823_p1), %vm833_vm3, %v6298_v37 }
 0x38a   :  { %4878 = vmatprep.subr.msk.mxu0 (%p823_p1), %vm833_vm3, %v6300_v38 }
 0x38b   : > { %5206 = vtanh.f32 %v1329_v41 }
 0x38d   :  { %4879 = vmatpush3.xpose.msk.msra.mxu0 (%p823_p1), %vm833_vm3, %v6300_v38 }
 0x38f   : > { %v5203_v44 = vpop.eup %5202 }
 0x390   : > { %v1079_v46 = vmul.f32 %v5203_v44, %v1078_v43  ;;  %v5205_v47 = vpop.eup %5204 }
 0x391   : > { %v1331_v48 = vsub.f32 1.0, %v5205_v47  ;;  %v1333_v52 = vmul.f32 %v5724_v27, %v5205_v47 }
 0x392   : > { %v1081_v28 = vadd.f32 %v1080_v45, %v1079_v46  }
 0x394   : > { %1083 = vst.msk [vmem:[%s1082_s16] sm:$0x3] %vm569_vm2, %v1081_v28  ;;  %v1357_v28 = vld [vmem:[#allocation24] sm:$0xff] (%p823_p1) }
 0x395   :  { %4860 = vmatprep.subr.mxu1 (%p823_p1), %v1357_v28 }
 0x396   :  { %4861 = vmatpush3.msra.mxu1 (%p823_p1), %v1357_v28 }
 0x397   :  { %4865 = vmatprep.subr.mxu1 (%p823_p1), %v1356_v3 }
 0x398   : > { %v5207_v49 = vpop.eup %5206 }
 0x399   : > { %v1332_v53 = vmul.f32 %v5207_v49, %v1331_v48  ;;  %825 = sbr.rel (!%p823_p1) target bundleno = 657 (0x291), region = 249 }
 0x39b   : > { %v1334_v27 = vadd.f32 %v1333_v52, %v1332_v53   ;;  %v1337_v4 = vld [vmem:[#allocation4] sm:$0x3] (%p823_p1)  ;;  %v1338_v5 = vld [vmem:[#allocation4 + $0x2] sm:$0x3] (%p823_p1)  ;;  %v1339_v8 = vld [vmem:[#allocation4 + $0x4] sm:$0x3] (%p823_p1) }
 0x39c   :  { %v1340_v9 = vld [vmem:[#allocation4 + $0x6] sm:$0x3] (%p823_p1)  ;;  %v1491_v10 = vcombine.low (%p823_p1), %v1337_v4, %v1338_v5  ;;  %v1341_v11 = vld [vmem:[#allocation4 + $0x8] sm:$0x3] (%p823_p1)  ;;  %v1342_v14 = vld [vmem:[#allocation4 + $0xa] sm:$0x3] (%p823_p1) }
 0x39d   : > { %1336 = vst.msk [vmem:[%s1335_s23] sm:$0x3] %vm569_vm2, %v1334_v27  ;;  %v1492_v13 = vcombine.low (%p823_p1), %v1339_v8, %v1340_v9  ;;  %v1343_v15 = vld [vmem:[#allocation4 + $0xc] sm:$0x3] (%p823_p1)  ;;  %v1344_v16 = vld [vmem:[#allocation4 + $0xe] sm:$0x3] (%p823_p1)  ;;  %v1508_v19 = vcombine.low (%p823_p1), %v1341_v11, %v1342_v14 }
 0x39e   :  { %v1499_v18 = vrot.slane %v1491_v10, %v6071_v31  ;;  %v1509_v20 = vcombine.low %v1343_v15, %v1344_v16  ;;  %v4621_v52 = vld [vmem:[#allocation26] ss:$0 sm:$0xff] }
 0x39f   :  { %v1506_v22 = vrot.slane %v1492_v13, %v6071_v31  ;;  %v1516_v23 = vrot.slane %v1508_v19, %v6071_v31 }
 0x3a0   :  { %v1523_v24 = vrot.slane %v1509_v20, %v6071_v31 }
 0x3a1   :  { %v6290_v27 = vcombine.low %v1499_v18, %v1506_v22 }
 0x3a2   :  { %v6294_v36 = vcombine.low %v1516_v23, %v1523_v24 }
 0x3a4   :  { %v1345_v58 = vld [vmem:[#allocation5] sm:$0x3]  ;;  %v1346_v59 = vld [vmem:[#allocation5 + $0x2] sm:$0x3]  ;;  %v1347_v60 = vld [vmem:[#allocation5 + $0x4] sm:$0x3] }
 0x3a5   :  { %v1348_v61 = vld [vmem:[#allocation5 + $0x6] sm:$0x3]  ;;  %v1369_v62 = vcombine.low %v1345_v58, %v1346_v59  ;;  %v1349_v26 = vld [vmem:[#allocation5 + $0x8] sm:$0x3]  ;;  %v1350_v30 = vld [vmem:[#allocation5 + $0xa] sm:$0x3] }
 0x3a6   :  { %v1370_v29 = vcombine.low %v1347_v60, %v1348_v61  ;;  %v1351_v32 = vld [vmem:[#allocation5 + $0xc] sm:$0x3]  ;;  %v1352_v33 = vld [vmem:[#allocation5 + $0xe] sm:$0x3]  ;;  %v1386_v0 = vcombine.low %v1349_v26, %v1350_v30 }
 0x3a7   :  { %v1377_v34 = vrot.slane %v1369_v62, %v6071_v31  ;;  %v1387_v1 = vcombine.low %v1351_v32, %v1352_v33 }
 0x3a8   :  { %v1384_v2 = vrot.slane %v1370_v29, %v6071_v31  ;;  %v1394_v6 = vrot.slane %v1386_v0, %v6071_v31 }
 0x3a9   :  { %v1401_v7 = vrot.slane %v1387_v1, %v6071_v31 }
 0x3aa   :  { %v6278_v12 = vcombine.low %v1377_v34, %v1384_v2 }
 0x3ab   :  { %v6280_v17 = vcombine.low %v1394_v6, %v1401_v7 }
 0x3ac   :  { %4862 = vmatprep.mubr.msk.f32.mxu1 %vm833_vm3, %v6278_v12 }
 0x3ad   :  { %4863 = vmatmul.mubr.msk.f32.vlgmr.msra.gmra.mxu1 %vm833_vm3, %v6280_v17 }
 0x3ae   :  { %4866 = vmatpush3.msra.mxu1 %v1356_v3  ;;  %4873 = vmatprep.mubr.msk.f32.mxu1 %vm833_vm3, %v6290_v27 }
 0x3af   :  { %4867 = vmatprep.subr.mxu1 %v1355_v21 }
 0x3b0   :  { %4868 = vmatpush3.msra.mxu1 %v1355_v21 }
 0x3b1   :  { %4869 = vmatprep.subr.mxu1 %v1354_v25 }
 0x3b2   :  { %4870 = vmatpush3.msra.mxu1 %v1354_v25 }
 0x3b3   :  { %4871 = vmatprep.subr.mxu1 %v1353_v35 }
 0x3b4   :  { %4872 = vmatpush3.msra.mxu1 %v1353_v35 }
 0x3b5   :  { %4874 = vmatmul.mubr.msk.f32.vlgmr.msra.gmra.mxu1 %vm833_vm3, %v6294_v36 }
 0x46d   :  { %v4864_v39 = vpop.f32.mrf.mxu1 }
 0x46f   :  { %v1474_v40 = vpop.f32.mrf.mxu1 }
 0x475   :  { %v4875_v41 = vpop.f32.mrf.mxu1 }
 0x476   :  { %v1601_v42 = vadd.f32 %v4875_v41, %v4864_v39 }
 0x477   :  { %v1595_v43 = vpop.f32.mrf.mxu1 }
 0x478   :  { %v1623_v44 = vcombine.high %v1601_v42, %v1601_v42  ;;  %v1630_v45 = vrot.slane %v1601_v42, %v6071_v31  ;;  %v1596_v46 = vadd.f32 %v1595_v43, %v1474_v40 }
 0x47a   :  { %v1637_v47 = vrot.slane %v1623_v44, %v6071_v31  ;;  %v1638_v48 = vcombine.high %v1630_v45, %v1630_v45  ;;  %v1606_v49 = vcombine.high %v1596_v46, %v1596_v46  ;;  %v1613_v53 = vrot.slane %v1596_v46, %v6071_v31 }
 0x47b   :  { %v1659_v61 = vadd.f32 %v4621_v52, %v1630_v45 }
 0x47c   :  { %v1639_v54 = vcombine.high %v1637_v47, %v1637_v47  ;;  %v1660_v55 = vadd.f32 %v4621_v52, %v1638_v48  ;;  %v1661_v57 = vadd.f32 %v4621_v52, %v1637_v47  ;;  %v1620_v58 = vrot.slane %v1606_v49, %v6071_v31 }
 0x47d   :  { %v1621_v59 = vcombine.high %v1613_v53, %v1613_v53  ;;  %v1655_v60 = vadd.f32 %v4621_v52, %v1613_v53  ;;  %v1679_v2 = vmul.f32 0.17677669, %v1659_v61 }
 0x47e   :  { %v1662_v62 = vadd.f32 %v4621_v52, %v1639_v54  ;;  %v1622_v26 = vcombine.high %v1620_v58, %v1620_v58  ;;  %v1657_v29 = vadd.f32 %v4621_v52, %v1620_v58  ;;  %v1680_v32 = vmul.f32 0.17677669, %v1660_v55 }
 0x47f   :  { %v1656_v30 = vadd.f32 %v4621_v52, %v1621_v59  ;;  %v1681_v33 = vmul.f32 0.17677669, %v1661_v57  ;;  %v1675_v34 = vmul.f32 0.17677669, %v1655_v60 }
 0x480   :  { %v1682_v28 = vmul.f32 0.17677669, %v1662_v62  ;;  %v1658_v0 = vadd.f32 %v4621_v52, %v1622_v26  ;;  %v1677_v4 = vmul.f32 0.17677669, %v1657_v29  ;;  %v1708_v7 = vcombine.low %v1679_v2, %v1680_v32 }
 0x481   :  { %v1676_v1 = vmul.f32 0.17677669, %v1656_v30 }
 0x482   :  { %v1709_v3 = vcombine.low %v1681_v33, %v1682_v28  ;;  %v1678_v5 = vmul.f32 0.17677669, %v1658_v0  ;;  %v1716_v13 = vrot.slane %v1708_v7, %v6071_v31 }
 0x483   :  { %v1691_v6 = vcombine.low %v1675_v34, %v1676_v1 }
 0x484   :  { %v1692_v8 = vcombine.low %v1677_v4, %v1678_v5  ;;  %v1723_v9 = vrot.slane %v1709_v3, %v6071_v31 }
 0x485   :  { %v1699_v10 = vrot.slane %v1691_v6, %v6071_v31 }
 0x486   :  { %v1706_v11 = vrot.slane %v1692_v8, %v6071_v31  ;;  %v6320_v15 = vcombine.low %v1716_v13, %v1723_v9 }
 0x488   :  { %v6318_v14 = vcombine.low %v1699_v10, %v1706_v11 }
 0x48a   :  { %4880 = vmatprep.mubr.msk.f32.mxu0 %vm833_vm3, %v6318_v14 }
 0x48b   :  { %4881 = vmatmul.mubr.msk.f32.vlgmr.msra.gmra.mxu0 %vm833_vm3, %v6320_v15 }
 0x54b   :  { %v4882_v16 = vpop.f32.mrf.mxu0 }
 0x54c   :  { %v1836_v18 = vrot.slane %v4882_v16, %v6071_v31  ;;  %v1829_v24 = vcombine.high %v4882_v16, %v4882_v16 }
 0x54d   :  { %v1801_v19 = vpop.f32.mrf.mxu0 }
 0x54e   :  { %v1812_v20 = vcombine.high %v1801_v19, %v1801_v19  ;;  %v1819_v21 = vrot.slane %v1801_v19, %v6071_v31  ;;  %v1867_v22 = vsel %vm1854_vm5, %v1836_v18, -inf  ;;  %v1844_v23 = vcombine.high %v1836_v18, %v1836_v18 }
 0x54f   :  { %1868 = vmax.xlane.f32.xlu0 %v1867_v22  ;;  %v1843_v41 = vrot.slane %v1829_v24, %v6071_v31 }
 0x550   :  { %v1826_v25 = vrot.slane %v1812_v20, %v6071_v31  ;;  %v1870_v35 = vsel %vm1854_vm5, %v1844_v23, -inf  ;;  %v1855_v39 = vsel %vm1854_vm5, %v1819_v21, -inf  ;;  %v1827_v40 = vcombine.high %v1819_v21, %v1819_v21 }
 0x551   :  { %1871 = vmax.xlane.f32.xlu1 %v1870_v35  ;;  %v1845_v46 = vcombine.high %v1843_v41, %v1843_v41  ;;  %v1873_v47 = vsel %vm1854_vm5, %v1843_v41, -inf  ;;  %v6355_v35 = vld [vmem:[#allocation21 + $0x8] sm:$0x3f] }
 0x552   :  { %v1861_v42 = vsel %vm1854_vm5, %v1826_v25, -inf  ;;  %v1828_v43 = vcombine.high %v1826_v25, %v1826_v25  ;;  %v1858_v44 = vsel %vm1854_vm5, %v1827_v40, -inf  ;;  %4883 = vmatprep.subr.msk.mxu1 %vm1990_vm6, %v6355_v35 }
 0x553   :  { %1856 = vmax.xlane.f32.xlu0 %v1855_v39  ;;  %v1876_v48 = vsel %vm1854_vm5, %v1845_v46, -inf  ;;  %v6357_v39 = vld [vmem:[#allocation21] sm:$0xff]  ;;  %4884 = vmatpush3.msk.msra.mxu1 %vm1990_vm6, %v6355_v35 }
 0x554   :  { %v1864_v45 = vsel %vm1854_vm5, %v1828_v43, -inf  ;;  %4885 = vmatprep.subr.mxu1 %v6357_v39 }
 0x555   :  { %1862 = vmax.xlane.f32.xlu1 %v1861_v42  ;;  %4886 = vmatpush3.msra.mxu1 %v6357_v39 }
 0x557   :  { %1859 = vmax.xlane.f32.xlu0 %v1858_v44 }
 0x559   :  { %1865 = vmax.xlane.f32.xlu1 %v1864_v45 }
 0x55b   :  { %1874 = vmax.xlane.f32.xlu0 %v1873_v47 }
 0x55d   :  { %1877 = vmax.xlane.f32.xlu1 %v1876_v48 }
 0x5d8   :  { %v1869_v49 = vpop.xlane.xlu0 %1868 }
 0x5d9   :  { %v1883_v52 = vsub.f32 %v1836_v18, %v1869_v49 }
 0x5da   :  { %v1872_v54 = vpop.xlane.xlu1 %1871 }
 0x5db   :  { %v1895_v53 = vmul.f32 1.442695, %v1883_v52  ;;  %v1884_v55 = vsub.f32 %v1844_v23, %v1872_v54 }
 0x5dc   :  { %v1857_v57 = vpop.xlane.xlu0 %1856 }
 0x5dd   :  { %5208 = vpow2.f32 %v1895_v53  ;;  %v1879_v58 = vsub.f32 %v1819_v21, %v1857_v57  ;;  %v1897_v59 = vmul.f32 1.442695, %v1884_v55 }
 0x5de   :  { %v1863_v61 = vpop.xlane.xlu1 %1862 }
 0x5df   :  { %v1887_v60 = vmul.f32 1.442695, %v1879_v58  ;;  %5210 = vpow2.f32 %v1897_v59  ;;  %v1881_v62 = vsub.f32 %v1826_v25, %v1863_v61 }
 0x5e0   :  { %v1860_v26 = vpop.xlane.xlu0 %1859 }
 0x5e1   :  { %5212 = vpow2.f32 %v1887_v60  ;;  %v1880_v29 = vsub.f32 %v1827_v40, %v1860_v26  ;;  %v1891_v30 = vmul.f32 1.442695, %v1881_v62 }
 0x5e2   :  { %v1866_v33 = vpop.xlane.xlu1 %1865 }
 0x5e3   :  { %v1889_v32 = vmul.f32 1.442695, %v1880_v29  ;;  %5214 = vpow2.f32 %v1891_v30  ;;  %v1882_v0 = vsub.f32 %v1828_v43, %v1866_v33 }
 0x5e4   :  { %v1875_v28 = vpop.xlane.xlu0 %1874 }
 0x5e5   :  { %5216 = vpow2.f32 %v1889_v32  ;;  %v1885_v34 = vsub.f32 %v1843_v41, %v1875_v28  ;;  %v1893_v5 = vmul.f32 1.442695, %v1882_v0 }
 0x5e6   :  { %v1878_v2 = vpop.xlane.xlu1 %1877 }
 0x5e7   :  { %v1899_v1 = vmul.f32 1.442695, %v1885_v34  ;;  %v1886_v3 = vsub.f32 %v1845_v46, %v1878_v2 }
 0x5e9   :  { %5218 = vpow2.f32 %v1899_v1  ;;  %v1901_v6 = vmul.f32 1.442695, %v1886_v3 }
 0x5ea   :  { %v6338_v4 = vpop.eup %5208 }
 0x5eb   :  { %v1915_v7 = vsel %vm1854_vm5, %v6338_v4, 0.0  ;;  %5220 = vpow2.f32 %v1901_v6  ;;  %v1670_v6 = vld [vmem:[%s6845_s10 + $0x18] sm:$0xff] }
 0x5ec   :  { %1916 = vadd.xlane.f32.xlu0 %v1915_v7  ;;  %v5211_v8 = vpop.eup %5210  ;;  %5222 = vpow2.f32 %v1893_v5 }
 0x5ed   :  { %v1918_v10 = vsel %vm1854_vm5, %v5211_v8, 0.0 }
 0x5ee   :  { %v5213_v9 = vpop.eup %5212  ;;  %1919 = vadd.xlane.f32.xlu1 %v1918_v10  ;;  %v1667_v10 = vld [vmem:[%s6845_s10] sm:$0xff] }
 0x5ef   :  { %v1903_v11 = vsel %vm1854_vm5, %v5213_v9, 0.0 }
 0x5f0   :  { %1904 = vadd.xlane.f32.xlu0 %v1903_v11  ;;  %v5215_v13 = vpop.eup %5214 }
 0x5f1   :  { %v1909_v18 = vsel %vm1854_vm5, %v5215_v13, 0.0 }
 0x5f2   :  { %v5217_v16 = vpop.eup %5216 }
 0x5f3   :  { %v1906_v19 = vsel %vm1854_vm5, %v5217_v16, 0.0 }
 0x5f4   :  { %1910 = vadd.xlane.f32.xlu0 %v1909_v18  ;;  %1907 = vadd.xlane.f32.xlu1 %v1906_v19 }
 0x5f6   :  { %v5219_v20 = vpop.eup %5218 }
 0x5f7   :  { %v1921_v21 = vsel %vm1854_vm5, %v5219_v20, 0.0 }
 0x5f8   :  { %1922 = vadd.xlane.f32.xlu0 %v1921_v21  ;;  %v5221_v22 = vpop.eup %5220 }
 0x5f9   :  { %v1924_v23 = vsel %vm1854_vm5, %v5221_v22, 0.0  ;;  %v5223_v24 = vpop.eup %5222 }
 0x5fa   :  { %1925 = vadd.xlane.f32.xlu1 %v1924_v23  ;;  %v1912_v25 = vsel %vm1854_vm5, %v5223_v24, 0.0 }
 0x5fe   :  { %1913 = vadd.xlane.f32.xlu1 %v1912_v25 }
 0x60e   :  { %2075 = vrot.lane.b32.xlu0 %v6298_v37, %s5789_s15 }
 0x60f   :  { %2073 = vrot.lane.b32.xlu1 %v6300_v38, %s5789_s15 }
 0x613   :  { %2069 = vrot.lane.b32.xlu1 %v6318_v14, %s5789_s15 }
 0x617   :  { %2071 = vrot.lane.b32.xlu1 %v6320_v15, %s5789_s15 }
 0x675   :  { %v1917_v37 = vpop.xlane.xlu0 %1916 }
 0x677   :  { %v1920_v14 = vpop.xlane.xlu1 %1919 }
 0x678   :  { %5224 = vrcp.f32 %v1920_v14 }
 0x679   :  { %v1905_v38 = vpop.xlane.xlu0 %1904 }
 0x67a   :  { %5226 = vrcp.f32 %v1905_v38 }
 0x67d   :  { %v1911_v40 = vpop.xlane.xlu0 %1910  ;;  %v1908_v41 = vpop.xlane.xlu1 %1907 }
 0x67e   :  { %5228 = vrcp.f32 %v1908_v41 }
 0x681   :  { %v1923_v42 = vpop.xlane.xlu0 %1922 }
 0x682   :  { %5230 = vrcp.f32 %v1923_v42 }
 0x683   :  { %v1926_v43 = vpop.xlane.xlu1 %1925 }
 0x684   :  { %5232 = vrcp.f32 %v1926_v43 }
 0x685   :  { %v2076_v44 = vpop.permute.xlu0 %2075  ;;  %5234 = vrcp.f32 %v1917_v37  ;;  %v5225_v45 = vpop.eup %5224 }
 0x686   :  { %4890 = vmatprep.subr.msk.mxu1 %vm833_vm3, %v2076_v44  ;;  %5236 = vrcp.f32 %v1911_v40  ;;  %v1938_v57 = vmul.f32 %v5225_v45, %v5211_v8  ;;  %v1669_v8 = vld [vmem:[%s6845_s10 + $0x10] sm:$0xff] }
 0x687   :  { %v1914_v15 = vpop.xlane.xlu1 %1913  ;;  %v5227_v46 = vpop.eup %5226 }
 0x688   :  { %5238 = vrcp.f32 %v1914_v15  ;;  %v1928_v59 = vmul.f32 %v5227_v46, %v5213_v9  ;;  %v1668_v9 = vld [vmem:[%s6845_s10 + $0x8] sm:$0xff] }
 0x68b   :  { %v5229_v47 = vpop.eup %5228  ;;  %v2074_v28 = vpop.permute.xlu1 %2073 }
 0x68c   :  { %v1930_v54 = vmul.f32 %v5229_v47, %v5217_v16 }
 0x68e   :  { %v1951_v30 = vcombine.low %v1928_v59, %v1930_v54 }
 0x68f   :  { %v5231_v48 = vpop.eup %5230 }
 0x690   :  { %v1940_v58 = vmul.f32 %v5231_v48, %v5219_v20  ;;  %v1959_v0 = vrot.slane %v1951_v30, %v6071_v31 }
 0x691   :  { %v5233_v49 = vpop.eup %5232 }
 0x692   :  { %v5235_v52 = vpop.eup %5234  ;;  %v1942_v53 = vmul.f32 %v5233_v49, %v5221_v22 }
 0x693   :  { %v5237_v55 = vpop.eup %5236  ;;  %v1936_v61 = vmul.f32 %v5235_v52, %v6338_v4  ;;  %v2070_v4 = vpop.permute.xlu1 %2069 }
 0x694   :  { %v1969_v62 = vcombine.low %v1940_v58, %v1942_v53  ;;  %v1932_v26 = vmul.f32 %v5237_v55, %v5215_v13 }
 0x695   :  { %v5239_v60 = vpop.eup %5238  ;;  %v1968_v32 = vcombine.low %v1936_v61, %v1938_v57 }
 0x696   :  { %v1934_v29 = vmul.f32 %v5239_v60, %v5223_v24  ;;  %v1983_v34 = vrot.slane %v1969_v62, %v6071_v31 }
 0x697   :  { %v1976_v2 = vrot.slane %v1968_v32, %v6071_v31  ;;  %v2072_v7 = vpop.permute.xlu1 %2071 }
 0x698   :  { %v1952_v33 = vcombine.low %v1932_v26, %v1934_v29 }
 0x699   :  { %v1984_v5 = vcombine.low %v1976_v2, %v1983_v34 }
 0x69a   :  { %v1966_v1 = vrot.slane %v1952_v33, %v6071_v31 }
 0x69c   :  { %v1967_v3 = vcombine.low %v1959_v0, %v1966_v1 }
 0x69e   :  { %4887 = vmatprep.mubr.msk.f32.mxu1 %vm1985_vm7, %v1967_v3 }
 0x69f   :  { %4888 = vmatmul.mubr.msk.f32.vlgmr.msra.gmra.mxu1 %vm1985_vm7, %v1984_v5 }
 0x6a0   :  { %4891 = vmatpush3.xpose.msk.msra.mxu1 %vm833_vm3, %v2076_v44  ;;  %4894 = vmatprep.mubr.msk.f32.mxu1 %vm833_vm3, %v2070_v4 }
 0x6a1   :  { %4892 = vmatprep.subr.msk.mxu1 %vm833_vm3, %v2074_v28 }
 0x6a4   :  { %4893 = vmatpush3.xpose.msk.msra.mxu1 %vm833_vm3, %v2074_v28 }
 0x6a5   :  { %4915 = vmatprep.subr.mxu1 %v1670_v6 }
 0x6a7   :  { %4895 = vmatmul.mubr.msk.f32.vlgmr.msra.gmra.mxu1 %vm833_vm3, %v2072_v7 }
 0x6a8   :  { %4916 = vmatpush3.msra.mxu1 %v1670_v6 }
 0x6a9   :  { %4917 = vmatprep.subr.mxu1 %v1669_v8 }
 0x6aa   :  { %4918 = vmatpush3.msra.mxu1 %v1669_v8 }
 0x6ab   :  { %4919 = vmatprep.subr.mxu1 %v1668_v9 }
 0x6ac   :  { %4920 = vmatpush3.msra.mxu1 %v1668_v9 }
 0x6ad   :  { %4921 = vmatprep.subr.mxu1 %v1667_v10 }
 0x6ae   :  { %4922 = vmatpush3.msra.mxu1 %v1667_v10 }
 0x75f   :  { %v4889_v11 = vpop.f32.mrf.mxu1 }
 0x761   :  { %v2060_v13 = vpop.f32.mrf.mxu1 }
 0x762   :  { %4923 = vmatprep.mubr.msk.f32.mxu1 %vm833_vm3, %v2060_v13 }
 0x763   :  { %4924 = vmatmul.mubr.msk.f32.vlgmr.msra.gmra.mxu1 %vm833_vm3, %v4889_v11 }
 0x767   :  { %v4896_v16 = vpop.f32.mrf.mxu1 }
 0x768   :  { %v2186_v18 = vrot.slane %v4896_v16, %v6071_v31  ;;  %v2179_v19 = vcombine.high %v4896_v16, %v4896_v16 }
 0x769   :  { %v2151_v20 = vpop.f32.mrf.mxu1 }
 0x76a   :  { %v2162_v21 = vcombine.high %v2151_v20, %v2151_v20  ;;  %v2169_v22 = vrot.slane %v2151_v20, %v6071_v31  ;;  %v2216_v23 = vsel %vm1854_vm5, %v2186_v18, -inf  ;;  %v2194_v24 = vcombine.high %v2186_v18, %v2186_v18 }
 0x76b   :  { %2217 = vmax.xlane.f32.xlu0 %v2216_v23  ;;  %v2193_v25 = vrot.slane %v2179_v19, %v6071_v31 }
 0x76c   :  { %v2219_v37 = vsel %vm1854_vm5, %v2194_v24, -inf  ;;  %v2177_v38 = vcombine.high %v2169_v22, %v2169_v22  ;;  %v2176_v14 = vrot.slane %v2162_v21, %v6071_v31  ;;  %v2204_v40 = vsel %vm1854_vm5, %v2169_v22, -inf }
 0x76d   :  { %2220 = vmax.xlane.f32.xlu1 %v2219_v37  ;;  %v2195_v42 = vcombine.high %v2193_v25, %v2193_v25  ;;  %v2222_v46 = vsel %vm1854_vm5, %v2193_v25, -inf }
 0x76e   :  { %v2207_v41 = vsel %vm1854_vm5, %v2177_v38, -inf  ;;  %v2210_v43 = vsel %vm1854_vm5, %v2176_v14, -inf  ;;  %v2178_v44 = vcombine.high %v2176_v14, %v2176_v14 }
 0x76f   :  { %2205 = vmax.xlane.f32.xlu0 %v2204_v40  ;;  %v2225_v15 = vsel %vm1854_vm5, %v2195_v42, -inf }
 0x770   :  { %v2213_v45 = vsel %vm1854_vm5, %v2178_v44, -inf }
 0x771   :  { %2208 = vmax.xlane.f32.xlu1 %v2207_v41 }
 0x773   :  { %2211 = vmax.xlane.f32.xlu0 %v2210_v43 }
 0x775   :  { %2226 = vmax.xlane.f32.xlu1 %v2225_v15 }
 0x777   :  { %2214 = vmax.xlane.f32.xlu0 %v2213_v45 }
 0x77b   :  { %2223 = vmax.xlane.f32.xlu0 %v2222_v46 }
 0x7f4   :  { %v2218_v47 = vpop.xlane.xlu0 %2217 }
 0x7f5   :  { %v2232_v48 = vsub.f32 %v2186_v18, %v2218_v47 }
 0x7f6   :  { %v2221_v52 = vpop.xlane.xlu1 %2220 }
 0x7f7   :  { %v2244_v49 = vmul.f32 1.442695, %v2232_v48  ;;  %v2233_v53 = vsub.f32 %v2194_v24, %v2221_v52 }
 0x7f8   :  { %v2206_v54 = vpop.xlane.xlu0 %2205 }
 0x7f9   :  { %5240 = vpow2.f32 %v2244_v49  ;;  %v2228_v55 = vsub.f32 %v2169_v22, %v2206_v54  ;;  %v2246_v57 = vmul.f32 1.442695, %v2233_v53 }
 0x7fa   :  { %v2209_v59 = vpop.xlane.xlu1 %2208 }
 0x7fb   :  { %v2236_v58 = vmul.f32 1.442695, %v2228_v55  ;;  %5242 = vpow2.f32 %v2246_v57  ;;  %v2229_v60 = vsub.f32 %v2177_v38, %v2209_v59 }
 0x7fc   :  { %v2212_v61 = vpop.xlane.xlu0 %2211 }
 0x7fd   :  { %5244 = vpow2.f32 %v2236_v58  ;;  %v2238_v62 = vmul.f32 1.442695, %v2229_v60  ;;  %v2230_v28 = vsub.f32 %v2176_v14, %v2212_v61 }
 0x7fe   :  { %v2227_v26 = vpop.xlane.xlu1 %2226 }
 0x7ff   :  { %5246 = vpow2.f32 %v2238_v62  ;;  %v2235_v29 = vsub.f32 %v2195_v42, %v2227_v26  ;;  %v2240_v3 = vmul.f32 1.442695, %v2230_v28 }
 0x800   :  { %v2215_v30 = vpop.xlane.xlu0 %2214 }
 0x801   :  { %v2231_v32 = vsub.f32 %v2178_v44, %v2215_v30  ;;  %v2250_v33 = vmul.f32 1.442695, %v2235_v29  ;;  %v1674_v44 = vld [vmem:[%s6845_s10 + $0x38] sm:$0xff] }
 0x803   :  { %v2242_v34 = vmul.f32 1.442695, %v2231_v32  ;;  %5248 = vpow2.f32 %v2250_v33 }
 0x804   :  { %v2224_v0 = vpop.xlane.xlu0 %2223 }
 0x805   :  { %v2234_v1 = vsub.f32 %v2193_v25, %v2224_v0  ;;  %5250 = vpow2.f32 %v2242_v34 }
 0x806   :  { %v6406_v2 = vpop.eup %5240 }
 0x807   :  { %v2248_v5 = vmul.f32 1.442695, %v2234_v1  ;;  %v2264_v4 = vsel %vm1854_vm5, %v6406_v2, 0.0 }
 0x808   :  { %2265 = vadd.xlane.f32.xlu0 %v2264_v4  ;;  %v5243_v6 = vpop.eup %5242  ;;  %v2657_v4 = vld [vmem:[#allocation30 + $0x38] sm:$0xff] }
 0x809   :  { %5252 = vpow2.f32 %v2248_v5  ;;  %v2267_v8 = vsel %vm1854_vm5, %v5243_v6, 0.0  ;;  %v1671_v5 = vld [vmem:[%s6845_s10 + $0x20] sm:$0xff] }
 0x80a   :  { %v5245_v7 = vpop.eup %5244  ;;  %5254 = vpow2.f32 %v2240_v3  ;;  %2268 = vadd.xlane.f32.xlu1 %v2267_v8  ;;  %v1672_v3 = vld [vmem:[%s6845_s10 + $0x28] sm:$0xff]  ;;  %v2647_v8 = vld [vmem:[#allocation29 + $0x28] sm:$0xff] }
 0x80b   :  { %v2252_v9 = vsel %vm1854_vm5, %v5245_v7, 0.0 }
 0x80c   :  { %2253 = vadd.xlane.f32.xlu0 %v2252_v9  ;;  %v5247_v10 = vpop.eup %5246  ;;  %v2646_v9 = vld [vmem:[#allocation29 + $0x20] sm:$0xff] }
 0x80d   :  { %v2255_v11 = vsel %vm1854_vm5, %v5247_v10, 0.0 }
 0x80e   :  { %2256 = vadd.xlane.f32.xlu1 %v2255_v11  ;;  %v2644_v11 = vld [vmem:[#allocation29 + $0x10] sm:$0xff] }
 0x810   :  { %v5249_v13 = vpop.eup %5248 }
 0x811   :  { %v2273_v16 = vsel %vm1854_vm5, %v5249_v13, 0.0 }
 0x812   :  { %v5251_v18 = vpop.eup %5250  ;;  %2274 = vadd.xlane.f32.xlu1 %v2273_v16 }
 0x813   :  { %v2261_v20 = vsel %vm1854_vm5, %v5251_v18, 0.0 }
 0x816   :  { %v5253_v19 = vpop.eup %5252  ;;  %2262 = vadd.xlane.f32.xlu1 %v2261_v20  ;;  %v2654_v20 = vld [vmem:[#allocation30 + $0x20] sm:$0xff] }
 0x817   :  { %v2270_v21 = vsel %vm1854_vm5, %v5253_v19, 0.0  ;;  %v5255_v22 = vpop.eup %5254 }
 0x818   :  { %2271 = vadd.xlane.f32.xlu0 %v2270_v21  ;;  %v2258_v23 = vsel %vm1854_vm5, %v5255_v22, 0.0  ;;  %v2653_v21 = vld [vmem:[#allocation30 + $0x18] sm:$0xff] }
 0x81c   :  { %2259 = vadd.xlane.f32.xlu0 %v2258_v23  ;;  %v2651_v23 = vld [vmem:[#allocation30 + $0x8] sm:$0xff] }
 0x827   :  { %2335 = vrot.lane.b32.xlu1 %v6357_v39, %s5789_s15 }
 0x832   :  { %2337 = vrot.lane.b32.xlu0 %v6355_v35, %s5789_s15 }
 0x891   :  { %v2266_v25 = vpop.xlane.xlu0 %2265 }
 0x893   :  { %v2269_v24 = vpop.xlane.xlu1 %2268 }
 0x894   :  { %5256 = vrcp.f32 %v2269_v24  ;;  %v2643_v24 = vld [vmem:[#allocation29 + $0x8] sm:$0xff] }
 0x895   :  { %v2254_v38 = vpop.xlane.xlu0 %2253 }
 0x896   :  { %5258 = vrcp.f32 %v2254_v38  ;;  %v5794_v38 = vmov 0.0  }
 0x897   :  { %v2257_v37 = vpop.xlane.xlu1 %2256  ;;  %2799 = vmatprep.mubr.f32.mxu1 %v5794_v38 }
 0x898   :  { %5260 = vrcp.f32 %v2257_v37  ;;  %v2642_v37 = vld [vmem:[#allocation29] sm:$0xff] }
 0x89b   :  { %v2275_v14 = vpop.xlane.xlu1 %2274 }
 0x89c   :  { %5262 = vrcp.f32 %v2275_v14  ;;  %v2875_v14 = vld [vmem:[#allocation32 + $0x78] sm:$0xff] }
 0x89f   :  { %v2263_v40 = vpop.xlane.xlu1 %2262 }
 0x8a1   :  { %v2272_v41 = vpop.xlane.xlu0 %2271  ;;  %v5257_v35 = vpop.eup %5256 }
 0x8a2   :  { %5264 = vrcp.f32 %v2272_v41  ;;  %v2287_v54 = vmul.f32 %v5257_v35, %v5243_v6  ;;  %v2649_v6 = vld [vmem:[#allocation29 + $0x38] sm:$0xff]  ;;  %v2873_v41 = vld [vmem:[#allocation32 + $0x68] sm:$0xff] }
 0x8a3   :  { %5266 = vrcp.f32 %v2266_v25  ;;  %v2336_v43 = vpop.permute.xlu1 %2335  ;;  %v5259_v15 = vpop.eup %5258  ;;  %2759 = vmatprep.subr.mxu1 %v2649_v6  ;;  %v2650_v25 = vld [vmem:[#allocation30] sm:$0xff]  ;;  %v2867_v35 = vld [vmem:[#allocation32 + $0x38] sm:$0xff] }
 0x8a4   :  { %5268 = vrcp.f32 %v2263_v40  ;;  %v2277_v57 = vmul.f32 %v5259_v15, %v5245_v7  ;;  %v2648_v7 = vld [vmem:[#allocation29 + $0x30] sm:$0xff]  ;;  %v2865_v15 = vld [vmem:[#allocation32 + $0x28] sm:$0xff] }
 0x8a5   :  { %v2260_v42 = vpop.xlane.xlu0 %2259  ;;  %v5261_v45 = vpop.eup %5260  ;;  %2760 = vmatpush1.msra.mxu1 %v2648_v7  ;;  %v2874_v40 = vld [vmem:[#allocation32 + $0x70] sm:$0xff] }
 0x8a6   :  { %5270 = vrcp.f32 %v2260_v42  ;;  %v2279_v52 = vmul.f32 %v5261_v45, %v5247_v10  ;;  %2761 = vmatprep.subr.mxu1 %v2647_v8  ;;  %v2645_v10 = vld [vmem:[#allocation29 + $0x18] sm:$0xff]  ;;  %v2872_v42 = vld [vmem:[#allocation32 + $0x60] sm:$0xff] }
 0x8a7   :  { %2762 = vmatpush1.msra.mxu1 %v2646_v9  ;;  %v2864_v45 = vld [vmem:[#allocation32 + $0x20] sm:$0xff] }
 0x8a8   :  { %v2300_v26 = vcombine.low %v2277_v57, %v2279_v52  ;;  %2763 = vmatprep.subr.mxu1 %v2645_v10 }
 0x8a9   :  { %v2338_v39 = vpop.permute.xlu0 %2337  ;;  %v5263_v46 = vpop.eup %5262  ;;  %2764 = vmatpush1.msra.mxu1 %v2644_v11 }
 0x8aa   :  { %4897 = vmatprep.subr.msk.mxu0 %vm1990_vm6, %v2338_v39  ;;  %v2291_v55 = vmul.f32 %v5263_v46, %v5249_v13  ;;  %v2308_v33 = vrot.slane %v2300_v26, %v6071_v31  ;;  %2765 = vmatprep.subr.mxu1 %v2643_v24  ;;  %v2863_v46 = vld [vmem:[#allocation32 + $0x18] sm:$0xff] }
 0x8ab   :  { %4898 = vmatpush3.msk.msra.mxu0 %vm1990_vm6, %v2338_v39  ;;  %2766 = vmatpush1.msra.mxu1 %v2642_v37  ;;  %v2871_v39 = vld [vmem:[#allocation32 + $0x58] sm:$0xff] }
 0x8ac   :  { %4899 = vmatprep.subr.mxu0 %v2336_v43  ;;  %4643 = vmatmul.mubr.msk.f32.vlgmr.msra.gmra.mxu1 %vm833_vm3, %v6290_v27  ;;  %v2868_v27 = vld [vmem:[#allocation32 + $0x40] sm:$0xff] }
 0x8ad   :  { %4900 = vmatpush3.msra.mxu0 %v2336_v43  ;;  %2805 = vmatprep.mubr.f32.mxu1 %v5794_v38  ;;  %v2870_v43 = vld [vmem:[#allocation32 + $0x50] sm:$0xff] }
 0x8ae   :  { %4904 = vmatprep.subr.mxu0 %v1674_v44 }
 0x8af   :  { %v5265_v47 = vpop.eup %5264 }
 0x8b0   :  { %v5267_v48 = vpop.eup %5266  ;;  %v2289_v49 = vmul.f32 %v5265_v47, %v5253_v19  ;;  %v2655_v19 = vld [vmem:[#allocation30 + $0x28] sm:$0xff]  ;;  %4644 = vmatmul.mubr.msk.f32.gmra.mxu1 %vm833_vm3, %v6294_v36  ;;  %v2862_v36 = vld [vmem:[#allocation32 + $0x10] sm:$0xff] }
 0x8b1   :  { %v5269_v53 = vpop.eup %5268  ;;  %v2285_v59 = vmul.f32 %v5267_v48, %v6406_v2  ;;  %v1673_v2 = vld [vmem:[%s6845_s10 + $0x30] sm:$0xff]  ;;  %v2860_v48 = vld [vmem:[#allocation32] sm:$0xff]  ;;  %s6621_s10 = smov 0  }
 0x8b2   :  { %v2318_v60 = vcombine.low %v2289_v49, %v2291_v55  ;;  %v2283_v62 = vmul.f32 %v5269_v53, %v5251_v18  ;;  %v2656_v18 = vld [vmem:[#allocation30 + $0x30] sm:$0xff]  ;;  %v2861_v47 = vld [vmem:[#allocation32 + $0x8] sm:$0xff] }
 0x8b3   :  { %v5271_v58 = vpop.eup %5270  ;;  %v2317_v29 = vcombine.low %v2285_v59, %v2287_v54 }
 0x8b4   :  { %v2281_v61 = vmul.f32 %v5271_v58, %v5255_v22  ;;  %v2332_v32 = vrot.slane %v2318_v60, %v6071_v31  ;;  %v2652_v22 = vld [vmem:[#allocation30 + $0x10] sm:$0xff] }
 0x8b5   :  { %v2325_v34 = vrot.slane %v2317_v29, %v6071_v31 }
 0x8b6   :  { %v2301_v30 = vcombine.low %v2281_v61, %v2283_v62 }
 0x8b7   :  { %v2333_v1 = vcombine.low %v2325_v34, %v2332_v32 }
 0x8b8   :  { %v2315_v28 = vrot.slane %v2301_v30, %v6071_v31  ;;  %v4640_v30 = vld [vmem:[#allocation27] ss:$0 sm:$0xff] }
 0x8ba   :  { %v2316_v0 = vcombine.low %v2308_v33, %v2315_v28 }
 0x8bc   :  { %4901 = vmatprep.mubr.msk.f32.mxu0 %vm1985_vm7, %v2316_v0 }
 0x8bd   :  { %4902 = vmatmul.mubr.msk.f32.vlgmr.msra.gmra.mxu0 %vm1985_vm7, %v2333_v1 }
 0x8be   :  { %4905 = vmatpush3.msra.mxu0 %v1674_v44  ;;  %v2866_v44 = vld [vmem:[#allocation32 + $0x30] sm:$0xff] }
 0x8bf   :  { %4906 = vmatprep.subr.mxu0 %v1673_v2 }
 0x8c0   :  { %4907 = vmatpush3.msra.mxu0 %v1673_v2 }
 0x8c1   :  { %4908 = vmatprep.subr.mxu0 %v1672_v3 }
 0x8c2   :  { %4909 = vmatpush3.msra.mxu0 %v1672_v3 }
 0x8c3   :  { %4910 = vmatprep.subr.mxu0 %v1671_v5 }
 0x8c4   :  { %4911 = vmatpush3.msra.mxu0 %v1671_v5 }
 0x8c5   :  { %2682 = vmatprep.subr.mxu0 %v2657_v4 }
 0x97d   :  { %v4903_v13 = vpop.f32.mrf.mxu0 }
 0x97f   :  { %v2412_v16 = vpop.f32.mrf.mxu0 }
 0x980   :  { %4912 = vmatprep.mubr.msk.f32.mxu0 %vm833_vm3, %v2412_v16 }
 0x981   :  { %4913 = vmatmul.mubr.msk.f32.vlgmr.msra.gmra.mxu0 %vm833_vm3, %v4903_v13 }
 0x982   :  { %2683 = vmatpush1.msra.mxu0 %v2656_v18  ;;  %2722 = vmatprep.mubr.f32.mxu0 %v5794_v38 }
 0x983   :  { %2684 = vmatprep.subr.mxu0 %v2655_v19 }
 0x984   :  { %2685 = vmatpush1.msra.mxu0 %v2654_v20 }
 0x985   :  { %2686 = vmatprep.subr.mxu0 %v2653_v21 }
 0x986   :  { %2687 = vmatpush1.msra.mxu0 %v2652_v22 }
 0x987   :  { %2688 = vmatprep.subr.mxu0 %v2651_v23 }
 0x988   :  { %2689 = vmatpush1.msra.mxu0 %v2650_v25 }
 0x989   :  { %4641 = vmatmul.mubr.msk.f32.vlgmr.msra.gmra.mxu0 %vm833_vm3, %v6278_v12  ;;  %2939 = vmatprep.subr.mxu0 %v2875_v14  ;;  %v2869_v12 = vld [vmem:[#allocation32 + $0x48] sm:$0xff] }
 0x98a   :  { %2728 = vmatprep.mubr.f32.mxu0 %v5794_v38  ;;  %2940 = vmatpush1.msra.mxu0 %v2874_v40  ;;  %v3056_v40 = vld [vmem:[#allocation33] sm:$0x3] }
 0x98b   :  { %2941 = vmatprep.subr.mxu0 %v2873_v41 }
 0x98c   :  { %2942 = vmatpush1.msra.mxu0 %v2872_v42 }
 0x98d   :  { %2943 = vmatprep.subr.mxu0 %v2871_v39  ;;  %4642 = vmatmul.mubr.msk.f32.gmra.mxu0 %vm833_vm3, %v6280_v17  ;;  %v4925_v17 = vpop.f32.mrf.mxu1  ;;  %v3061_v39 = vrot.slane %v3056_v40, %v6086_v50 }
 0x98e   :  { %2944 = vmatpush1.msra.mxu0 %v2870_v43  ;;  %2987 = vmatprep.mubr.f32.mxu0 %v5794_v38  ;;  %v3065_v43 = vrot.slane %v3056_v40, %v6089_v51 }
 0x98f   :  { %2945 = vmatprep.subr.mxu0 %v2869_v12  ;;  %v2574_v53 = vpop.f32.mrf.mxu1 }
 0x990   :  { %2946 = vmatpush1.msra.mxu0 %v2868_v27 }
 0x991   :  { %2947 = vmatprep.subr.mxu0 %v2867_v35  ;;  %v2801_v21 = vpop.f32.mrf.mxu1 }
 0x992   :  { %2948 = vmatpush1.msra.mxu0 %v2866_v44 }
 0x993   :  { %2949 = vmatprep.subr.mxu0 %v2865_v15  ;;  %v2803_v23 = vpop.f32.mrf.mxu1  ;;  %v3066_v15 = vcombine.low %v3061_v39, %v3065_v43 }
 0x994   :  { %2950 = vmatpush1.msra.mxu0 %v2864_v45 }
 0x995   :  { %2951 = vmatprep.subr.mxu0 %v2863_v46  ;;  %v2807_v25 = vpop.f32.mrf.mxu1 }
 0x996   :  { %2952 = vmatpush1.msra.mxu0 %v2862_v36 }
 0x997   :  { %2953 = vmatprep.subr.mxu0 %v2861_v47  ;;  %v2809_v42 = vpop.f32.mrf.mxu1 }
 0x998   :  { %2954 = vmatpush1.msra.mxu0 %v2860_v48 }
 0xa41   :  { %v4914_v49 = vpop.f32.mrf.mxu0 }
 0xa42   :  { %v2580_v52 = vadd.f32 %v4925_v17, %v4914_v49 }
 0xa43   :  { %v2493_v54 = vpop.f32.mrf.mxu0 }
 0xa44   :  { %v2602_v55 = vcombine.high %v2580_v52, %v2580_v52  ;;  %v2609_v57 = vrot.slane %v2580_v52, %v6071_v31  ;;  %v2575_v58 = vadd.f32 %v2574_v53, %v2493_v54 }
 0xa46   :  { %v2616_v59 = vrot.slane %v2602_v55, %v6071_v31  ;;  %v2585_v60 = vcombine.high %v2575_v58, %v2575_v58  ;;  %v2592_v61 = vrot.slane %v2575_v58, %v6071_v31  ;;  %v2617_v62 = vcombine.high %v2609_v57, %v2609_v57 }
 0xa47   :  { %v2638_v6 = vadd.f32 %v4640_v30, %v2609_v57  ;;  %v3073_v55 = vrot.slane %v3066_v15, %v6071_v31  ;;  %v6527_v15 = vld [vmem:[#allocation35] sm:$0xff] }
 0xa48   :  { %v2618_v26 = vcombine.high %v2616_v59, %v2616_v59  ;;  %v2599_v29 = vrot.slane %v2585_v60, %v6071_v31  ;;  %v2600_v32 = vcombine.high %v2592_v61, %v2592_v61  ;;  %v2634_v34 = vadd.f32 %v4640_v30, %v2592_v61 }
 0xa49   :  { %v2639_v1 = vadd.f32 %v4640_v30, %v2617_v62  ;;  %v2640_v2 = vadd.f32 %v4640_v30, %v2616_v59  ;;  %v2724_v20 = vpop.f32.mrf.mxu0 }
 0xa4a   :  { %v2641_v33 = vadd.f32 %v4640_v30, %v2618_v26  ;;  %v2601_v28 = vcombine.high %v2599_v29, %v2599_v29  ;;  %v2635_v0 = vadd.f32 %v4640_v30, %v2600_v32  ;;  %v2636_v3 = vadd.f32 %v4640_v30, %v2599_v29 }
 0xa4b   :  { %v2901_v9 = vcombine.low %v2638_v6, %v2639_v1  ;;  %v2726_v22 = vpop.f32.mrf.mxu0  ;;  %v2802_v37 = vadd.f32 %v2801_v21, %v2724_v20 }
 0xa4c   :  { %v2637_v5 = vadd.f32 %v4640_v30, %v2601_v28  ;;  %v2884_v4 = vcombine.low %v2634_v34, %v2635_v0  ;;  %v2902_v7 = vcombine.low %v2640_v2, %v2641_v33  ;;  %v2804_v14 = vadd.f32 %v2803_v23, %v2726_v22 }
 0xa4d   :  { %v2909_v18 = vrot.slane %v2901_v9, %v6071_v31  ;;  %v2730_v24 = vpop.f32.mrf.mxu0 }
 0xa4e   :  { %v2885_v8 = vcombine.low %v2636_v3, %v2637_v5  ;;  %v2892_v10 = vrot.slane %v2884_v4, %v6071_v31  ;;  %v2916_v13 = vrot.slane %v2902_v7, %v6071_v31  ;;  %v2816_v12 = vcombine.low %v2802_v37, %v2804_v14 }
 0xa4f   :  { %v2732_v41 = vpop.f32.mrf.mxu0  ;;  %v2817_v27 = vcombine.high %v2802_v37, %v2804_v14 }
 0xa50   :  { %v2899_v11 = vrot.slane %v2885_v8, %v6071_v31  ;;  %v2917_v19 = vcombine.low %v2909_v18, %v2916_v13  ;;  %v2810_v35 = vadd.f32 %v2809_v42, %v2732_v41  ;;  %v2824_v45 = vrot.slane %v2816_v12, %v6071_v31 }
 0xa51   :  { %v2831_v46 = vrot.slane %v2817_v27, %v6071_v31 }
 0xa52   :  { %v2900_v16 = vcombine.low %v2892_v10, %v2899_v11  ;;  %v2832_v57 = vcombine.high %v2824_v45, %v2824_v45 }
 0xa53   :  { %v2833_v58 = vcombine.high %v2831_v46, %v2831_v46 }
 0xa54   :  { %4645 = vmatmul.mubr.msk.f32.vlgmr.msra.gmra.mxu0 %vm2918_vm8, %v2900_v16 }
 0xa55   :  { %2993 = vmatprep.mubr.f32.mxu0 %v5794_v38  ;;  %v2808_v38 = vadd.f32 %v2807_v25, %v2730_v24 }
 0xa57   :  { %v2834_v36 = vcombine.low %v2808_v38, %v2810_v35  ;;  %v2835_v47 = vcombine.high %v2808_v38, %v2810_v35 }
 0xa58   :  { %4646 = vmatmul.mubr.msk.f32.gmra.mxu0 %vm2918_vm8, %v2917_v19 }
 0xa59   :  { %v2842_v59 = vrot.slane %v2834_v36, %v6071_v31  ;;  %v2849_v60 = vrot.slane %v2835_v47, %v6071_v31  ;;  %v6535_v36 = vld [vmem:[#allocation35 + $0x18] sm:$0xff]  ;;  %v6537_v47 = vld [vmem:[#allocation35 + $0x20] sm:$0xff] }
 0xa5b   :  { %v2850_v2 = vcombine.high %v2842_v59, %v2842_v59  ;;  %v2851_v3 = vcombine.high %v2849_v60, %v2849_v60 }
 0xb14   :  { %v2989_v44 = vpop.f32.mrf.mxu0 }
 0xb16   :  { %v2991_v48 = vpop.f32.mrf.mxu0 }
 0xb17   :  { %v3004_v17 = vcombine.low %v2989_v44, %v2991_v48  ;;  %v3005_v49 = vcombine.high %v2989_v44, %v2991_v48  ;;  %v6539_v48 = vld [vmem:[#allocation35 + $0x28] sm:$0xff] }
 0xb18   :  { %v2995_v52 = vpop.f32.mrf.mxu0 }
 0xb19   :  { %v3012_v53 = vrot.slane %v3004_v17, %v6071_v31  ;;  %v3019_v54 = vrot.slane %v3005_v49, %v6071_v31  ;;  %v6541_v17 = vld [vmem:[#allocation35 + $0x30] sm:$0xff]  ;;  %v6543_v49 = vld [vmem:[#allocation35 + $0x38] sm:$0xff] }
 0xb1a   :  { %v2997_v61 = vpop.f32.mrf.mxu0 }
 0xb1b   :  { %v3020_v62 = vcombine.high %v3012_v53, %v3012_v53  ;;  %v3021_v26 = vcombine.high %v3019_v54, %v3019_v54  ;;  %v3048_v29 = vadd.f32 %v3012_v53, %v2824_v45  ;;  %v3050_v30 = vadd.f32 %v3019_v54, %v2831_v46  ;;  %v6529_v45 = vld [vmem:[#allocation35 + $0x8] sm:$0xff]  ;;  %v6531_v46 = vld [vmem:[#allocation35 + $0x10] sm:$0xff] }
 0xb1c   :  { %v3022_v32 = vcombine.low %v2995_v52, %v2997_v61  ;;  %v3023_v33 = vcombine.high %v2995_v52, %v2997_v61  ;;  %v6545_v52 = vld [vmem:[#allocation35 + $0x40] sm:$0xff]  ;;  %v6547_v53 = vld [vmem:[#allocation35 + $0x48] sm:$0xff]  ;;  %v6549_v54 = vld [vmem:[#allocation35 + $0x50] sm:$0xff] }
 0xb1d   :  { %v3049_v28 = vadd.f32 %v3020_v62, %v2832_v57  ;;  %v3051_v34 = vadd.f32 %v3021_v26, %v2833_v58  ;;  %v3075_v0 = vadd.f32 %v3073_v55, %v3048_v29  ;;  %v3077_v1 = vadd.f32 %v3073_v55, %v3050_v30  ;;  %v6553_v57 = vld [vmem:[#allocation35 + $0x60] sm:$0xff]  ;;  %v6555_v58 = vld [vmem:[#allocation35 + $0x68] sm:$0xff]  ;;  %v6567_v26 = vld [vmem:[#allocation35 + $0x90] sm:$0xff] }
 0xb1e   :  { %v3030_v5 = vrot.slane %v3022_v32, %v6071_v31  ;;  %v3037_v4 = vrot.slane %v3023_v33, %v6071_v31  ;;  %v6563_v61 = vld [vmem:[#allocation35 + $0x80] sm:$0xff]  ;;  %v6565_v62 = vld [vmem:[#allocation35 + $0x88] sm:$0xff]  ;;  %v6569_v29 = vld [vmem:[#allocation35 + $0x98] sm:$0xff] }
 0xb1f   :  { %v3076_v6 = vadd.f32 %v3073_v55, %v3049_v28  ;;  %v3078_v7 = vadd.f32 %v3073_v55, %v3051_v34  ;;  %3083 = vst.msk [vmem:[#allocation6] sm:$0x3] %vm569_vm2, %v3075_v0  ;;  %3085 = vst.msk [vmem:[#allocation6 + $0x4] sm:$0x3] %vm569_vm2, %v3077_v1  ;;  %v3119_v8 = vrot.slane %v3077_v1, %v6071_v31  ;;  %v6571_v30 = vld [vmem:[#allocation35 + $0xa0] sm:$0xff]  ;;  %v6573_v32 = vld [vmem:[#allocation35 + $0xa8] sm:$0xff] }
 0xb20   :  { %v3105_v9 = vrot.slane %v3075_v0, %v6071_v31  ;;  %v3038_v10 = vcombine.high %v3030_v5, %v3030_v5  ;;  %v3039_v11 = vcombine.high %v3037_v4, %v3037_v4  ;;  %v3052_v13 = vadd.f32 %v3030_v5, %v2842_v59  ;;  %v6557_v59 = vld [vmem:[#allocation35 + $0x70] sm:$0xff]  ;;  %v6577_v28 = vld [vmem:[#allocation35 + $0xb8] sm:$0xff]  ;;  %v6579_v34 = vld [vmem:[#allocation36] ss:$0 sm:$0xff] }
 0xb21   :  { %v3054_v16 = vadd.f32 %v3037_v4, %v2849_v60  ;;  %3084 = vst.msk [vmem:[#allocation6 + $0x2] sm:$0x3] %vm569_vm2, %v3076_v6  ;;  %3086 = vst.msk [vmem:[#allocation6 + $0x6] sm:$0x3] %vm569_vm2, %v3078_v7  ;;  %3159 = vrot.lane.b32.xlu0 %v3119_v8, %s5789_s15  ;;  %v3112_v18 = vrot.slane %v3076_v6, %v6071_v31  ;;  %v3126_v19 = vrot.slane %v3078_v7, %v6071_v31  ;;  %v6561_v60 = vld [vmem:[#allocation35 + $0x78] sm:$0xff]  ;;  %v6575_v33 = vld [vmem:[#allocation35 + $0xb0] sm:$0xff] }
 0xb22   :  { %3155 = vrot.lane.b32.xlu1 %v3105_v9, %s5789_s15  ;;  %v3253_v20 = vcombine.high %v3105_v9, %v3105_v9  ;;  %v3053_v21 = vadd.f32 %v3038_v10, %v2850_v2  ;;  %v3055_v22 = vadd.f32 %v3039_v11, %v2851_v3  ;;  %v3079_v23 = vadd.f32 %v3073_v55, %v3052_v13  ;;  %v6581_v0 = vld [vmem:[#allocation36 + $0x1] ss:$0 sm:$0xff] }
 0xb23   :  { %v3081_v24 = vadd.f32 %v3073_v55, %v3054_v16  ;;  %v3255_v25 = vcombine.high %v3119_v8, %v3119_v8  ;;  %v3254_v37 = vcombine.high %v3112_v18, %v3112_v18  ;;  %v3256_v14 = vcombine.high %v3126_v19, %v3126_v19 }
 0xb24   :  { %3270 = vst.msk [vmem:[#allocation7 + $0x10] sm:$0x3] %vm569_vm2, %v3253_v20  ;;  %v3080_v40 = vadd.f32 %v3073_v55, %v3053_v21  ;;  %v3082_v41 = vadd.f32 %v3073_v55, %v3055_v22  ;;  %3087 = vst.msk [vmem:[#allocation6 + $0x8] sm:$0x3] %vm569_vm2, %v3079_v23  ;;  %v3133_v42 = vrot.slane %v3079_v23, %v6071_v31  ;;  %v6551_v55 = vld [vmem:[#allocation35 + $0x58] sm:$0xff] }
 0xb25   :  { %3089 = vst.msk [vmem:[#allocation6 + $0xc] sm:$0x3] %vm569_vm2, %v3081_v24  ;;  %v3147_v39 = vrot.slane %v3081_v24, %v6071_v31  ;;  %3188 = vrot.lane.b32.xlu0 %v3105_v9, %s5790_s5  ;;  %3272 = vst.msk [vmem:[#allocation7 + $0x14] sm:$0x3] %vm569_vm2, %v3255_v25 }
 0xb26   :  { %3157 = vrot.lane.b32.xlu1 %v3112_v18, %s5789_s15  ;;  %3271 = vst.msk [vmem:[#allocation7 + $0x12] sm:$0x3] %vm569_vm2, %v3254_v37  ;;  %3273 = vst.msk [vmem:[#allocation7 + $0x16] sm:$0x3] %vm569_vm2, %v3256_v14  ;;  %v3140_v43 = vrot.slane %v3080_v40, %v6071_v31  ;;  %v3154_v12 = vrot.slane %v3082_v41, %v6071_v31  ;;  %v3257_v27 = vcombine.high %v3133_v42, %v3133_v42 }
 0xb27   :  { %3088 = vst.msk [vmem:[#allocation6 + $0xa] sm:$0x3] %vm569_vm2, %v3080_v40  ;;  %3090 = vst.msk [vmem:[#allocation6 + $0xe] sm:$0x3] %vm569_vm2, %v3082_v41  ;;  %v3259_v38 = vcombine.high %v3147_v39, %v3147_v39 }
 0xb28   :  { %3274 = vst.msk [vmem:[#allocation7 + $0x18] sm:$0x3] %vm569_vm2, %v3257_v27  ;;  %v3258_v35 = vcombine.high %v3140_v43, %v3140_v43  ;;  %v3260_v44 = vcombine.high %v3154_v12, %v3154_v12 }
 0xb29   :  { %3276 = vst.msk [vmem:[#allocation7 + $0x1c] sm:$0x3] %vm569_vm2, %v3259_v38  ;;  %3192 = vrot.lane.b32.xlu0 %v3119_v8, %s5790_s5 }
 0xb2a   :  { %3161 = vrot.lane.b32.xlu1 %v3126_v19, %s5789_s15  ;;  %3275 = vst.msk [vmem:[#allocation7 + $0x1a] sm:$0x3] %vm569_vm2, %v3258_v35  ;;  %3277 = vst.msk [vmem:[#allocation7 + $0x1e] sm:$0x3] %vm569_vm2, %v3260_v44 }
 0xb2d   :  { %3221 = vrot.lane.b32.xlu0 %v3105_v9, %s5791_s28 }
 0xb2e   :  { %3190 = vrot.lane.b32.xlu1 %v3112_v18, %s5790_s5 }
 0xb31   :  { %3225 = vrot.lane.b32.xlu0 %v3119_v8, %s5791_s28 }
 0xb32   :  { %3194 = vrot.lane.b32.xlu1 %v3126_v19, %s5790_s5 }
 0xb35   :  { %3278 = vrot.lane.b32.xlu0 %v3253_v20, %s5789_s15 }
 0xb36   :  { %3223 = vrot.lane.b32.xlu1 %v3112_v18, %s5791_s28 }
 0xb39   :  { %3282 = vrot.lane.b32.xlu0 %v3255_v25, %s5789_s15 }
 0xb3a   :  { %3227 = vrot.lane.b32.xlu1 %v3126_v19, %s5791_s28 }
 0xb3d   :  { %3163 = vrot.lane.b32.xlu0 %v3133_v42, %s5789_s15 }
 0xb3e   :  { %3280 = vrot.lane.b32.xlu1 %v3254_v37, %s5789_s15 }
 0xb41   :  { %3167 = vrot.lane.b32.xlu0 %v3147_v39, %s5789_s15 }
 0xb42   :  { %3284 = vrot.lane.b32.xlu1 %v3256_v14, %s5789_s15 }
 0xb45   :  { %3196 = vrot.lane.b32.xlu0 %v3133_v42, %s5790_s5 }
 0xb46   :  { %3165 = vrot.lane.b32.xlu1 %v3140_v43, %s5789_s15 }
 0xb49   :  { %3200 = vrot.lane.b32.xlu0 %v3147_v39, %s5790_s5 }
 0xb4a   :  { %3169 = vrot.lane.b32.xlu1 %v3154_v12, %s5789_s15 }
 0xb4d   :  { %3229 = vrot.lane.b32.xlu0 %v3133_v42, %s5791_s28 }
 0xb4e   :  { %3198 = vrot.lane.b32.xlu1 %v3140_v43, %s5790_s5 }
 0xb51   :  { %3233 = vrot.lane.b32.xlu0 %v3147_v39, %s5791_s28 }
 0xb52   :  { %3202 = vrot.lane.b32.xlu1 %v3154_v12, %s5790_s5 }
 0xb55   :  { %3286 = vrot.lane.b32.xlu0 %v3257_v27, %s5789_s15 }
 0xb56   :  { %3231 = vrot.lane.b32.xlu1 %v3140_v43, %s5791_s28 }
 0xb59   :  { %3290 = vrot.lane.b32.xlu0 %v3259_v38, %s5789_s15 }
 0xb5a   :  { %3235 = vrot.lane.b32.xlu1 %v3154_v12, %s5791_s28 }
 0xb5e   :  { %3288 = vrot.lane.b32.xlu1 %v3258_v35, %s5789_s15 }
 0xb62   :  { %3292 = vrot.lane.b32.xlu1 %v3260_v44, %s5789_s15  ;;  %v6617_v44 = vmov 0.0  }
 0xb93   :  { %v3160_v1 = vpop.permute.xlu0 %3159 }
 0xb94   :  { %v3156_v2 = vpop.permute.xlu1 %3155  ;;  %3182 = vst.msk [vmem:[#allocation6 + $0x14] sm:$0x3] %vm569_vm2, %v3160_v1  ;;  %v6619_v1 = vmov 0.0  }
 0xb95   :  { %3180 = vst.msk [vmem:[#allocation6 + $0x10] sm:$0x3] %vm569_vm2, %v3156_v2 }
 0xb97   :  { %v3189_v3 = vpop.permute.xlu0 %3188 }
 0xb98   :  { %v3158_v5 = vpop.permute.xlu1 %3157  ;;  %3213 = vst.msk [vmem:[#allocation6 + $0x20] sm:$0x3] %vm569_vm2, %v3189_v3 }
 0xb99   :  { %3181 = vst.msk [vmem:[#allocation6 + $0x12] sm:$0x3] %vm569_vm2, %v3158_v5 }
 0xb9b   :  { %v3193_v4 = vpop.permute.xlu0 %3192 }
 0xb9c   :  { %v3162_v6 = vpop.permute.xlu1 %3161  ;;  %3215 = vst.msk [vmem:[#allocation6 + $0x24] sm:$0x3] %vm569_vm2, %v3193_v4 }
 0xb9d   :  { %3183 = vst.msk [vmem:[#allocation6 + $0x16] sm:$0x3] %vm569_vm2, %v3162_v6 }
 0xb9f   :  { %v3222_v7 = vpop.permute.xlu0 %3221 }
 0xba0   :  { %v3191_v8 = vpop.permute.xlu1 %3190  ;;  %3245 = vst.msk [vmem:[#allocation7] sm:$0x3] %vm569_vm2, %v3222_v7 }
 0xba1   :  { %3214 = vst.msk [vmem:[#allocation6 + $0x22] sm:$0x3] %vm569_vm2, %v3191_v8 }
 0xba3   :  { %v3226_v9 = vpop.permute.xlu0 %3225 }
 0xba4   :  { %v3195_v10 = vpop.permute.xlu1 %3194  ;;  %3247 = vst.msk [vmem:[#allocation7 + $0x4] sm:$0x3] %vm569_vm2, %v3226_v9 }
 0xba5   :  { %3216 = vst.msk [vmem:[#allocation6 + $0x26] sm:$0x3] %vm569_vm2, %v3195_v10 }
 0xba7   :  { %v3279_v11 = vpop.permute.xlu0 %3278 }
 0xba8   :  { %v3224_v13 = vpop.permute.xlu1 %3223  ;;  %3303 = vst.msk [vmem:[#allocation7 + $0x20] sm:$0x3] %vm569_vm2, %v3279_v11 }
 0xba9   :  { %3246 = vst.msk [vmem:[#allocation7 + $0x2] sm:$0x3] %vm569_vm2, %v3224_v13 }
 0xbab   :  { %v3283_v16 = vpop.permute.xlu0 %3282 }
 0xbac   :  { %v3228_v18 = vpop.permute.xlu1 %3227  ;;  %3305 = vst.msk [vmem:[#allocation7 + $0x24] sm:$0x3] %vm569_vm2, %v3283_v16 }
 0xbad   :  { %3248 = vst.msk [vmem:[#allocation7 + $0x6] sm:$0x3] %vm569_vm2, %v3228_v18 }
 0xbaf   :  { %v3164_v20 = vpop.permute.xlu0 %3163 }
 0xbb0   :  { %v3281_v19 = vpop.permute.xlu1 %3280  ;;  %3184 = vst.msk [vmem:[#allocation6 + $0x18] sm:$0x3] %vm569_vm2, %v3164_v20 }
 0xbb1   :  { %3304 = vst.msk [vmem:[#allocation7 + $0x22] sm:$0x3] %vm569_vm2, %v3281_v19 }
 0xbb3   :  { %v3168_v22 = vpop.permute.xlu0 %3167 }
 0xbb4   :  { %v3285_v21 = vpop.permute.xlu1 %3284  ;;  %3186 = vst.msk [vmem:[#allocation6 + $0x1c] sm:$0x3] %vm569_vm2, %v3168_v22 }
 0xbb5   :  { %3306 = vst.msk [vmem:[#allocation7 + $0x26] sm:$0x3] %vm569_vm2, %v3285_v21 }
 0xbb7   :  { %v3197_v23 = vpop.permute.xlu0 %3196 }
 0xbb8   :  { %v3166_v24 = vpop.permute.xlu1 %3165  ;;  %3217 = vst.msk [vmem:[#allocation6 + $0x28] sm:$0x3] %vm569_vm2, %v3197_v23 }
 0xbb9   :  { %3185 = vst.msk [vmem:[#allocation6 + $0x1a] sm:$0x3] %vm569_vm2, %v3166_v24 }
 0xbbb   :  { %v3201_v25 = vpop.permute.xlu0 %3200 }
 0xbbc   :  { %v3170_v37 = vpop.permute.xlu1 %3169  ;;  %3219 = vst.msk [vmem:[#allocation6 + $0x2c] sm:$0x3] %vm569_vm2, %v3201_v25 }
 0xbbd   :  { %3187 = vst.msk [vmem:[#allocation6 + $0x1e] sm:$0x3] %vm569_vm2, %v3170_v37 }
 0xbbf   :  { %v3230_v14 = vpop.permute.xlu0 %3229 }
 0xbc0   :  { %v3199_v40 = vpop.permute.xlu1 %3198  ;;  %3249 = vst.msk [vmem:[#allocation7 + $0x8] sm:$0x3] %vm569_vm2, %v3230_v14 }
 0xbc1   :  { %3218 = vst.msk [vmem:[#allocation6 + $0x2a] sm:$0x3] %vm569_vm2, %v3199_v40 }
 0xbc3   :  { %v3234_v41 = vpop.permute.xlu0 %3233 }
 0xbc4   :  { %v3203_v42 = vpop.permute.xlu1 %3202  ;;  %3251 = vst.msk [vmem:[#allocation7 + $0xc] sm:$0x3] %vm569_vm2, %v3234_v41 }
 0xbc5   :  { %3220 = vst.msk [vmem:[#allocation6 + $0x2e] sm:$0x3] %vm569_vm2, %v3203_v42 }
 0xbc7   :  { %v3287_v39 = vpop.permute.xlu0 %3286 }
 0xbc8   :  { %v3232_v43 = vpop.permute.xlu1 %3231  ;;  %3307 = vst.msk [vmem:[#allocation7 + $0x28] sm:$0x3] %vm569_vm2, %v3287_v39 }
 0xbc9   :  { %3250 = vst.msk [vmem:[#allocation7 + $0xa] sm:$0x3] %vm569_vm2, %v3232_v43 }
 0xbcb   :  { %v3291_v12 = vpop.permute.xlu0 %3290 }
 0xbcc   :  { %v3236_v27 = vpop.permute.xlu1 %3235  ;;  %3309 = vst.msk [vmem:[#allocation7 + $0x2c] sm:$0x3] %vm569_vm2, %v3291_v12 }
 0xbcd   :  { %3252 = vst.msk [vmem:[#allocation7 + $0xe] sm:$0x3] %vm569_vm2, %v3236_v27 }
 0xbd0   :  { %v3289_v38 = vpop.permute.xlu1 %3288 }
 0xbd1   :  { %3308 = vst.msk [vmem:[#allocation7 + $0x2a] sm:$0x3] %vm569_vm2, %v3289_v38 }
 0xbd4   :  { %v3293_v35 = vpop.permute.xlu1 %3292 }
 0xbd5   :  { %3310 = vst.msk [vmem:[#allocation7 + $0x2e] sm:$0x3] %vm569_vm2, %v3293_v35 }
 0xbd6 LB: > { %v5795_v2 = vmov 0.0   ;;  %vm5796_vm9 = vmmov 0   ;;  %s4647_s15 = sshll.u32 %s5744_s10, 1  ;;  %s3350_s28 = ssub.s32 7, %s5744_s10  ;;  %s5744_s10 = sphi %s6621_s10, %s3347_s10   ;;  %v5740_v1 = vphi %v6619_v1, %v3601_v1   ;;  %v5736_v44 = vphi %v6617_v44, %v3854_v44  }
 0xbd7   : > { %4926 = vmatprep.subr.mxu0 %v5795_v2  ;;  %4937 = vmatprep.subr.mxu1 %v5795_v2  ;;  %s6677_s5 = scalar_lea.vmem [#allocation6], %s4647_s15  ;;  %s6681_s4 = sshll.u32 %s3350_s28, 1 }
 0xbd8   : > { %4927 = vmatpush3.msra.mxu0 %v6535_v36  ;;  %4938 = vmatpush3.msra.mxu1 %v6543_v49  ;;  %v3353_v3 = vld [vmem:[%s6677_s5] sm:$0x3]  ;;  %v4651_v10 = vld [vmem:[%s6677_s5 + $0x10] sm:$0x3]  ;;  %s3605_s14 = scalar_lea.vmem [#allocation7], %s6681_s4  ;;  %s3687_s30 = ssub.s32 15, %s5744_s10 }
 0xbd9   : > { %4928 = vmatprep.subr.mxu0 %v5795_v2  ;;  %4939 = vmatprep.subr.mxu1 %v5795_v2  ;;  %s4661_s16 = sshll.u32 %s3687_s30, 1  ;;  %s3768_s2 = ssub.s32 23, %s5744_s10 }
 0xbda   : > { %4929 = vmatpush3.msra.mxu0 %v6531_v46  ;;  %4940 = vmatpush3.msra.mxu1 %v6541_v17  ;;  %s3689_s23 = scalar_lea.vmem [#allocation7], %s4661_s16  ;;  %s4664_s29 = sshll.u32 %s3768_s2, 1 }
 0xbdb   : > { %4930 = vmatprep.subr.mxu0 %v5795_v2  ;;  %4941 = vmatprep.subr.mxu1 %v5795_v2  ;;  %s3770_s3 = scalar_lea.vmem [#allocation7], %s4664_s29  ;;  %s3602_s1 = scalar_lea.vmem [#allocation8], %s4647_s15 }
 0xbdc   : > { %4931 = vmatpush3.msra.mxu0 %v6529_v45  ;;  %4942 = vmatpush3.msra.mxu1 %v6539_v48  ;;  %v3606_v13 = vld [vmem:[%s3605_s14] sm:$0x3]  ;;  %s3855_s26 = scalar_lea.vmem [#allocation9], %s6681_s4  ;;  %s3347_s10 = sadd.s32 1, %s5744_s10  }
 0xbdd   : > { %4932 = vmatprep.subr.mxu0 %v5795_v2  ;;  %4943 = vmatprep.subr.mxu1 %v5795_v2  ;;  %v3690_v24 = vld [vmem:[%s3689_s23] sm:$0x3]  ;;  %p3344_p2 = scmp.ge.s32.totalorder %s3347_s10, 8  }
 0xbde   : > { %4933 = vmatpush3.msra.mxu0 %v6527_v15  ;;  %4934 = vmatprep.mubr.msk.f32.mxu0 %vm5796_vm9, %v5795_v2  ;;  %v3878_v15 = vld [vmem:[%s6854_s19 + $0x8] sm:$0xff] (%p3344_p2)  ;;  %v3877_v46 = vld [vmem:[%s6854_s19] sm:$0xff] (%p3344_p2)  ;;  %s6764_s30 = smov (%p3344_p2), 1  }
 0xbdf   : > { %4944 = vmatpush3.msra.mxu1 %v6537_v47  ;;  %4945 = vmatprep.mubr.msk.f32.mxu1 %vm5796_vm9, %v5795_v2  ;;  %v3866_v45 = vld [vmem:[%s6853_s18 + $0x8] sm:$0xff] (%p3344_p2)  ;;  %v3865_v36 = vld [vmem:[%s6853_s18] sm:$0xff] (%p3344_p2) }
 0xbe0   : > { %4935 = vmatmul.mubr.msk.f32.vlgmr.msra.gmra.mxu0 %vm833_vm3, %v5740_v1  ;;  %4946 = vmatmul.mubr.msk.f32.vlgmr.msra.gmra.mxu1 %vm833_vm3, %v5740_v1 }
 0xbe1   : > { %4959 = vmatprep.subr.mxu1 %v5795_v2  ;;  %4948 = vmatprep.subr.mxu0 %v5795_v2 }
 0xbe2   : > { %4960 = vmatpush3.msra.mxu1 %v6561_v60  ;;  %4949 = vmatpush3.msra.mxu0 %v6551_v55 }
 0xbe3   : > { %4961 = vmatprep.subr.mxu1 %v5795_v2  ;;  %4967 = vmatprep.mubr.msk.f32.mxu1 %vm5796_vm9, %v5795_v2 }
 0xbe4   : > { %4962 = vmatpush3.msra.mxu1 %v6557_v59  ;;  %4950 = vmatprep.subr.mxu0 %v5795_v2 }
 0xbe5   : > { %4963 = vmatprep.subr.mxu1 %v5795_v2  ;;  %4951 = vmatpush3.msra.mxu0 %v6549_v54 }
 0xbe6   : > { %4964 = vmatpush3.msra.mxu1 %v6555_v58  ;;  %4952 = vmatprep.subr.mxu0 %v5795_v2 }
 0xbe7   : > { %4965 = vmatprep.subr.mxu1 %v5795_v2  ;;  %4953 = vmatpush3.msra.mxu0 %v6547_v53 }
 0xbe8   : > { %4966 = vmatpush3.msra.mxu1 %v6553_v57  ;;  %4954 = vmatprep.subr.mxu0 %v5795_v2 }
 0xbe9   : > { %4968 = vmatmul.mubr.msk.f32.vlgmr.msra.gmra.mxu1 %vm833_vm3, %v5736_v44  ;;  %4955 = vmatpush3.msra.mxu0 %v6545_v52 }
 0xbea   : > { %4956 = vmatprep.mubr.msk.f32.mxu0 %vm5796_vm9, %v5795_v2  ;;  %4970 = vmatprep.subr.mxu0 %v5795_v2 }
 0xbeb   : > { %4957 = vmatmul.mubr.msk.f32.vlgmr.msra.gmra.mxu0 %vm833_vm3, %v5740_v1  ;;  %4981 = vmatprep.subr.mxu1 %v5795_v2 }
 0xbec   : > { %4971 = vmatpush3.msra.mxu0 %v6569_v29  ;;  %4978 = vmatprep.mubr.msk.f32.mxu0 %vm5796_vm9, %v5795_v2 }
 0xbed   : > { %4972 = vmatprep.subr.mxu0 %v5795_v2  ;;  %4982 = vmatpush3.msra.mxu1 %v6577_v28 }
 0xbee   : > { %4973 = vmatpush3.msra.mxu0 %v6567_v26  ;;  %4983 = vmatprep.subr.mxu1 %v5795_v2 }
 0xbef   : > { %4974 = vmatprep.subr.mxu0 %v5795_v2  ;;  %4984 = vmatpush3.msra.mxu1 %v6575_v33 }
 0xbf0   : > { %4975 = vmatpush3.msra.mxu0 %v6565_v62  ;;  %4985 = vmatprep.subr.mxu1 %v5795_v2 }
 0xbf1   : > { %4976 = vmatprep.subr.mxu0 %v5795_v2  ;;  %4986 = vmatpush3.msra.mxu1 %v6573_v32 }
 0xbf2   : > { %4977 = vmatpush3.msra.mxu0 %v6563_v61  ;;  %4987 = vmatprep.subr.mxu1 %v5795_v2 }
 0xbf3   : > { %4979 = vmatmul.mubr.msk.f32.vlgmr.msra.gmra.mxu0 %vm833_vm3, %v5736_v44  ;;  %4988 = vmatpush3.msra.mxu1 %v6571_v30 }
 0xbf4   : > { %4989 = vmatprep.mubr.msk.f32.mxu1 %vm5796_vm9, %v5795_v2 }
 0xbf5   : > { %4990 = vmatmul.mubr.msk.f32.vlgmr.msra.gmra.mxu1 %vm833_vm3, %v5736_v44 }
 0xca0   : > { %v3423_v5 = vpop.f32.mrf.mxu0  ;;  %v3504_v4 = vpop.f32.mrf.mxu1 }
 0xca1   : > { %v3427_v6 = vadd.f32 %v3423_v5, %v3353_v3  ;;  %v3508_v11 = vadd.f32 %v4651_v10, %v3504_v4  ;;  %v4655_v5 = vld [vmem:[%s6677_s5 + $0x20] sm:$0x3] }
 0xca2   : > { %v4947_v7 = vpop.f32.mrf.mxu1  ;;  %v4936_v8 = vpop.f32.mrf.mxu0 }
 0xca3   : > { %v4649_v9 = vmul.f32 -1.442695, %v3427_v6  ;;  %v4653_v19 = vmul.f32 -1.442695, %v3508_v11  ;;  %v3771_v11 = vld [vmem:[%s3770_s3] sm:$0x3] }
 0xca5   : > { %5272 = vpow2.f32 %v4649_v9 }
 0xca9   : > { %v3676_v16 = vpop.f32.mrf.mxu1 }
 0xcaa   : > { %v3680_v18 = vadd.f32 %v3676_v16, %v3606_v13 }
 0xcab   : > { %v4969_v20 = vpop.f32.mrf.mxu1  ;;  %v3591_v21 = vpop.f32.mrf.mxu0 }
 0xcac   : > { %v4660_v22 = vmul.f32 -1.442695, %v3680_v18  ;;  %v3592_v2 = vadd.f32 %v6579_v34, %v3591_v21 }
 0xcad   : > { %v4958_v23 = vpop.f32.mrf.mxu0 }
 0xcae   : > { %5274 = vpow2.f32 %v4660_v22 }
 0xcaf   : > { %5276 = vpow2.f32 %v4653_v19 }
 0xcb2   : > { %v5273_v25 = vpop.eup %5272 }
 0xcb3   : > { %v3431_v37 = vadd.f32 1.0, %v5273_v25  ;;  %v3757_v14 = vpop.f32.mrf.mxu0 }
 0xcb4   : > { %v3761_v40 = vadd.f32 %v3757_v14, %v3690_v24 }
 0xcb5   : > { %5278 = vrcp.f32 %v3431_v37  ;;  %v4980_v41 = vpop.f32.mrf.mxu0  ;;  %v3844_v42 = vpop.f32.mrf.mxu1 }
 0xcb6   : > { %v4663_v39 = vmul.f32 -1.442695, %v3761_v40  ;;  %v3845_v9 = vadd.f32 %v6581_v0, %v3844_v42  ;;  %v3880_v40 = vld [vmem:[%s6854_s19 + $0x18] sm:$0xff] (%p3344_p2)  ;;  %v3879_v42 = vld [vmem:[%s6854_s19 + $0x10] sm:$0xff] (%p3344_p2) }
 0xcb7   : > { %v4991_v43 = vpop.f32.mrf.mxu1  ;;  %v3868_v41 = vld [vmem:[%s6853_s18 + $0x18] sm:$0xff] (%p3344_p2)  ;;  %4992 = vmatprep.subr.mxu0 (%p3344_p2), %v3880_v40 }
 0xcb8   : > { %5280 = vpow2.f32 %v4663_v39  ;;  %5003 = vmatprep.subr.mxu1 (%p3344_p2), %v3868_v41  ;;  %4993 = vmatpush3.msra.mxu0 (%p3344_p2), %v3880_v40 }
 0xcb9   :  { %5004 = vmatpush3.msra.mxu1 (%p3344_p2), %v3868_v41  ;;  %4994 = vmatprep.subr.mxu0 (%p3344_p2), %v3879_v42 }
 0xcba   :  { %4995 = vmatpush3.msra.mxu0 (%p3344_p2), %v3879_v42 }
 0xcbb   : > { %v5275_v12 = vpop.eup %5274  ;;  %4996 = vmatprep.subr.mxu0 (%p3344_p2), %v3878_v15 }
 0xcbc   : > { %v5277_v27 = vpop.eup %5276  ;;  %v3684_v38 = vadd.f32 1.0, %v5275_v12  ;;  %4997 = vmatpush3.msra.mxu0 (%p3344_p2), %v3878_v15 }
 0xcbd   : > { %v3512_v35 = vadd.f32 1.0, %v5277_v27  ;;  %4998 = vmatprep.subr.mxu0 (%p3344_p2), %v3877_v46 }
 0xcbe   : > { %5282 = vrcp.f32 %v3684_v38  ;;  %4999 = vmatpush3.msra.mxu0 (%p3344_p2), %v3877_v46 }
 0xcbf   : > { %5284 = vrcp.f32 %v3512_v35 }
 0xcc2   : > { %v5279_v3 = vpop.eup %5278 }
 0xcc3   : > { %v3595_v4 = vmul.f32 %v5279_v3, %v3592_v2 }
 0xcc5   : > { %v5281_v6 = vpop.eup %5280  ;;  %v3596_v7 = vadd.f32 %v4655_v5, %v3595_v4 }
 0xcc6   : > { %v3765_v8 = vadd.f32 1.0, %v5281_v6 }
 0xcc7   : > { %5286 = vtanh.f32 %v3596_v7 }
 0xcc8   : > { %5288 = vrcp.f32 %v3765_v8 }
 0xccb   : > { %v5283_v10 = vpop.eup %5282 }
 0xccc   : > { %v3848_v13 = vmul.f32 %v5283_v10, %v3845_v9  ;;  %v5285_v18 = vpop.eup %5284  ;;  %v6740_v9 = vld [vmem:[#allocation38] sm:$0xff] (%p3344_p2)  ;;  %v6742_v10 = vld [vmem:[#allocation38 + $0x8] sm:$0x3f] (%p3344_p2) }
 0xccd   : > { %v3598_v19 = vsub.f32 1.0, %v5285_v18  ;;  %v3600_v21 = vmul.f32 %v5740_v1, %v5285_v18 }
 0xcce   : > { %v3849_v16 = vadd.f32 %v3848_v13, %v3771_v11 }
 0xcd0   : > { %5290 = vtanh.f32 %v3849_v16 }
 0xcd4   : > { %v5287_v20 = vpop.eup %5286 }
 0xcd5   : > { %v3599_v22 = vmul.f32 %v5287_v20, %v3598_v19  ;;  %v5289_v23 = vpop.eup %5288  ;;  %v4671_v19 = vld [vmem:[%s6855_s20] ss:$0 sm:$0xff] (%p3344_p2) }
 0xcd6   : > { %v3851_v24 = vsub.f32 1.0, %v5289_v23  ;;  %v3853_v37 = vmul.f32 %v5736_v44, %v5289_v23 }
 0xcd7   : > { %v3601_v1 = vadd.f32 %v3600_v21, %v3599_v22  }
 0xcd9   : > { %3603 = vst.msk [vmem:[%s3602_s1] sm:$0x3] %vm569_vm2, %v3601_v1  ;;  %v3867_v1 = vld [vmem:[%s6853_s18 + $0x10] sm:$0xff] (%p3344_p2) }
 0xcda   :  { %5005 = vmatprep.subr.mxu1 (%p3344_p2), %v3867_v1 }
 0xcdb   :  { %5006 = vmatpush3.msra.mxu1 (%p3344_p2), %v3867_v1 }
 0xcdc   :  { %5007 = vmatprep.subr.mxu1 (%p3344_p2), %v3866_v45 }
 0xcdd   : > { %v5291_v25 = vpop.eup %5290  ;;  %5008 = vmatpush3.msra.mxu1 (%p3344_p2), %v3866_v45 }
 0xcde   : > { %v3852_v14 = vmul.f32 %v5291_v25, %v3851_v24  ;;  %3346 = sbr.rel (!%p3344_p2) target bundleno = 3030 (0xbd6), region = 260  ;;  %5009 = vmatprep.subr.mxu1 (%p3344_p2), %v3865_v36 }
 0xcdf   :  { %5010 = vmatpush3.msra.mxu1 (%p3344_p2), %v3865_v36 }
 0xce0   : > { %v3854_v44 = vadd.f32 %v3853_v37, %v3852_v14   ;;  %v3857_v54 = vld [vmem:[#allocation8] sm:$0x3] (%p3344_p2)  ;;  %v3858_v55 = vld [vmem:[#allocation8 + $0x2] sm:$0x3] (%p3344_p2)  ;;  %v3859_v57 = vld [vmem:[#allocation8 + $0x4] sm:$0x3] (%p3344_p2) }
 0xce1   :  { %v3860_v58 = vld [vmem:[#allocation8 + $0x6] sm:$0x3] (%p3344_p2)  ;;  %v4010_v59 = vcombine.low (%p3344_p2), %v3857_v54, %v3858_v55  ;;  %v3861_v33 = vld [vmem:[#allocation8 + $0x8] sm:$0x3] (%p3344_p2)  ;;  %v3863_v39 = vld [vmem:[#allocation8 + $0xc] sm:$0x3] (%p3344_p2) }
 0xce2   : > { %3856 = vst.msk [vmem:[%s3855_s26] sm:$0x3] %vm569_vm2, %v3854_v44  ;;  %v4011_v29 = vcombine.low (%p3344_p2), %v3859_v57, %v3860_v58  ;;  %v3862_v44 = vld [vmem:[#allocation8 + $0xa] sm:$0x3] (%p3344_p2)  ;;  %v3864_v43 = vld [vmem:[#allocation8 + $0xe] sm:$0x3] (%p3344_p2) }
 0xce3   :  { %v4018_v28 = vrot.slane %v4010_v59, %v6071_v31  ;;  %v4027_v38 = vcombine.low %v3861_v33, %v3862_v44  ;;  %v4028_v3 = vcombine.low %v3863_v39, %v3864_v43 }
 0xce4   :  { %v4025_v27 = vrot.slane %v4011_v29, %v6071_v31 }
 0xce5   :  { %v4035_v4 = vrot.slane %v4027_v38, %v6071_v31  ;;  %v4042_v7 = vrot.slane %v4028_v3, %v6071_v31 }
 0xce6   :  { %v4026_v5 = vcombine.low %v4018_v28, %v4025_v27 }
 0xce7   :  { %v4043_v8 = vcombine.low %v4035_v4, %v4042_v7 }
 0xce8   :  { %5011 = vmatprep.mubr.msk.f32.mxu1 %vm833_vm3, %v4026_v5 }
 0xce9   :  { %v3869_v47 = vld [vmem:[#allocation9] sm:$0x3]  ;;  %v3870_v48 = vld [vmem:[#allocation9 + $0x2] sm:$0x3]  ;;  %v3871_v17 = vld [vmem:[#allocation9 + $0x4] sm:$0x3]  ;;  %5012 = vmatmul.mubr.msk.f32.vlgmr.msra.gmra.mxu1 %vm833_vm3, %v4043_v8 }
 0xcea   :  { %v3872_v49 = vld [vmem:[#allocation9 + $0x6] sm:$0x3]  ;;  %v3889_v52 = vcombine.low %v3869_v47, %v3870_v48  ;;  %v3873_v60 = vld [vmem:[#allocation9 + $0x8] sm:$0x3]  ;;  %v3874_v61 = vld [vmem:[#allocation9 + $0xa] sm:$0x3] }
 0xceb   :  { %v3890_v53 = vcombine.low %v3871_v17, %v3872_v49  ;;  %v3875_v30 = vld [vmem:[#allocation9 + $0xc] sm:$0x3]  ;;  %v3876_v32 = vld [vmem:[#allocation9 + $0xe] sm:$0x3]  ;;  %v3906_v34 = vcombine.low %v3873_v60, %v3874_v61 }
 0xcec   :  { %v3897_v62 = vrot.slane %v3889_v52, %v6071_v31  ;;  %v3907_v0 = vcombine.low %v3875_v30, %v3876_v32 }
 0xced   :  { %v3904_v26 = vrot.slane %v3890_v53, %v6071_v31  ;;  %v3914_v35 = vrot.slane %v3906_v34, %v6071_v31 }
 0xcee   :  { %v3921_v2 = vrot.slane %v3907_v0, %v6071_v31 }
 0xcef   :  { %v3905_v12 = vcombine.low %v3897_v62, %v3904_v26 }
 0xcf0   :  { %v3922_v6 = vcombine.low %v3914_v35, %v3921_v2 }
 0xcf1   :  { %5000 = vmatprep.mubr.msk.f32.mxu0 %vm833_vm3, %v3905_v12 }
 0xcf2   :  { %5001 = vmatmul.mubr.msk.f32.vlgmr.msra.gmra.mxu0 %vm833_vm3, %v3922_v6 }
 0xda9   :  { %v5013_v13 = vpop.f32.mrf.mxu1 }
 0xdab   :  { %v4114_v20 = vpop.f32.mrf.mxu1 }
 0xdb2   :  { %v5002_v11 = vpop.f32.mrf.mxu0 }
 0xdb3   :  { %v4120_v18 = vadd.f32 %v5013_v13, %v5002_v11 }
 0xdb4   :  { %v3993_v16 = vpop.f32.mrf.mxu0 }
 0xdb5   :  { %v4142_v21 = vcombine.high %v4120_v18, %v4120_v18  ;;  %v4149_v22 = vrot.slane %v4120_v18, %v6071_v31  ;;  %v4115_v23 = vadd.f32 %v4114_v20, %v3993_v16 }
 0xdb7   :  { %v4156_v24 = vrot.slane %v4142_v21, %v6071_v31  ;;  %v4157_v25 = vcombine.high %v4149_v22, %v4149_v22  ;;  %v4178_v37 = vadd.f32 %v4671_v19, %v4149_v22  ;;  %v4125_v14 = vcombine.high %v4115_v23, %v4115_v23 }
 0xdb8   :  { %v4132_v40 = vrot.slane %v4115_v23, %v6071_v31 }
 0xdb9   :  { %v4158_v41 = vcombine.high %v4156_v24, %v4156_v24  ;;  %v4179_v42 = vadd.f32 %v4671_v19, %v4157_v25  ;;  %v4180_v1 = vadd.f32 %v4671_v19, %v4156_v24  ;;  %4186 = vst.msk [vmem:[#allocation10 + $0x8] sm:$0x3] %vm1854_vm5, %v4178_v37  ;;  %v4139_v15 = vrot.slane %v4125_v14, %v6071_v31  ;;  %v4672_v31 = vld [vmem:[%s6856_s21] ss:$0 sm:$0xff] }
 0xdba   :  { %v4140_v45 = vcombine.high %v4132_v40, %v4132_v40  ;;  %v4174_v46 = vadd.f32 %v4671_v19, %v4132_v40 }
 0xdbb   :  { %v4181_v36 = vadd.f32 %v4671_v19, %v4158_v41  ;;  %4187 = vst.msk [vmem:[#allocation10 + $0xa] sm:$0x3] %vm1854_vm5, %v4179_v42  ;;  %4188 = vst.msk [vmem:[#allocation10 + $0xc] sm:$0x3] %vm1854_vm5, %v4180_v1  ;;  %v4141_v47 = vcombine.high %v4139_v15, %v4139_v15  ;;  %v4176_v48 = vadd.f32 %v4671_v19, %v4139_v15 }
 0xdbc   :  { %v4175_v17 = vadd.f32 %v4671_v19, %v4140_v45  ;;  %4182 = vst.msk [vmem:[#allocation10] sm:$0x3] %vm1854_vm5, %v4174_v46 }
 0xdbd   :  { %4189 = vst.msk [vmem:[#allocation10 + $0xe] sm:$0x3] %vm1854_vm5, %v4181_v36  ;;  %v4177_v49 = vadd.f32 %v4671_v19, %v4141_v47  ;;  %4184 = vst.msk [vmem:[#allocation10 + $0x4] sm:$0x3] %vm1854_vm5, %v4176_v48 }
 0xdbe   :  { %4183 = vst.msk [vmem:[#allocation10 + $0x2] sm:$0x3] %vm1854_vm5, %v4175_v17 }
 0xdbf   :  { %4185 = vst.msk [vmem:[#allocation10 + $0x6] sm:$0x3] %vm1854_vm5, %v4177_v49 }
 0xdc3   :  { %v4193_v52 = vld [vmem:[#allocation10] sm:$0x3] }
 0xdc4   :  { %v4200_v53 = vadd.f32 %v4672_v31, %v4193_v52  }
 0xdc5 LB: > { %v5797_v54 = vmov 1966171168   ;;  %vm4248_vm10 = vcmask 111616   ;;  %v6782_v43 = vand.u32 127, %v358_v56  ;;  %s4673_s21 = sshll.u32 %s5752_s30, 1  ;;  %v5798_v22 = vmov 0   ;;  %s5752_s30 = sphi %s6764_s30, %s4206_s30   ;;  %v5748_v53 = vphi %v4200_v53, %v6881_v53  }
 0xdc6   : > { %v4210_v55 = vunpack.c.l.s4 %v5797_v54  ;;  %s4353_s16 = scalar_lea.vmem [#allocation10], %s4673_s21  ;;  %5293 = vset.pattern.permute.xlu1 %v5798_v22  ;;  %5292 = vset.pattern.permute.xlu0 %v5798_v22  ;;  %vm4337_vm3 = vcmask 130112   ;;  %vm4348_vm4 = vcmask 1041409   ;;  %s4351_s23 = scalar_lea.vmem [#allocation11], %s4673_s21 }
 0xdc7   : > { %v4354_v19 = vld [vmem:[%s4353_s16] sm:$0x3]  ;;  %s4206_s30 = sadd.s32 1, %s5752_s30  }
 0xdc8   : > { %v4211_v57 = vunpack.c.0.s8 %v4210_v55  ;;  %v4359_v20 = vrot.slane %v4354_v19, %v6086_v50  ;;  %v4370_v21 = vrot.slane %v4354_v19, %v6089_v51  ;;  %p4203_p3 = scmp.ge.s32.totalorder %s4206_s30, 8  }
 0xdc9   :  { %vm4452_vm8 = vcmp.eq.s32.totalorder (%p4203_p3), %v6782_v43, 7 }
 0xdca   : > { %v4214_v58 = vsub.s32 %v4211_v57, %v6068_v63 }
 0xdcc   : > { %v4215_v59 = vrot.slane %v5748_v53, %v4214_v58 }
 0xdce   : > { %v4223_v60 = vrot.slane %v4215_v59, %v4214_v58  ;;  %v4216_v61 = vcombine.high %v4215_v59, %v4215_v59 }
 0xdd0   : > { %v4234_v62 = vrot.slane %v4223_v60, %v6086_v50  ;;  %v4230_v26 = vrot.slane %v4216_v61, %v4214_v58 }
 0xdd2   : > { %v4241_v29 = vadd.f32 %v4234_v62, %v6740_v9  ;;  %v4242_v30 = vadd.f32 %v4234_v62, %v6742_v10  ;;  %v4238_v32 = vrot.slane %v4230_v26, %v6086_v50 }
 0xdd4   : > { %v4245_v33 = vsel %vm1985_vm7, %v4241_v29, -inf  ;;  %v4243_v28 = vadd.f32 %v4238_v32, %v6740_v9  ;;  %v4244_v34 = vadd.f32 %v4238_v32, %v6742_v10  ;;  %v4249_v0 = vsel %vm4248_vm10, %v4242_v30, -inf }
 0xdd5   : > { %4246 = vmax.xlane.f32.xlu0 %v4245_v33 }
 0xdd6   : > { %v4252_v44 = vsel %vm1985_vm7, %v4243_v28, -inf  ;;  %v4255_v39 = vsel %vm4248_vm10, %v4244_v34, -inf }
 0xdd7   : > { %4253 = vmax.xlane.f32.xlu1 %v4252_v44 }
 0xdd9   : > { %4250 = vmax.xlane.f32.xlu0 %v4249_v0  ;;  %v4330_v0 = vsub.s32 %v6782_v43, %v6068_v63 }
 0xddb   : > { %4256 = vmax.xlane.f32.xlu1 %v4255_v39 }
 0xe5e   : > { %v6784_v12 = vpop.xlane.xlu0 %4246 }
 0xe5f   : > { %vm4260_vm11 = vcmp.eq.f32.partialorder %v4241_v29, %v6784_v12 }
 0xe60   : > { %v4264_v27 = vsel %vm4260_vm11, %v6782_v43, 14  ;;  %v4254_v38 = vpop.xlane.xlu1 %4253 }
 0xe61   : > { %vm4262_vm12 = vcmp.eq.f32.partialorder %v4243_v28, %v4254_v38  ;;  %v4268_v35 = vsel %vm1985_vm7, %v4264_v27, 2147483647  ;;  %v4332_v28 = vadd.s32 4294967288, %v6782_v43 }
 0xe62   : > { %v4251_v2 = vpop.xlane.xlu0 %4250  ;;  %v4266_v3 = vsel %vm4262_vm12, %v6782_v43, 14  ;;  %v4270_v5 = vshra.s32 %v4268_v35, 16  ;;  %v4269_v40 = vand.u32 65535, %v4268_v35 }
 0xe63   : > { %vm4261_vm13 = vcmp.eq.f32.partialorder %v4242_v30, %v4251_v2  ;;  %v4298_v4 = vsel %vm1985_vm7, %v4266_v3, 2147483647 }
 0xe64   : > { %v4265_v6 = vsel %vm4261_vm13, %v6782_v43, 14  ;;  %v4272_v7 = vcvt.s32.f32 %v4270_v5  ;;  %v4300_v8 = vshra.s32 %v4298_v4, 16  ;;  %v4257_v23 = vpop.xlane.xlu1 %4256  ;;  %v4271_v42 = vcvt.s32.f32 %v4269_v40 }
 0xe65   : > { %v4283_v11 = vsel %vm4248_vm10, %v4265_v6, 2147483647  ;;  %vm4263_vm14 = vcmp.eq.f32.partialorder %v4244_v34, %v4257_v23  ;;  %v4299_v1 = vand.u32 65535, %v4298_v4 }
 0xe66   : > { %4273 = vmin.xlane.f32.xlu0 %v4272_v7  ;;  %v4285_v13 = vshra.s32 %v4283_v11, 16  ;;  %v4302_v16 = vcvt.s32.f32 %v4300_v8  ;;  %v4267_v24 = vsel %vm4263_vm14, %v6782_v43, 14  ;;  %v4284_v15 = vand.u32 65535, %v4283_v11 }
 0xe67   : > { %v4313_v25 = vsel %vm4248_vm10, %v4267_v24, 2147483647  ;;  %v4301_v47 = vcvt.s32.f32 %v4299_v1 }
 0xe68   : > { %v4287_v18 = vcvt.s32.f32 %v4285_v13  ;;  %v4315_v37 = vshra.s32 %v4313_v25, 16  ;;  %v4286_v48 = vcvt.s32.f32 %v4284_v15  ;;  %v4314_v55 = vand.u32 65535, %v4313_v25 }
 0xe6a   : > { %4288 = vmin.xlane.f32.xlu1 %v4287_v18  ;;  %4303 = vmin.xlane.f32.xlu0 %v4302_v16  ;;  %v4317_v14 = vcvt.s32.f32 %v4315_v37  ;;  %v4316_v58 = vcvt.s32.f32 %v4314_v55 }
 0xe7b   : > { %4365 = vbcast.lane.b32.xlu1 %v4359_v20, 264 }
 0xe7f   : > { %4372 = vbcast.lane.b32.xlu1 %v4370_v21, 256 }
 0xe80   : > { %4361 = vbcast.lane.b32.xlu0 %v4359_v20, 256 }
 0xea3   : > { %4318 = vmin.xlane.f32.xlu1 %v4317_v14 }
 0xeb4   : > { %4376 = vbcast.lane.b32.xlu1 %v4370_v21, 264 }
 0xeef   : > { %v4274_v41 = vpop.xlane.xlu0 %4273 }
 0xef0   : > { %vm4275_vm15 = vcmp.eq.f32.partialorder %v4272_v7, %v4274_v41  ;;  %v4280_v29 = vcvt.f32.s32 %v4274_v41 }
 0xef1   : > { %v4276_v45 = vsel %vm4275_vm15, %v4271_v42, inf }
 0xef2   : > { %4277 = vmin.xlane.f32.xlu0 %v4276_v45  ;;  %v4281_v34 = vshll.u32 %v4280_v29, 16 }
 0xef3   : > { %v4304_v46 = vpop.xlane.xlu0 %4303  ;;  %v4289_v36 = vpop.xlane.xlu1 %4288 }
 0xef4   : > { %vm4305_vm0 = vcmp.eq.f32.partialorder %v4302_v16, %v4304_v46  ;;  %vm4290_vm1 = vcmp.eq.f32.partialorder %v4287_v18, %v4289_v36  ;;  %v4295_v32 = vcvt.f32.s32 %v4289_v36  ;;  %v4310_v7 = vcvt.f32.s32 %v4304_v46 }
 0xef5   : > { %v4306_v17 = vsel %vm4305_vm0, %v4301_v47, inf  ;;  %v4291_v49 = vsel %vm4290_vm1, %v4286_v48, inf  ;;  %v4674_v47 = vld [vmem:[%s6857_s22] ss:$0 sm:$0xff] (%p4203_p3)  ;;  %s6824_s22 = smov (%p4203_p3), 0  }
 0xef6   : > { %4307 = vmin.xlane.f32.xlu0 %v4306_v17  ;;  %4292 = vmin.xlane.f32.xlu1 %v4291_v49  ;;  %v4296_v39 = vshll.u32 %v4295_v32, 16  ;;  %v4311_v13 = vshll.u32 %v4310_v7, 16 }
 0xef7   : > { %v4366_v31 = vpop.permute.xlu1 %4365  ;;  %v4362_v62 = vpop.permute.xlu0 %4361 }
 0xef8   : > { %v4383_v52 = vadd.f32 %v4366_v31, %v4251_v2  ;;  %v4382_v26 = vadd.f32 %v4362_v62, %v6784_v12 }
 0xefb   : > { %v4373_v53 = vpop.permute.xlu1 %4372 }
 0xefc   : > { %v4384_v54 = vadd.f32 %v4373_v53, %v4254_v38  ;;  %v4335_v38 = vsub.s32 %v4332_v28, %v6068_v63 }
 0xf07   : > { %4394 = vperm.xlu1 %5293, %v4383_v52  }
 0xf0b   : > { %4397 = vperm.xlu1 %5293, %v4384_v54  }
 0xf2c   : > { %v4319_v57 = vpop.xlane.xlu1 %4318 }
 0xf2d   : > { %vm4320_vm2 = vcmp.eq.f32.partialorder %v4317_v14, %v4319_v57  ;;  %v4325_v8 = vcvt.f32.s32 %v4319_v57 }
 0xf2e   : > { %v4321_v59 = vsel %vm4320_vm2, %v4316_v58, inf }
 0xf2f   : > { %4322 = vmin.xlane.f32.xlu0 %v4321_v59  ;;  %v4326_v19 = vshll.u32 %v4325_v8, 16 }
 0xf30   : > { %v4377_v60 = vpop.permute.xlu1 %4376 }
 0xf31   : > { %v4385_v61 = vadd.f32 %v4377_v60, %v4257_v23 }
 0xf33   : > { %4400 = vperm.xlu1 %5293, %v4385_v61  }
 0xf45   : > { %4391 = vperm.xlu0 %5292, %v4382_v26  }
 0xf7b   : > { %v4278_v30 = vpop.xlane.xlu0 %4277 }
 0xf7c   : > { %v4279_v33 = vcvt.f32.s32 %v4278_v30 }
 0xf7e   : > { %v4282_v27 = vadd.s32 %v4281_v34, %v4279_v33 }
 0xf7f   : > { %v4293_v44 = vpop.xlane.xlu1 %4292  ;;  %v4308_v4 = vpop.xlane.xlu0 %4307 }
 0xf80   : > { %v4294_v35 = vcvt.f32.s32 %v4293_v44  ;;  %v4331_v12 = vrot.slane %v4282_v27, %v4330_v0  ;;  %v4309_v11 = vcvt.f32.s32 %v4308_v4 }
 0xf82   : > { %v4297_v2 = vadd.s32 %v4296_v39, %v4294_v35  ;;  %v4312_v20 = vadd.s32 %v4311_v13, %v4309_v11 }
 0xf83   : > { %v4395_v6 = vpop.permute.xlu1 %4394 }
 0xf84   : > { %v4336_v3 = vrot.slane %v4297_v2, %v4335_v38  ;;  %v4342_v24 = vrot.slane %v4312_v20, %v4330_v0  ;;  %v4409_v42 = vrot.slane %v4395_v6, %v4335_v38 }
 0xf86   : > { %v4338_v5 = vsel %vm4337_vm3, %v4336_v3, %v4331_v12 }
 0xf87   : > { %v4398_v16 = vpop.permute.xlu1 %4397 }
 0xf88   : > { %v4414_v1 = vrot.slane %v4398_v16, %v4330_v0 }
 0xfae   : > { %v4401_v23 = vpop.permute.xlu1 %4400 }
 0xfaf   : > { %v4418_v37 = vrot.slane %v4401_v23, %v4335_v38 }
 0xfb1   : > { %v4419_v45 = vsel %vm4337_vm3, %v4418_v37, %v4414_v1 }
 0xfb8   : > { %v4323_v18 = vpop.xlane.xlu0 %4322 }
 0xfb9   : > { %v4324_v21 = vcvt.f32.s32 %v4323_v18 }
 0xfbb   : > { %v4327_v22 = vadd.s32 %v4326_v19, %v4324_v21 }
 0xfbd   : > { %v4346_v25 = vrot.slane %v4327_v22, %v4335_v38 }
 0xfbf   : > { %v4347_v14 = vsel %vm4337_vm3, %v4346_v25, %v4342_v24 }
 0xfc0   : > { %v4392_v40 = vpop.permute.xlu0 %4391  ;;  %v4349_v41 = vsel %vm4348_vm4, %v4347_v14, %v4338_v5 }
 0xfc1   : > { %4352 = vst.msk [vmem:[%s4351_s23] sm:$0x3] %vm1854_vm5, %v4349_v41  ;;  %v4405_v15 = vrot.slane %v4392_v40, %v4330_v0  ;;  %4205 = sbr.rel (!%p4203_p3) target bundleno = 3525 (0xdc5), region = 271 }
 0xfc3   : > { %v4410_v46 = vsel %vm4337_vm3, %v4409_v42, %v4405_v15 }
 0xfc4   : > { %v4420_v36 = vsel %vm4348_vm4, %v4419_v45, %v4410_v46  }
 0xfc5   : > { %v6881_v53 = vmov %v4420_v36  ;;  %v4429_v48 = vadd.f32 (%p4203_p3), %v4674_v47, %v4420_v36 }
 0xfc7   :  { %v4432_v17 = vsel %vm1854_vm5, %v4429_v48, -inf }
 0xfc8   :  { %4433 = vmax.xlane.f32.xlu0 %v4432_v17 }
0x1051   :  { %v4434_v49 = vpop.xlane.xlu0 %4433 }
0x1052   :  { %vm4435_vm6 = vcmp.eq.f32.partialorder %v4429_v48, %v4434_v49 }
0x1053   :  { %v4436_v31 = vsel %vm4435_vm6, %v6782_v43, 14 }
0x1054   :  { %v4437_v52 = vsel %vm1854_vm5, %v4436_v31, 2147483647 }
0x1055   :  { %v4439_v53 = vshra.s32 %v4437_v52, 16  ;;  %v4438_v55 = vand.u32 65535, %v4437_v52 }
0x1057   :  { %v4441_v54 = vcvt.s32.f32 %v4439_v53  ;;  %v4440_v58 = vcvt.s32.f32 %v4438_v55 }
0x1059   :  { %4442 = vmin.xlane.f32.xlu0 %v4441_v54 }
0x10e2   :  { %v4443_v57 = vpop.xlane.xlu0 %4442 }
0x10e3   :  { %vm4444_vm7 = vcmp.eq.f32.partialorder %v4441_v54, %v4443_v57  ;;  %v4449_v63 = vcvt.f32.s32 %v4443_v57 }
0x10e4   :  { %v4445_v56 = vsel %vm4444_vm7, %v4440_v58, inf }
0x10e5   :  { %4446 = vmin.xlane.f32.xlu1 %v4445_v56  ;;  %v4450_v51 = vshll.u32 %v4449_v63, 16 }
0x116e   :  { %v4447_v50 = vpop.xlane.xlu1 %4446 }
0x116f   :  { %v4448_v9 = vcvt.f32.s32 %v4447_v50 }
0x1171   :  { %v4451_v10 = vadd.s32 %v4450_v51, %v4448_v9  }
0x1173   :  { %v4453_v59 = vsel %vm4452_vm8, %v4451_v10, 0   ;;  %v5758_v61 = vmov %v4451_v10  }
0x1174   :  { %v5754_v60 = vmov %v4453_v59  }
0x1175 LB: > { %s4462_s3 = ssub.s32 7, %s5764_s22  ;;  %vm4466_vm9 = vcmp.eq.s32.totalorder %v6782_v43, %v5760_v61  ;;  %s4481_s27 = ssub.s32 6, %s5764_s22  ;;  %s5764_s22 = sphi %s6824_s22, %s4459_s22   ;;  %v5760_v61 = vphi %v5758_v61, %v4480_v61   ;;  %v5756_v60 = vphi %v5754_v60, %v5755_v60  }
0x1176   : > { %s4675_s1 = sshll.u32 %s4462_s3, 1  ;;  %v4482_v44 = vstv %s4481_s27  ;;  %s4459_s22 = sadd.s32 1, %s5764_s22  }
0x1177   : > { %s4464_s26 = scalar_lea.vmem [#allocation11], %s4675_s1  ;;  %vm4483_vm10 = vcmp.eq.s32.totalorder %v6782_v43, %v4482_v44  ;;  %p4456_p4 = scmp.ge.s32.totalorder %s4459_s22, 7  }
0x1178   : > { %v4465_v62 = vld [vmem:[%s4464_s26] sm:$0x3]  ;;  %vm4485_vm11 = vcmask (%p4456_p4), 58368   ;;  %s5799_s11 = smov (%p4456_p4), [#allocation39]  }
0x1179   : > { %v4467_v26 = vsel %vm4466_vm9, %v4465_v62, 0  ;;  %s4493_s9 = sshll.u32 (%p4456_p4), %s5799_s11, 4  ;;  %s4494_s9 = int_to_ptr.vmem [resolvable:$true] %s4493_s9 }
0x117a   : > { %v4468_v29 = vsel %vm1854_vm5, %v4467_v26, 0  ;;  %s5638_s17 = scalar_lea.vmem (%p4456_p4), %s4494_s9, 32  ;;  %p5643_p6 = scmp.lt.s32.totalorder (%p4456_p4), %s4494_s9, %s4494_s9 }
0x117b   : > { %v4470_v30 = vshrl.u32 %v4468_v29, 16  ;;  %v4469_v32 = vand.u32 65535, %v4468_v29  ;;  %p5639_p5 = scmp.ne.s32.totalorder (%p4456_p4), %s4494_s9, %s5638_s17  ;;  %p5644_p7 = scmp.lt.s32.totalorder (%p4456_p4), %s5638_s17, %s5638_s17 }
0x117d   : > { %v4472_v33 = vcvt.s32.f32 %v4470_v30  ;;  %v4471_v28 = vcvt.s32.f32 %v4469_v32  ;;  %p5645_p8 = por (%p4456_p4), %p5644_p7, %p5643_p6 }
0x117f   : > { %4475 = vadd.xlane.f32.xlu0 %v4472_v33  ;;  %p5646_p9 = pnand (%p4456_p4), %p5645_p8, %p5639_p5 }
0x1183   : > { %4473 = vadd.xlane.f32.xlu0 %v4471_v28 }
0x1208   : > { %v4476_v34 = vpop.xlane.xlu0 %4475 }
0x1209   : > { %v4478_v0 = vcvt.f32.s32 %v4476_v34 }
0x120b   : > { %v4479_v27 = vshll.u32 %v4478_v0, 16 }
0x120c   : > { %v4474_v39 = vpop.xlane.xlu0 %4473 }
0x120d   : > { %v4477_v38 = vcvt.f32.s32 %v4474_v39 }
0x120e   :  { %4458 = sbr.rel (!%p4456_p4) target bundleno = 4469 (0x1175), region = 282 }
0x120f   : > { %v4480_v61 = vadd.s32 %v4479_v27, %v4477_v38  }
0x1211   : > { %v4484_v35 = vsel %vm4483_vm10, %v4480_v61, %v5756_v60  }
0x1212   : > { %v5755_v60 = vmov %v4484_v35   ;;  %4486 = vst.msk [vmem:[#allocation39] sm:$0x3] (%p4456_p4), %vm4485_vm11, %v4484_v35 }
0x1213   :  { %5649 = shalt.err (!%p5646_p9)
}
0x1214   :  { %4496 = dma.vmem_to_hbm [thread:$0]  %s4494_s9, 32, %s6859_s24, [#allocation14]  }
0x1215   :  { %5720 = dma.done.wait [#allocation14], 32  }
0x1216   :  { %5721 = vsyncadd [#allocation14], 4294967264 }
0x1217   :  { %4500 = vsyncpa [#allocation13], 1 }
0x1218   :  { %4501 = vsyncpa [#allocation16], 1 }
0x1219   :  { %4502 = vsyncpa [#allocation19], 1 }
0x121a   :  { %4503 = vsyncpa [#allocation22], 1 }
0x121b   :  { %4504 = vsyncpa [#allocation25], 1 }
0x121c   :  { %4505 = vsyncpa [#allocation28], 1 }
0x121d   :  { %4506 = vsyncpa [#allocation31], 1 }
0x121e   :  { %4507 = vsyncpa [#allocation34], 1 }
0x121f   :  { %4508 = vsyncpa [#allocation37], 1 }
0x1220   :  { %4509 = vsyncpa [#allocation14], 1 }

</bundles_post_ra>
